<compile_context>
chip_gen: v5e
topology: v5e:2x2
jax: 0.10.0
libtpu: 0.0.40
codegen_flags: <defaults>
</compile_context>

<pallas_src>
import math

import jax
import jax.numpy as jnp
from jax.experimental import pallas as pl
from jax.experimental.pallas import tpu as pltpu

_LANE = 128
_TM_MAX = 512


# ----------------------------------------------------------------------------
# Pallas kernel: fused (patches @ W + b) with per-channel clip (relu/hardtanh/id)
# ----------------------------------------------------------------------------
def _matmul_bias_clip_kernel(p_ref, w_ref, b_ref, lo_ref, hi_ref, o_ref):
    acc = jnp.dot(p_ref[...], w_ref[...], preferred_element_type=jnp.float32)
    acc = acc + b_ref[...]                                    # (1, N) broadcast
    acc = jnp.minimum(jnp.maximum(acc, lo_ref[...]), hi_ref[...])
    o_ref[...] = acc.astype(o_ref.dtype)


def _round_up(x, m):
    return ((x + m - 1) // m) * m


def fused_matmul(patches, w, b, lo, hi, out_dtype):
    """patches: (M, K) bf16, w: (K, N) bf16, b/lo/hi: (N,) f32 -> (M, N)."""
    M, K = patches.shape
    N = w.shape[1]

    # Lane-dense output: pad Cout to a multiple of 128.
    n_pad = _round_up(max(N, _LANE), _LANE)
    # Tile over M; TM multiple of 16 (bf16 sublane packing), capped for VMEM
    # (2x double-buffered (TM,K)+(TM,N_pad) + weights stays well under the
    # 32 MiB default scoped VMEM on all generations, incl. v7x's 64 MiB phys).
    tm = _TM_MAX if M >= _TM_MAX else _round_up(M, 16)
    m_pad = _round_up(M, tm)

    if m_pad != M:
        patches = jnp.pad(patches, ((0, m_pad - M), (0, 0)))
    if n_pad != N:
        w = jnp.pad(w, ((0, 0), (0, n_pad - N)))
        b = jnp.pad(b, (0, n_pad - N))
        lo = jnp.pad(lo, (0, n_pad - N))
        hi = jnp.pad(hi, (0, n_pad - N))

    b2 = b.reshape(1, n_pad).astype(jnp.float32)
    lo2 = lo.reshape(1, n_pad).astype(jnp.float32)
    hi2 = hi.reshape(1, n_pad).astype(jnp.float32)

    cost = pl.CostEstimate(
        flops=2 * m_pad * K * n_pad,
        transcendentals=0,
        bytes_accessed=(patches.size * patches.dtype.itemsize
                        + w.size * w.dtype.itemsize
                        + m_pad * n_pad * jnp.dtype(out_dtype).itemsize),
    )

    out = pl.pallas_call(
        _matmul_bias_clip_kernel,
        out_shape=jax.ShapeDtypeStruct((m_pad, n_pad), out_dtype),
        grid=(m_pad // tm,),
        in_specs=[
            pl.BlockSpec((tm, K), lambda i: (i, 0)),
            pl.BlockSpec((K, n_pad), lambda i: (0, 0)),
            pl.BlockSpec((1, n_pad), lambda i: (0, 0)),
            pl.BlockSpec((1, n_pad), lambda i: (0, 0)),
            pl.BlockSpec((1, n_pad), lambda i: (0, 0)),
        ],
        out_specs=pl.BlockSpec((tm, n_pad), lambda i: (i, 0)),
        compiler_params=pltpu.CompilerParams(
            dimension_semantics=("parallel",)),
        cost_estimate=cost,
    )(patches, w, b2, lo2, hi2)
    return out[:M, :N]


# ----------------------------------------------------------------------------
# Conv2d = im2col (XLA glue) + fused Pallas matmul kernel
# ----------------------------------------------------------------------------
# TODO(synk): fold the im2col (patch extraction) into the Pallas kernel via an
# in-kernel unrolled (kh, kw) tap accumulation so the kh*kw-expanded patches
# never materialize in HBM (biggest remaining HBM-traffic win at large batch).
def _extract_patches(x, kh, kw, stride, padding):
    """x: (B, H, W, C) -> (B, OH, OW, kh*kw*C), flattened (kh, kw, cin) order."""
    B, H, W, C = x.shape
    if padding > 0:
        x = jnp.pad(x, ((0, 0), (padding, padding), (padding, padding), (0, 0)))
    Hp, Wp = H + 2 * padding, W + 2 * padding
    OH = (Hp - kh) // stride + 1
    OW = (Wp - kw) // stride + 1
    cols = []
    for i in range(kh):
        for j in range(kw):
            sl = x[:, i:i + stride * (OH - 1) + 1:stride,
                      j:j + stride * (OW - 1) + 1:stride, :]
            cols.append(sl)
    patches = jnp.stack(cols, axis=3)                     # (B, OH, OW, kh*kw, C)
    return patches.reshape(B, OH, OW, kh * kw * C), OH, OW


def conv2d_pallas(x, w, b, stride, padding, lo, hi, out_dtype):
    """x: (B, H, W, Cin) NHWC;  w: (Cout, Cin, KH, KW) PyTorch layout."""
    Cout, Cin, KH, KW = w.shape
    B = x.shape[0]
    patches, OH, OW = _extract_patches(x, KH, KW, stride, padding)
    K = KH * KW * Cin
    p2 = patches.reshape(B * OH * OW, K).astype(jnp.bfloat16)
    w2 = jnp.transpose(w, (2, 3, 1, 0)).reshape(K, Cout).astype(jnp.bfloat16)
    out = fused_matmul(p2, w2, b, lo, hi, out_dtype)
    return out.reshape(B, OH, OW, Cout)


def _relu_bounds(cout):
    return (jnp.zeros((cout,), jnp.float32),
            jnp.full((cout,), jnp.inf, jnp.float32))


# ----------------------------------------------------------------------------
# Parameter init (deterministic, PyTorch-default-style uniform)
# ----------------------------------------------------------------------------
def _init_conv(key, cout, cin, kh, kw):
    kw_key, kb_key = jax.random.split(key)
    fan_in = cin * kh * kw
    bound = 1.0 / math.sqrt(fan_in)
    w = jax.random.uniform(kw_key, (cout, cin, kh, kw), jnp.float32, -bound, bound)
    b = jax.random.uniform(kb_key, (cout,), jnp.float32, -bound, bound)
    return w, b


def init_params(key, z_dim):
    keys = jax.random.split(key, 6)
    p = {}
    p["w1"], p["b1"] = _init_conv(keys[0], 32, 1, 3, 3)
    p["w2"], p["b2"] = _init_conv(keys[1], 64, 32, 5, 5)
    p["w3"], p["b3"] = _init_conv(keys[2], 128, 64, 5, 5)
    p["w4"], p["b4"] = _init_conv(keys[3], 256, 128, 3, 3)
    p["wm"], p["bm"] = _init_conv(keys[4], z_dim, 256, 3, 3)
    p["wv"], p["bv"] = _init_conv(keys[5], z_dim, 256, 3, 3)
    return p


# ----------------------------------------------------------------------------
# Forward pass (matches EncoderMnistConv.forward)
# ----------------------------------------------------------------------------
@jax.jit
def encoder_mnist_conv_forward(x, params):
    # PyTorch: if len(x.shape) < 3: x = x.reshape(-1, 1, 28, 28)
    if x.ndim < 3:
        x = x.reshape(-1, 1, 28, 28)
    # NCHW -> NHWC; hidden activations in bf16 (MXU-native), accum/clip in f32.
    x = jnp.transpose(x, (0, 2, 3, 1)).astype(jnp.bfloat16)

    lo, hi = _relu_bounds(32)
    h = conv2d_pallas(x, params["w1"], params["b1"], 1, 1, lo, hi, jnp.bfloat16)
    lo, hi = _relu_bounds(64)
    h = conv2d_pallas(h, params["w2"], params["b2"], 2, 0, lo, hi, jnp.bfloat16)
    lo, hi = _relu_bounds(128)
    h = conv2d_pallas(h, params["w3"], params["b3"], 2, 0, lo, hi, jnp.bfloat16)
    lo, hi = _relu_bounds(256)
    h = conv2d_pallas(h, params["w4"], params["b4"], 2, 1, lo, hi, jnp.bfloat16)

    # Fused mean + logvar head: one conv with 2*z output channels; per-channel
    # clip = identity for the mean half, Hardtanh(-10, 4) for the logvar half.
    z = params["wm"].shape[0]
    w_head = jnp.concatenate([params["wm"], params["wv"]], axis=0)
    b_head = jnp.concatenate([params["bm"], params["bv"]], axis=0)
    lo_head = jnp.concatenate([jnp.full((z,), -jnp.inf, jnp.float32),
                               jnp.full((z,), -10.0, jnp.float32)])
    hi_head = jnp.concatenate([jnp.full((z,), jnp.inf, jnp.float32),
                               jnp.full((z,), 4.0, jnp.float32)])
    head = conv2d_pallas(h, w_head, b_head, 2, 1, lo_head, hi_head, jnp.float32)

    B = head.shape[0]
    # Final spatial size is 1x1 for 28x28 inputs, so NHWC flatten == NCHW flatten.
    head = head.reshape(B, 2 * z)
    z_q_mean = head[:, :z]
    z_q_logvar = head[:, z:]
    return z_q_mean, z_q_logvar


# ----------------------------------------------------------------------------
if __name__ == "__main__":
    key = jax.random.PRNGKey(0)
    k_params, k_x = jax.random.split(key)

    z_dim = 16
    batch = 2
    params = init_params(k_params, z_dim)
    x = jax.random.normal(k_x, (batch, 1, 28, 28), dtype=jnp.float32)

    z_mean, z_logvar = encoder_mnist_conv_forward(x, params)
    jax.block_until_ready((z_mean, z_logvar))

    assert z_mean.shape == (batch, z_dim), z_mean.shape
    assert z_logvar.shape == (batch, z_dim), z_logvar.shape
    assert bool(jnp.all(jnp.isfinite(z_mean)))
    assert bool(jnp.all(z_logvar >= -10.0)) and bool(jnp.all(z_logvar <= 4.0))

    print("KERNEL_OK")
</pallas_src>

<mosaic_0001>
module attributes {stable_mosaic.version = 11 : i64} {
  func.func @_matmul_bias_clip_kernel(%arg0: i32, %arg1: memref<512x9xbf16, #tpu.memory_space<vmem>>, %arg2: memref<9x128xbf16, #tpu.memory_space<vmem>>, %arg3: memref<1x128xf32, #tpu.memory_space<vmem>>, %arg4: memref<1x128xf32, #tpu.memory_space<vmem>>, %arg5: memref<1x128xf32, #tpu.memory_space<vmem>>, %arg6: memref<512x128xbf16, #tpu.memory_space<vmem>>) attributes {dimension_semantics = [#tpu.dimension_semantics<parallel>], iteration_bounds = array<i64: 4>, scalar_prefetch = 0 : i64, scratch_operands = 0 : i64, tpu.core_type = #tpu.core_type<tc>, window_params = [{transform_indices = @transform_0, window_bounds = array<i64: 512, 9>}, {pipeline_mode = #tpu.pipeline_mode<synchronous>, transform_indices = @transform_1, window_bounds = array<i64: 9, 128>}, {pipeline_mode = #tpu.pipeline_mode<synchronous>, transform_indices = @transform_2, window_bounds = array<i64: 1, 128>}, {pipeline_mode = #tpu.pipeline_mode<synchronous>, transform_indices = @transform_3, window_bounds = array<i64: 1, 128>}, {pipeline_mode = #tpu.pipeline_mode<synchronous>, transform_indices = @transform_4, window_bounds = array<i64: 1, 128>}, {transform_indices = @transform_5, window_bounds = array<i64: 512, 128>}]} {
    %c0 = arith.constant 0 : index
    %c0_0 = arith.constant 0 : index
    %0 = vector.load %arg1[%c0, %c0_0] : memref<512x9xbf16, #tpu.memory_space<vmem>>, vector<512x9xbf16>
    %c0_1 = arith.constant 0 : index
    %c0_2 = arith.constant 0 : index
    %1 = vector.load %arg2[%c0_1, %c0_2] : memref<9x128xbf16, #tpu.memory_space<vmem>>, vector<9x128xbf16>
    %cst = arith.constant dense<0.000000e+00> : vector<512x128xf32>
    %2 = tpu.matmul %0, %1, %cst {dimension_numbers = #tpu.dot_dimension_numbers<[1], [0], [0], [1], [0, 0, 1, 1], [], []>} : vector<512x9xbf16>, vector<9x128xbf16>, vector<512x128xf32> -> vector<512x128xf32>
    %c0_3 = arith.constant 0 : index
    %c0_4 = arith.constant 0 : index
    %3 = vector.load %arg3[%c0_3, %c0_4] : memref<1x128xf32, #tpu.memory_space<vmem>>, vector<1x128xf32>
    %4 = vector.broadcast %3 : vector<1x128xf32> to vector<512x128xf32>
    %5 = arith.addf %2, %4 : vector<512x128xf32>
    %c0_5 = arith.constant 0 : index
    %c0_6 = arith.constant 0 : index
    %6 = vector.load %arg4[%c0_5, %c0_6] : memref<1x128xf32, #tpu.memory_space<vmem>>, vector<1x128xf32>
    %7 = vector.broadcast %6 : vector<1x128xf32> to vector<512x128xf32>
    %8 = arith.maximumf %5, %7 : vector<512x128xf32>
    %c0_7 = arith.constant 0 : index
    %c0_8 = arith.constant 0 : index
    %9 = vector.load %arg5[%c0_7, %c0_8] : memref<1x128xf32, #tpu.memory_space<vmem>>, vector<1x128xf32>
    %10 = vector.broadcast %9 : vector<1x128xf32> to vector<512x128xf32>
    %11 = arith.minimumf %8, %10 : vector<512x128xf32>
    %12 = arith.truncf %11 : vector<512x128xf32> to vector<512x128xbf16>
    %c0_9 = arith.constant 0 : index
    %c0_10 = arith.constant 0 : index
    %13 = vector.load %arg6[%c0_9, %c0_10] : memref<512x128xbf16, #tpu.memory_space<vmem>>, vector<512x128xbf16>
    tpu.vector_store %arg6[%c0_9, %c0_10], %12 {strides = array<i32>} : memref<512x128xbf16, #tpu.memory_space<vmem>>, vector<512x128xbf16>,
    return
  }
  func.func @transform_0(%arg0: i32) -> (i32, i32) {
    %c0_i32 = arith.constant 0 : i32
    %c0_i32_0 = arith.constant 0 : i32
    return %arg0, %c0_i32 : i32, i32
  }
  func.func @transform_1(%arg0: i32) -> (i32, i32) {
    %c0_i32 = arith.constant 0 : i32
    %c0_i32_0 = arith.constant 0 : i32
    %c0_i32_1 = arith.constant 0 : i32
    return %c0_i32, %c0_i32_0 : i32, i32
  }
  func.func @transform_2(%arg0: i32) -> (i32, i32) {
    %c0_i32 = arith.constant 0 : i32
    %c0_i32_0 = arith.constant 0 : i32
    %c0_i32_1 = arith.constant 0 : i32
    return %c0_i32, %c0_i32_0 : i32, i32
  }
  func.func @transform_3(%arg0: i32) -> (i32, i32) {
    %c0_i32 = arith.constant 0 : i32
    %c0_i32_0 = arith.constant 0 : i32
    %c0_i32_1 = arith.constant 0 : i32
    return %c0_i32, %c0_i32_0 : i32, i32
  }
  func.func @transform_4(%arg0: i32) -> (i32, i32) {
    %c0_i32 = arith.constant 0 : i32
    %c0_i32_0 = arith.constant 0 : i32
    %c0_i32_1 = arith.constant 0 : i32
    return %c0_i32, %c0_i32_0 : i32, i32
  }
  func.func @transform_5(%arg0: i32) -> (i32, i32) {
    %c0_i32 = arith.constant 0 : i32
    %c0_i32_0 = arith.constant 0 : i32
    return %arg0, %c0_i32 : i32, i32
  }
}

module attributes {stable_mosaic.version = 11 : i64} {
  func.func @_matmul_bias_clip_kernel(%arg0: i32, %arg1: memref<288x800xbf16, #tpu.memory_space<vmem>>, %arg2: memref<800x128xbf16, #tpu.memory_space<vmem>>, %arg3: memref<1x128xf32, #tpu.memory_space<vmem>>, %arg4: memref<1x128xf32, #tpu.memory_space<vmem>>, %arg5: memref<1x128xf32, #tpu.memory_space<vmem>>, %arg6: memref<288x128xbf16, #tpu.memory_space<vmem>>) attributes {dimension_semantics = [#tpu.dimension_semantics<parallel>], iteration_bounds = array<i64: 1>, scalar_prefetch = 0 : i64, scratch_operands = 0 : i64, tpu.core_type = #tpu.core_type<tc>, window_params = [{transform_indices = @transform_0, window_bounds = array<i64: 288, 800>}, {pipeline_mode = #tpu.pipeline_mode<synchronous>, transform_indices = @transform_1, window_bounds = array<i64: 800, 128>}, {pipeline_mode = #tpu.pipeline_mode<synchronous>, transform_indices = @transform_2, window_bounds = array<i64: 1, 128>}, {pipeline_mode = #tpu.pipeline_mode<synchronous>, transform_indices = @transform_3, window_bounds = array<i64: 1, 128>}, {pipeline_mode = #tpu.pipeline_mode<synchronous>, transform_indices = @transform_4, window_bounds = array<i64: 1, 128>}, {transform_indices = @transform_5, window_bounds = array<i64: 288, 128>}]} {
    %c0 = arith.constant 0 : index
    %c0_0 = arith.constant 0 : index
    %0 = vector.load %arg1[%c0, %c0_0] : memref<288x800xbf16, #tpu.memory_space<vmem>>, vector<288x800xbf16>
    %c0_1 = arith.constant 0 : index
    %c0_2 = arith.constant 0 : index
    %1 = vector.load %arg2[%c0_1, %c0_2] : memref<800x128xbf16, #tpu.memory_space<vmem>>, vector<800x128xbf16>
    %cst = arith.constant dense<0.000000e+00> : vector<288x128xf32>
    %2 = tpu.matmul %0, %1, %cst {dimension_numbers = #tpu.dot_dimension_numbers<[1], [0], [0], [1], [0, 0, 1, 1], [], []>} : vector<288x800xbf16>, vector<800x128xbf16>, vector<288x128xf32> -> vector<288x128xf32>
    %c0_3 = arith.constant 0 : index
    %c0_4 = arith.constant 0 : index
    %3 = vector.load %arg3[%c0_3, %c0_4] : memref<1x128xf32, #tpu.memory_space<vmem>>, vector<1x128xf32>
    %4 = vector.broadcast %3 : vector<1x128xf32> to vector<288x128xf32>
    %5 = arith.addf %2, %4 : vector<288x128xf32>
    %c0_5 = arith.constant 0 : index
    %c0_6 = arith.constant 0 : index
    %6 = vector.load %arg4[%c0_5, %c0_6] : memref<1x128xf32, #tpu.memory_space<vmem>>, vector<1x128xf32>
    %7 = vector.broadcast %6 : vector<1x128xf32> to vector<288x128xf32>
    %8 = arith.maximumf %5, %7 : vector<288x128xf32>
    %c0_7 = arith.constant 0 : index
    %c0_8 = arith.constant 0 : index
    %9 = vector.load %arg5[%c0_7, %c0_8] : memref<1x128xf32, #tpu.memory_space<vmem>>, vector<1x128xf32>
    %10 = vector.broadcast %9 : vector<1x128xf32> to vector<288x128xf32>
    %11 = arith.minimumf %8, %10 : vector<288x128xf32>
    %12 = arith.truncf %11 : vector<288x128xf32> to vector<288x128xbf16>
    %c0_9 = arith.constant 0 : index
    %c0_10 = arith.constant 0 : index
    %13 = vector.load %arg6[%c0_9, %c0_10] : memref<288x128xbf16, #tpu.memory_space<vmem>>, vector<288x128xbf16>
    tpu.vector_store %arg6[%c0_9, %c0_10], %12 {strides = array<i32>} : memref<288x128xbf16, #tpu.memory_space<vmem>>, vector<288x128xbf16>,
    return
  }
  func.func @transform_0(%arg0: i32) -> (i32, i32) {
    %c0_i32 = arith.constant 0 : i32
    %c0_i32_0 = arith.constant 0 : i32
    return %arg0, %c0_i32 : i32, i32
  }
  func.func @transform_1(%arg0: i32) -> (i32, i32) {
    %c0_i32 = arith.constant 0 : i32
    %c0_i32_0 = arith.constant 0 : i32
    %c0_i32_1 = arith.constant 0 : i32
    return %c0_i32, %c0_i32_0 : i32, i32
  }
  func.func @transform_2(%arg0: i32) -> (i32, i32) {
    %c0_i32 = arith.constant 0 : i32
    %c0_i32_0 = arith.constant 0 : i32
    %c0_i32_1 = arith.constant 0 : i32
    return %c0_i32, %c0_i32_0 : i32, i32
  }
  func.func @transform_3(%arg0: i32) -> (i32, i32) {
    %c0_i32 = arith.constant 0 : i32
    %c0_i32_0 = arith.constant 0 : i32
    %c0_i32_1 = arith.constant 0 : i32
    return %c0_i32, %c0_i32_0 : i32, i32
  }
  func.func @transform_4(%arg0: i32) -> (i32, i32) {
    %c0_i32 = arith.constant 0 : i32
    %c0_i32_0 = arith.constant 0 : i32
    %c0_i32_1 = arith.constant 0 : i32
    return %c0_i32, %c0_i32_0 : i32, i32
  }
  func.func @transform_5(%arg0: i32) -> (i32, i32) {
    %c0_i32 = arith.constant 0 : i32
    %c0_i32_0 = arith.constant 0 : i32
    return %arg0, %c0_i32 : i32, i32
  }
}

module attributes {stable_mosaic.version = 11 : i64} {
  func.func @_matmul_bias_clip_kernel(%arg0: i32, %arg1: memref<32x1600xbf16, #tpu.memory_space<vmem>>, %arg2: memref<1600x128xbf16, #tpu.memory_space<vmem>>, %arg3: memref<1x128xf32, #tpu.memory_space<vmem>>, %arg4: memref<1x128xf32, #tpu.memory_space<vmem>>, %arg5: memref<1x128xf32, #tpu.memory_space<vmem>>, %arg6: memref<32x128xbf16, #tpu.memory_space<vmem>>) attributes {dimension_semantics = [#tpu.dimension_semantics<parallel>], iteration_bounds = array<i64: 1>, scalar_prefetch = 0 : i64, scratch_operands = 0 : i64, tpu.core_type = #tpu.core_type<tc>, window_params = [{transform_indices = @transform_0, window_bounds = array<i64: 32, 1600>}, {pipeline_mode = #tpu.pipeline_mode<synchronous>, transform_indices = @transform_1, window_bounds = array<i64: 1600, 128>}, {pipeline_mode = #tpu.pipeline_mode<synchronous>, transform_indices = @transform_2, window_bounds = array<i64: 1, 128>}, {pipeline_mode = #tpu.pipeline_mode<synchronous>, transform_indices = @transform_3, window_bounds = array<i64: 1, 128>}, {pipeline_mode = #tpu.pipeline_mode<synchronous>, transform_indices = @transform_4, window_bounds = array<i64: 1, 128>}, {transform_indices = @transform_5, window_bounds = array<i64: 32, 128>}]} {
    %c0 = arith.constant 0 : index
    %c0_0 = arith.constant 0 : index
    %0 = vector.load %arg1[%c0, %c0_0] : memref<32x1600xbf16, #tpu.memory_space<vmem>>, vector<32x1600xbf16>
    %c0_1 = arith.constant 0 : index
    %c0_2 = arith.constant 0 : index
    %1 = vector.load %arg2[%c0_1, %c0_2] : memref<1600x128xbf16, #tpu.memory_space<vmem>>, vector<1600x128xbf16>
    %cst = arith.constant dense<0.000000e+00> : vector<32x128xf32>
    %2 = tpu.matmul %0, %1, %cst {dimension_numbers = #tpu.dot_dimension_numbers<[1], [0], [0], [1], [0, 0, 1, 1], [], []>} : vector<32x1600xbf16>, vector<1600x128xbf16>, vector<32x128xf32> -> vector<32x128xf32>
    %c0_3 = arith.constant 0 : index
    %c0_4 = arith.constant 0 : index
    %3 = vector.load %arg3[%c0_3, %c0_4] : memref<1x128xf32, #tpu.memory_space<vmem>>, vector<1x128xf32>
    %4 = vector.broadcast %3 : vector<1x128xf32> to vector<32x128xf32>
    %5 = arith.addf %2, %4 : vector<32x128xf32>
    %c0_5 = arith.constant 0 : index
    %c0_6 = arith.constant 0 : index
    %6 = vector.load %arg4[%c0_5, %c0_6] : memref<1x128xf32, #tpu.memory_space<vmem>>, vector<1x128xf32>
    %7 = vector.broadcast %6 : vector<1x128xf32> to vector<32x128xf32>
    %8 = arith.maximumf %5, %7 : vector<32x128xf32>
    %c0_7 = arith.constant 0 : index
    %c0_8 = arith.constant 0 : index
    %9 = vector.load %arg5[%c0_7, %c0_8] : memref<1x128xf32, #tpu.memory_space<vmem>>, vector<1x128xf32>
    %10 = vector.broadcast %9 : vector<1x128xf32> to vector<32x128xf32>
    %11 = arith.minimumf %8, %10 : vector<32x128xf32>
    %12 = arith.truncf %11 : vector<32x128xf32> to vector<32x128xbf16>
    %c0_9 = arith.constant 0 : index
    %c0_10 = arith.constant 0 : index
    %13 = vector.load %arg6[%c0_9, %c0_10] : memref<32x128xbf16, #tpu.memory_space<vmem>>, vector<32x128xbf16>
    tpu.vector_store %arg6[%c0_9, %c0_10], %12 {strides = array<i32>} : memref<32x128xbf16, #tpu.memory_space<vmem>>, vector<32x128xbf16>,
    return
  }
  func.func @transform_0(%arg0: i32) -> (i32, i32) {
    %c0_i32 = arith.constant 0 : i32
    %c0_i32_0 = arith.constant 0 : i32
    return %arg0, %c0_i32 : i32, i32
  }
  func.func @transform_1(%arg0: i32) -> (i32, i32) {
    %c0_i32 = arith.constant 0 : i32
    %c0_i32_0 = arith.constant 0 : i32
    %c0_i32_1 = arith.constant 0 : i32
    return %c0_i32, %c0_i32_0 : i32, i32
  }
  func.func @transform_2(%arg0: i32) -> (i32, i32) {
    %c0_i32 = arith.constant 0 : i32
    %c0_i32_0 = arith.constant 0 : i32
    %c0_i32_1 = arith.constant 0 : i32
    return %c0_i32, %c0_i32_0 : i32, i32
  }
  func.func @transform_3(%arg0: i32) -> (i32, i32) {
    %c0_i32 = arith.constant 0 : i32
    %c0_i32_0 = arith.constant 0 : i32
    %c0_i32_1 = arith.constant 0 : i32
    return %c0_i32, %c0_i32_0 : i32, i32
  }
  func.func @transform_4(%arg0: i32) -> (i32, i32) {
    %c0_i32 = arith.constant 0 : i32
    %c0_i32_0 = arith.constant 0 : i32
    %c0_i32_1 = arith.constant 0 : i32
    return %c0_i32, %c0_i32_0 : i32, i32
  }
  func.func @transform_5(%arg0: i32) -> (i32, i32) {
    %c0_i32 = arith.constant 0 : i32
    %c0_i32_0 = arith.constant 0 : i32
    return %arg0, %c0_i32 : i32, i32
  }
}

module attributes {stable_mosaic.version = 11 : i64} {
  func.func @_matmul_bias_clip_kernel(%arg0: i32, %arg1: memref<16x1152xbf16, #tpu.memory_space<vmem>>, %arg2: memref<1152x256xbf16, #tpu.memory_space<vmem>>, %arg3: memref<1x256xf32, #tpu.memory_space<vmem>>, %arg4: memref<1x256xf32, #tpu.memory_space<vmem>>, %arg5: memref<1x256xf32, #tpu.memory_space<vmem>>, %arg6: memref<16x256xbf16, #tpu.memory_space<vmem>>) attributes {dimension_semantics = [#tpu.dimension_semantics<parallel>], iteration_bounds = array<i64: 1>, scalar_prefetch = 0 : i64, scratch_operands = 0 : i64, tpu.core_type = #tpu.core_type<tc>, window_params = [{transform_indices = @transform_0, window_bounds = array<i64: 16, 1152>}, {pipeline_mode = #tpu.pipeline_mode<synchronous>, transform_indices = @transform_1, window_bounds = array<i64: 1152, 256>}, {pipeline_mode = #tpu.pipeline_mode<synchronous>, transform_indices = @transform_2, window_bounds = array<i64: 1, 256>}, {pipeline_mode = #tpu.pipeline_mode<synchronous>, transform_indices = @transform_3, window_bounds = array<i64: 1, 256>}, {pipeline_mode = #tpu.pipeline_mode<synchronous>, transform_indices = @transform_4, window_bounds = array<i64: 1, 256>}, {transform_indices = @transform_5, window_bounds = array<i64: 16, 256>}]} {
    %c0 = arith.constant 0 : index
    %c0_0 = arith.constant 0 : index
    %0 = vector.load %arg1[%c0, %c0_0] : memref<16x1152xbf16, #tpu.memory_space<vmem>>, vector<16x1152xbf16>
    %c0_1 = arith.constant 0 : index
    %c0_2 = arith.constant 0 : index
    %1 = vector.load %arg2[%c0_1, %c0_2] : memref<1152x256xbf16, #tpu.memory_space<vmem>>, vector<1152x256xbf16>
    %cst = arith.constant dense<0.000000e+00> : vector<16x256xf32>
    %2 = tpu.matmul %0, %1, %cst {dimension_numbers = #tpu.dot_dimension_numbers<[1], [0], [0], [1], [0, 0, 1, 1], [], []>} : vector<16x1152xbf16>, vector<1152x256xbf16>, vector<16x256xf32> -> vector<16x256xf32>
    %c0_3 = arith.constant 0 : index
    %c0_4 = arith.constant 0 : index
    %3 = vector.load %arg3[%c0_3, %c0_4] : memref<1x256xf32, #tpu.memory_space<vmem>>, vector<1x256xf32>
    %4 = vector.broadcast %3 : vector<1x256xf32> to vector<16x256xf32>
    %5 = arith.addf %2, %4 : vector<16x256xf32>
    %c0_5 = arith.constant 0 : index
    %c0_6 = arith.constant 0 : index
    %6 = vector.load %arg4[%c0_5, %c0_6] : memref<1x256xf32, #tpu.memory_space<vmem>>, vector<1x256xf32>
    %7 = vector.broadcast %6 : vector<1x256xf32> to vector<16x256xf32>
    %8 = arith.maximumf %5, %7 : vector<16x256xf32>
    %c0_7 = arith.constant 0 : index
    %c0_8 = arith.constant 0 : index
    %9 = vector.load %arg5[%c0_7, %c0_8] : memref<1x256xf32, #tpu.memory_space<vmem>>, vector<1x256xf32>
    %10 = vector.broadcast %9 : vector<1x256xf32> to vector<16x256xf32>
    %11 = arith.minimumf %8, %10 : vector<16x256xf32>
    %12 = arith.truncf %11 : vector<16x256xf32> to vector<16x256xbf16>
    %c0_9 = arith.constant 0 : index
    %c0_10 = arith.constant 0 : index
    %13 = vector.load %arg6[%c0_9, %c0_10] : memref<16x256xbf16, #tpu.memory_space<vmem>>, vector<16x256xbf16>
    tpu.vector_store %arg6[%c0_9, %c0_10], %12 {strides = array<i32>} : memref<16x256xbf16, #tpu.memory_space<vmem>>, vector<16x256xbf16>,
    return
  }
  func.func @transform_0(%arg0: i32) -> (i32, i32) {
    %c0_i32 = arith.constant 0 : i32
    %c0_i32_0 = arith.constant 0 : i32
    return %arg0, %c0_i32 : i32, i32
  }
  func.func @transform_1(%arg0: i32) -> (i32, i32) {
    %c0_i32 = arith.constant 0 : i32
    %c0_i32_0 = arith.constant 0 : i32
    %c0_i32_1 = arith.constant 0 : i32
    return %c0_i32, %c0_i32_0 : i32, i32
  }
  func.func @transform_2(%arg0: i32) -> (i32, i32) {
    %c0_i32 = arith.constant 0 : i32
    %c0_i32_0 = arith.constant 0 : i32
    %c0_i32_1 = arith.constant 0 : i32
    return %c0_i32, %c0_i32_0 : i32, i32
  }
  func.func @transform_3(%arg0: i32) -> (i32, i32) {
    %c0_i32 = arith.constant 0 : i32
    %c0_i32_0 = arith.constant 0 : i32
    %c0_i32_1 = arith.constant 0 : i32
    return %c0_i32, %c0_i32_0 : i32, i32
  }
  func.func @transform_4(%arg0: i32) -> (i32, i32) {
    %c0_i32 = arith.constant 0 : i32
    %c0_i32_0 = arith.constant 0 : i32
    %c0_i32_1 = arith.constant 0 : i32
    return %c0_i32, %c0_i32_0 : i32, i32
  }
  func.func @transform_5(%arg0: i32) -> (i32, i32) {
    %c0_i32 = arith.constant 0 : i32
    %c0_i32_0 = arith.constant 0 : i32
    return %arg0, %c0_i32 : i32, i32
  }
}

module attributes {stable_mosaic.version = 11 : i64} {
  func.func @_matmul_bias_clip_kernel(%arg0: i32, %arg1: memref<16x2304xbf16, #tpu.memory_space<vmem>>, %arg2: memref<2304x128xbf16, #tpu.memory_space<vmem>>, %arg3: memref<1x128xf32, #tpu.memory_space<vmem>>, %arg4: memref<1x128xf32, #tpu.memory_space<vmem>>, %arg5: memref<1x128xf32, #tpu.memory_space<vmem>>, %arg6: memref<16x128xf32, #tpu.memory_space<vmem>>) attributes {dimension_semantics = [#tpu.dimension_semantics<parallel>], iteration_bounds = array<i64: 1>, scalar_prefetch = 0 : i64, scratch_operands = 0 : i64, tpu.core_type = #tpu.core_type<tc>, window_params = [{transform_indices = @transform_0, window_bounds = array<i64: 16, 2304>}, {pipeline_mode = #tpu.pipeline_mode<synchronous>, transform_indices = @transform_1, window_bounds = array<i64: 2304, 128>}, {pipeline_mode = #tpu.pipeline_mode<synchronous>, transform_indices = @transform_2, window_bounds = array<i64: 1, 128>}, {pipeline_mode = #tpu.pipeline_mode<synchronous>, transform_indices = @transform_3, window_bounds = array<i64: 1, 128>}, {pipeline_mode = #tpu.pipeline_mode<synchronous>, transform_indices = @transform_4, window_bounds = array<i64: 1, 128>}, {transform_indices = @transform_5, window_bounds = array<i64: 16, 128>}]} {
    %c0 = arith.constant 0 : index
    %c0_0 = arith.constant 0 : index
    %0 = vector.load %arg1[%c0, %c0_0] : memref<16x2304xbf16, #tpu.memory_space<vmem>>, vector<16x2304xbf16>
    %c0_1 = arith.constant 0 : index
    %c0_2 = arith.constant 0 : index
    %1 = vector.load %arg2[%c0_1, %c0_2] : memref<2304x128xbf16, #tpu.memory_space<vmem>>, vector<2304x128xbf16>
    %cst = arith.constant dense<0.000000e+00> : vector<16x128xf32>
    %2 = tpu.matmul %0, %1, %cst {dimension_numbers = #tpu.dot_dimension_numbers<[1], [0], [0], [1], [0, 0, 1, 1], [], []>} : vector<16x2304xbf16>, vector<2304x128xbf16>, vector<16x128xf32> -> vector<16x128xf32>
    %c0_3 = arith.constant 0 : index
    %c0_4 = arith.constant 0 : index
    %3 = vector.load %arg3[%c0_3, %c0_4] : memref<1x128xf32, #tpu.memory_space<vmem>>, vector<1x128xf32>
    %4 = vector.broadcast %3 : vector<1x128xf32> to vector<16x128xf32>
    %5 = arith.addf %2, %4 : vector<16x128xf32>
    %c0_5 = arith.constant 0 : index
    %c0_6 = arith.constant 0 : index
    %6 = vector.load %arg4[%c0_5, %c0_6] : memref<1x128xf32, #tpu.memory_space<vmem>>, vector<1x128xf32>
    %7 = vector.broadcast %6 : vector<1x128xf32> to vector<16x128xf32>
    %8 = arith.maximumf %5, %7 : vector<16x128xf32>
    %c0_7 = arith.constant 0 : index
    %c0_8 = arith.constant 0 : index
    %9 = vector.load %arg5[%c0_7, %c0_8] : memref<1x128xf32, #tpu.memory_space<vmem>>, vector<1x128xf32>
    %10 = vector.broadcast %9 : vector<1x128xf32> to vector<16x128xf32>
    %11 = arith.minimumf %8, %10 : vector<16x128xf32>
    %c0_9 = arith.constant 0 : index
    %c0_10 = arith.constant 0 : index
    %12 = vector.load %arg6[%c0_9, %c0_10] : memref<16x128xf32, #tpu.memory_space<vmem>>, vector<16x128xf32>
    tpu.vector_store %arg6[%c0_9, %c0_10], %11 {strides = array<i32>} : memref<16x128xf32, #tpu.memory_space<vmem>>, vector<16x128xf32>,
    return
  }
  func.func @transform_0(%arg0: i32) -> (i32, i32) {
    %c0_i32 = arith.constant 0 : i32
    %c0_i32_0 = arith.constant 0 : i32
    return %arg0, %c0_i32 : i32, i32
  }
  func.func @transform_1(%arg0: i32) -> (i32, i32) {
    %c0_i32 = arith.constant 0 : i32
    %c0_i32_0 = arith.constant 0 : i32
    %c0_i32_1 = arith.constant 0 : i32
    return %c0_i32, %c0_i32_0 : i32, i32
  }
  func.func @transform_2(%arg0: i32) -> (i32, i32) {
    %c0_i32 = arith.constant 0 : i32
    %c0_i32_0 = arith.constant 0 : i32
    %c0_i32_1 = arith.constant 0 : i32
    return %c0_i32, %c0_i32_0 : i32, i32
  }
  func.func @transform_3(%arg0: i32) -> (i32, i32) {
    %c0_i32 = arith.constant 0 : i32
    %c0_i32_0 = arith.constant 0 : i32
    %c0_i32_1 = arith.constant 0 : i32
    return %c0_i32, %c0_i32_0 : i32, i32
  }
  func.func @transform_4(%arg0: i32) -> (i32, i32) {
    %c0_i32 = arith.constant 0 : i32
    %c0_i32_0 = arith.constant 0 : i32
    %c0_i32_1 = arith.constant 0 : i32
    return %c0_i32, %c0_i32_0 : i32, i32
  }
  func.func @transform_5(%arg0: i32) -> (i32, i32) {
    %c0_i32 = arith.constant 0 : i32
    %c0_i32_0 = arith.constant 0 : i32
    return %arg0, %c0_i32 : i32, i32
  }
}

</mosaic_0001>

<bundles_post_ra>
// kernel: encoder_mnist_conv_forward.5
= control target key start
LH: loop header
LB: loop body
LE: loop exit
PB: predicated region body
PF: predicated region fallthrough
CT: control target
= control target key end

     0   :  { %s1510_s18 = smov 0   ;;  %s1847_s0 = inlined_call_operand.vmem [shape: bf16[2048,9], index: 0, kind: input, shape index: {}]   ;;  %s1848_s1 = inlined_call_operand.vmem [shape: bf16[9,128], index: 1, kind: input, shape index: {}]   ;;  %s1849_s2 = inlined_call_operand.vmem [shape: f32[1,128], index: 2, kind: input, shape index: {}]   ;;  %s1850_s3 = inlined_call_operand.vmem [shape: f32[1,128], index: 3, kind: input, shape index: {}]   ;;  %s1851_s4 = inlined_call_operand.vmem [shape: f32[1,128], index: 4, kind: input, shape index: {}]   ;;  %s1852_s5 = inlined_call_operand.vmem [shape: bf16[2048,128], index: 5, kind: output, shape index: {}]  }
   0x1 LB: > { %s1057_s19 = sadd.s32 4294967295, %s1477_s18   ;;  %p1061_p0 = scmp.ge.s32.totalorder %s1477_s18, 1  ;;  %s1477_s18 = sphi %s1510_s18, %s15_s18  }
   0x2   : > { %p188_p1 = scmp.lt.s32.totalorder %s1477_s18, 5 }
   0x4   : > { %p189_p2 = pnand %p1061_p0, %p188_p1 }
   0x5   : > { %s1062_s24 = sshll.u32 (!%p189_p2), %s1057_s19, 6 }
   0x6   : > { %192 = sbr.rel (%p189_p2) target bundleno = 283 (0x11b), region = 40  ;;  %p217_p3 = scmp.lt.s32.totalorder (!%p189_p2), %s1062_s24, 255 }
   0xb   : > { %v1196_v0 = vld [vmem:[%s1848_s1] sm:$0xf]  ;;  %v1264_v1 = vld [vmem:[%s1848_s1] sm:$0x10]  ;;  %vm561_vm0 = vcmask 1043456   ;;  %vm562_vm1 = vcmask 1044480  }
   0xc   : > { %v1197_v2 = vor.u32 %v1264_v1, %v1196_v0  ;;  %v1479_v3 = vmov 65535   ;;  %s1854_s24 = smov (!%p217_p3, %s1062_s24), 255  ;;  %vm464_vm2 = vcmask 72704   ;;  %v1601_v41 = vld [vmem:[%s1849_s2] ss:$0 sm:$0xff] }
   0xd   : > { %v563_v4 = vsel %vm561_vm0, 4294967295, %v1479_v3  ;;  %s1063_s25 = sshll.u32 %s1854_s24, 2  ;;  %v1607_v43 = vld [vmem:[%s1850_s3] ss:$0 sm:$0xff] }
   0xe   : > { %v564_v5 = vsel %vm562_vm1, %v563_v4, 0  ;;  %s1532_s28 = scalar_lea.vmem %s1847_s0, %s1063_s25  ;;  %v1614_v50 = vld [vmem:[%s1851_s4] ss:$0 sm:$0xff]  ;;  %s1632_s12 = scalar_lea.vmem %s1852_s5, %s1063_s25 }
   0xf   : > { %v566_v6 = vand.u32 %v1197_v2, %v564_v5  ;;  %v1232_v7 = vld [vmem:[%s1532_s28] sm:$0xff]  ;;  %v1233_v11 = vld [vmem:[%s1532_s28 + $0x8] sm:$0xff]  ;;  %v1234_v15 = vld [vmem:[%s1532_s28 + $0x10] sm:$0xff] }
  0x10   : > { %v1240_v8 = vld [vmem:[%s1532_s28 + $0x40] sm:$0xff]  ;;  %v1241_v12 = vld [vmem:[%s1532_s28 + $0x48] sm:$0xff]  ;;  %v1242_v16 = vld [vmem:[%s1532_s28 + $0x50] sm:$0xff] }
  0x11   : > { %575 = vmatpush.bf16.msra.mxu0 %v566_v6  ;;  %1456 = vmatpush.bf16.msra.mxu1 %v566_v6  ;;  %v1248_v9 = vld [vmem:[%s1532_s28 + $0x80] sm:$0xff]  ;;  %v1249_v13 = vld [vmem:[%s1532_s28 + $0x88] sm:$0xff]  ;;  %v1250_v17 = vld [vmem:[%s1532_s28 + $0x90] sm:$0xff] }
  0x12   : > { %1457 = vmatpush.bf16.msra.mxu2 %v566_v6  ;;  %1458 = vmatpush.bf16.msra.mxu3 %v566_v6  ;;  %v1256_v10 = vld [vmem:[%s1532_s28 + $0xc0] sm:$0xff]  ;;  %v1257_v14 = vld [vmem:[%s1532_s28 + $0xc8] sm:$0xff]  ;;  %v1258_v18 = vld [vmem:[%s1532_s28 + $0xd0] sm:$0xff] }
  0x13   : > { %v1235_v19 = vld [vmem:[%s1532_s28 + $0x18] sm:$0xff]  ;;  %v1236_v23 = vld [vmem:[%s1532_s28 + $0x20] sm:$0xff]  ;;  %v1237_v27 = vld [vmem:[%s1532_s28 + $0x28] sm:$0xff] }
  0x14   : > { %1198 = vmatmul.msk.bf16.vlgmr.msra.gmra.mxu0 %vm464_vm2, %v1232_v7  ;;  %1206 = vmatmul.msk.bf16.vlgmr.msra.gmra.mxu1 %vm464_vm2, %v1240_v8  ;;  %v1243_v20 = vld [vmem:[%s1532_s28 + $0x58] sm:$0xff]  ;;  %v1244_v24 = vld [vmem:[%s1532_s28 + $0x60] sm:$0xff]  ;;  %v1245_v28 = vld [vmem:[%s1532_s28 + $0x68] sm:$0xff] }
  0x15   : > { %1214 = vmatmul.msk.bf16.vlgmr.msra.gmra.mxu2 %vm464_vm2, %v1248_v9  ;;  %1222 = vmatmul.msk.bf16.vlgmr.msra.gmra.mxu3 %vm464_vm2, %v1256_v10  ;;  %v1251_v21 = vld [vmem:[%s1532_s28 + $0x98] sm:$0xff]  ;;  %v1252_v25 = vld [vmem:[%s1532_s28 + $0xa0] sm:$0xff]  ;;  %v1253_v29 = vld [vmem:[%s1532_s28 + $0xa8] sm:$0xff] }
  0x16   : > { %v1259_v22 = vld [vmem:[%s1532_s28 + $0xd8] sm:$0xff]  ;;  %v1260_v26 = vld [vmem:[%s1532_s28 + $0xe0] sm:$0xff]  ;;  %v1261_v30 = vld [vmem:[%s1532_s28 + $0xe8] sm:$0xff] }
  0x17   : > { %v1238_v31 = vld [vmem:[%s1532_s28 + $0x30] sm:$0xff]  ;;  %v1239_v35 = vld [vmem:[%s1532_s28 + $0x38] sm:$0xff] }
  0x18   : > { %v1246_v32 = vld [vmem:[%s1532_s28 + $0x70] sm:$0xff]  ;;  %v1247_v36 = vld [vmem:[%s1532_s28 + $0x78] sm:$0xff] }
  0x19   : > { %v1254_v33 = vld [vmem:[%s1532_s28 + $0xb0] sm:$0xff]  ;;  %v1255_v37 = vld [vmem:[%s1532_s28 + $0xb8] sm:$0xff] }
  0x1a   : > { %v1262_v34 = vld [vmem:[%s1532_s28 + $0xf0] sm:$0xff]  ;;  %v1263_v38 = vld [vmem:[%s1532_s28 + $0xf8] sm:$0xff] }
  0x24   : > { %1199 = vmatmul.msk.bf16.gmra.mxu0 %vm464_vm2, %v1233_v11  ;;  %1207 = vmatmul.msk.bf16.gmra.mxu1 %vm464_vm2, %v1241_v12 }
  0x25   : > { %1215 = vmatmul.msk.bf16.gmra.mxu2 %vm464_vm2, %v1249_v13  ;;  %1223 = vmatmul.msk.bf16.gmra.mxu3 %vm464_vm2, %v1257_v14 }
  0x34   : > { %1200 = vmatmul.msk.bf16.gmra.mxu0 %vm464_vm2, %v1234_v15  ;;  %1208 = vmatmul.msk.bf16.gmra.mxu1 %vm464_vm2, %v1242_v16 }
  0x35   : > { %1216 = vmatmul.msk.bf16.gmra.mxu2 %vm464_vm2, %v1250_v17  ;;  %1224 = vmatmul.msk.bf16.gmra.mxu3 %vm464_vm2, %v1258_v18 }
  0x44   : > { %1201 = vmatmul.msk.bf16.gmra.mxu0 %vm464_vm2, %v1235_v19  ;;  %1209 = vmatmul.msk.bf16.gmra.mxu1 %vm464_vm2, %v1243_v20 }
  0x45   : > { %1217 = vmatmul.msk.bf16.gmra.mxu2 %vm464_vm2, %v1251_v21  ;;  %1225 = vmatmul.msk.bf16.gmra.mxu3 %vm464_vm2, %v1259_v22 }
  0x54   : > { %1202 = vmatmul.msk.bf16.gmra.mxu0 %vm464_vm2, %v1236_v23  ;;  %1210 = vmatmul.msk.bf16.gmra.mxu1 %vm464_vm2, %v1244_v24 }
  0x55   : > { %1218 = vmatmul.msk.bf16.gmra.mxu2 %vm464_vm2, %v1252_v25  ;;  %1226 = vmatmul.msk.bf16.gmra.mxu3 %vm464_vm2, %v1260_v26 }
  0x64   : > { %1203 = vmatmul.msk.bf16.gmra.mxu0 %vm464_vm2, %v1237_v27  ;;  %1211 = vmatmul.msk.bf16.gmra.mxu1 %vm464_vm2, %v1245_v28 }
  0x65   : > { %1219 = vmatmul.msk.bf16.gmra.mxu2 %vm464_vm2, %v1253_v29  ;;  %1227 = vmatmul.msk.bf16.gmra.mxu3 %vm464_vm2, %v1261_v30 }
  0x74   : > { %1204 = vmatmul.msk.bf16.gmra.mxu0 %vm464_vm2, %v1238_v31  ;;  %1212 = vmatmul.msk.bf16.gmra.mxu1 %vm464_vm2, %v1246_v32 }
  0x75   : > { %1220 = vmatmul.msk.bf16.gmra.mxu2 %vm464_vm2, %v1254_v33  ;;  %1228 = vmatmul.msk.bf16.gmra.mxu3 %vm464_vm2, %v1262_v34 }
  0x84   : > { %1205 = vmatmul.msk.bf16.gmra.mxu0 %vm464_vm2, %v1239_v35  ;;  %1213 = vmatmul.msk.bf16.gmra.mxu1 %vm464_vm2, %v1247_v36 }
  0x85   : > { %1221 = vmatmul.msk.bf16.gmra.mxu2 %vm464_vm2, %v1255_v37  ;;  %1229 = vmatmul.msk.bf16.gmra.mxu3 %vm464_vm2, %v1263_v38 }
  0x91   : > { %v577_v39 = vpop.f32.mrf.mxu0  ;;  %v617_v40 = vpop.f32.mrf.mxu1 }
  0x92   : > { %v578_v42 = vadd.f32 %v1601_v41, %v577_v39  ;;  %v618_v44 = vadd.f32 %v1601_v41, %v617_v40 }
  0x94   : > { %v741_v49 = vmax.f32 %v578_v42, %v1607_v43  ;;  %v757_v51 = vmax.f32 %v618_v44, %v1607_v43 }
  0x96   : > { %v809_v58 = vmin.f32 %v741_v49, %v1614_v50  ;;  %v825_v59 = vmin.f32 %v757_v51, %v1614_v50 }
  0x98   : > { %v657_v45 = vpop.f32.mrf.mxu2  ;;  %v697_v46 = vpop.f32.mrf.mxu3 }
  0x99   : > { %v579_v47 = vpop.f32.mrf.mxu0  ;;  %v619_v48 = vpop.f32.mrf.mxu1  ;;  %v658_v56 = vadd.f32 %v1601_v41, %v657_v45  ;;  %v698_v57 = vadd.f32 %v1601_v41, %v697_v46 }
  0x9a   : > { %v580_v52 = vadd.f32 %v1601_v41, %v579_v47  ;;  %v620_v53 = vadd.f32 %v1601_v41, %v619_v48 }
  0x9b   : > { %v773_v2 = vmax.f32 %v658_v56, %v1607_v43  ;;  %v789_v3 = vmax.f32 %v698_v57, %v1607_v43 }
  0x9c   : > { %v742_v54 = vmax.f32 %v580_v52, %v1607_v43  ;;  %v758_v55 = vmax.f32 %v620_v53, %v1607_v43 }
  0x9d   : > { %v841_v10 = vmin.f32 %v773_v2, %v1614_v50  ;;  %v857_v11 = vmin.f32 %v789_v3, %v1614_v50 }
  0x9e   : > { %v810_v60 = vmin.f32 %v742_v54, %v1614_v50  ;;  %v826_v61 = vmin.f32 %v758_v55, %v1614_v50 }
  0xa0   : > { %v1268_v62 = vpack.c.bf16 %v810_v60, %v809_v58  ;;  %v1308_v63 = vpack.c.bf16 %v826_v61, %v825_v59  ;;  %v659_v0 = vpop.f32.mrf.mxu2  ;;  %v699_v1 = vpop.f32.mrf.mxu3 }
  0xa1   : > { %v660_v4 = vadd.f32 %v1601_v41, %v659_v0  ;;  %v700_v5 = vadd.f32 %v1601_v41, %v699_v1  ;;  %v582_v6 = vpop.f32.mrf.mxu0  ;;  %v622_v7 = vpop.f32.mrf.mxu1 }
  0xa2   : > { %1269 = vst [vmem:[%s1632_s12] sm:$0xff] %v1268_v62   ;;  %v583_v14 = vadd.f32 %v1601_v41, %v582_v6  ;;  %v623_v15 = vadd.f32 %v1601_v41, %v622_v7 }
  0xa3   : > { %1432 = vst [vmem:[%s1632_s12 + $0x40] sm:$0xff] %v1308_v63   ;;  %v774_v8 = vmax.f32 %v660_v4, %v1607_v43  ;;  %v790_v9 = vmax.f32 %v700_v5, %v1607_v43 }
  0xa4   : > { %v743_v22 = vmax.f32 %v583_v14, %v1607_v43  ;;  %v759_v23 = vmax.f32 %v623_v15, %v1607_v43 }
  0xa5   : > { %v842_v12 = vmin.f32 %v774_v8, %v1614_v50  ;;  %v858_v13 = vmin.f32 %v790_v9, %v1614_v50 }
  0xa6   : > { %v811_v30 = vmin.f32 %v743_v22, %v1614_v50  ;;  %v827_v31 = vmin.f32 %v759_v23, %v1614_v50 }
  0xa7   : > { %v1348_v16 = vpack.c.bf16 %v842_v12, %v841_v10  ;;  %v1388_v17 = vpack.c.bf16 %v858_v13, %v857_v11 }
  0xa8   : > { %v662_v18 = vpop.f32.mrf.mxu2  ;;  %v702_v19 = vpop.f32.mrf.mxu3 }
  0xa9   : > { %1440 = vst [vmem:[%s1632_s12 + $0x80] sm:$0xff] %v1348_v16   ;;  %v584_v20 = vpop.f32.mrf.mxu0  ;;  %v624_v21 = vpop.f32.mrf.mxu1  ;;  %v663_v28 = vadd.f32 %v1601_v41, %v662_v18  ;;  %v703_v29 = vadd.f32 %v1601_v41, %v702_v19 }
  0xaa   : > { %1448 = vst [vmem:[%s1632_s12 + $0xc0] sm:$0xff] %v1388_v17   ;;  %v585_v24 = vadd.f32 %v1601_v41, %v584_v20  ;;  %v625_v25 = vadd.f32 %v1601_v41, %v624_v21 }
  0xab   : > { %v775_v38 = vmax.f32 %v663_v28, %v1607_v43  ;;  %v791_v39 = vmax.f32 %v703_v29, %v1607_v43 }
  0xac   : > { %v744_v26 = vmax.f32 %v585_v24, %v1607_v43  ;;  %v760_v27 = vmax.f32 %v625_v25, %v1607_v43 }
  0xad   : > { %v843_v48 = vmin.f32 %v775_v38, %v1614_v50  ;;  %v859_v49 = vmin.f32 %v791_v39, %v1614_v50 }
  0xae   : > { %v812_v32 = vmin.f32 %v744_v26, %v1614_v50  ;;  %v828_v33 = vmin.f32 %v760_v27, %v1614_v50 }
  0xb0   : > { %v1273_v34 = vpack.c.bf16 %v812_v32, %v811_v30  ;;  %v1313_v35 = vpack.c.bf16 %v828_v33, %v827_v31  ;;  %v664_v36 = vpop.f32.mrf.mxu2  ;;  %v704_v37 = vpop.f32.mrf.mxu3 }
  0xb1   : > { %v665_v40 = vadd.f32 %v1601_v41, %v664_v36  ;;  %v705_v42 = vadd.f32 %v1601_v41, %v704_v37  ;;  %v587_v44 = vpop.f32.mrf.mxu0  ;;  %v627_v45 = vpop.f32.mrf.mxu1 }
  0xb2   : > { %1425 = vst [vmem:[%s1632_s12 + $0x8] sm:$0xff] %v1273_v34   ;;  %v588_v53 = vadd.f32 %v1601_v41, %v587_v44  ;;  %v628_v54 = vadd.f32 %v1601_v41, %v627_v45 }
  0xb3   : > { %1433 = vst [vmem:[%s1632_s12 + $0x48] sm:$0xff] %v1313_v35   ;;  %v776_v46 = vmax.f32 %v665_v40, %v1607_v43  ;;  %v792_v47 = vmax.f32 %v705_v42, %v1607_v43 }
  0xb4   : > { %v745_v61 = vmax.f32 %v588_v53, %v1607_v43  ;;  %v761_v62 = vmax.f32 %v628_v54, %v1607_v43 }
  0xb5   : > { %v844_v51 = vmin.f32 %v776_v46, %v1614_v50  ;;  %v860_v52 = vmin.f32 %v792_v47, %v1614_v50 }
  0xb6   : > { %v813_v5 = vmin.f32 %v745_v61, %v1614_v50  ;;  %v829_v6 = vmin.f32 %v761_v62, %v1614_v50 }
  0xb7   : > { %v1353_v55 = vpack.c.bf16 %v844_v51, %v843_v48  ;;  %v1393_v56 = vpack.c.bf16 %v860_v52, %v859_v49 }
  0xb8   : > { %v667_v57 = vpop.f32.mrf.mxu2  ;;  %v707_v58 = vpop.f32.mrf.mxu3 }
  0xb9   : > { %1441 = vst [vmem:[%s1632_s12 + $0x88] sm:$0xff] %v1353_v55   ;;  %v589_v59 = vpop.f32.mrf.mxu0  ;;  %v629_v60 = vpop.f32.mrf.mxu1  ;;  %v668_v3 = vadd.f32 %v1601_v41, %v667_v57  ;;  %v708_v4 = vadd.f32 %v1601_v41, %v707_v58 }
  0xba   : > { %1449 = vst [vmem:[%s1632_s12 + $0xc8] sm:$0xff] %v1393_v56   ;;  %v590_v63 = vadd.f32 %v1601_v41, %v589_v59  ;;  %v630_v0 = vadd.f32 %v1601_v41, %v629_v60 }
  0xbb   : > { %v777_v13 = vmax.f32 %v668_v3, %v1607_v43  ;;  %v793_v14 = vmax.f32 %v708_v4, %v1607_v43 }
  0xbc   : > { %v746_v1 = vmax.f32 %v590_v63, %v1607_v43  ;;  %v762_v2 = vmax.f32 %v630_v0, %v1607_v43 }
  0xbd   : > { %v845_v21 = vmin.f32 %v777_v13, %v1614_v50  ;;  %v861_v22 = vmin.f32 %v793_v14, %v1614_v50 }
  0xbe   : > { %v814_v7 = vmin.f32 %v746_v1, %v1614_v50  ;;  %v830_v8 = vmin.f32 %v762_v2, %v1614_v50 }
  0xc0   : > { %v1278_v9 = vpack.c.bf16 %v814_v7, %v813_v5  ;;  %v1318_v10 = vpack.c.bf16 %v830_v8, %v829_v6  ;;  %v669_v11 = vpop.f32.mrf.mxu2  ;;  %v709_v12 = vpop.f32.mrf.mxu3 }
  0xc1   : > { %v670_v15 = vadd.f32 %v1601_v41, %v669_v11  ;;  %v710_v16 = vadd.f32 %v1601_v41, %v709_v12  ;;  %v592_v17 = vpop.f32.mrf.mxu0  ;;  %v632_v18 = vpop.f32.mrf.mxu1 }
  0xc2   : > { %1426 = vst [vmem:[%s1632_s12 + $0x10] sm:$0xff] %v1278_v9   ;;  %v593_v25 = vadd.f32 %v1601_v41, %v592_v17  ;;  %v633_v26 = vadd.f32 %v1601_v41, %v632_v18 }
  0xc3   : > { %1434 = vst [vmem:[%s1632_s12 + $0x50] sm:$0xff] %v1318_v10   ;;  %v778_v19 = vmax.f32 %v670_v15, %v1607_v43  ;;  %v794_v20 = vmax.f32 %v710_v16, %v1607_v43 }
  0xc4   : > { %v747_v33 = vmax.f32 %v593_v25, %v1607_v43  ;;  %v763_v34 = vmax.f32 %v633_v26, %v1607_v43 }
  0xc5   : > { %v846_v23 = vmin.f32 %v778_v19, %v1614_v50  ;;  %v862_v24 = vmin.f32 %v794_v20, %v1614_v50 }
  0xc6   : > { %v815_v42 = vmin.f32 %v747_v33, %v1614_v50  ;;  %v831_v44 = vmin.f32 %v763_v34, %v1614_v50 }
  0xc7   : > { %v1358_v27 = vpack.c.bf16 %v846_v23, %v845_v21  ;;  %v1398_v28 = vpack.c.bf16 %v862_v24, %v861_v22 }
  0xc8   : > { %v672_v29 = vpop.f32.mrf.mxu2  ;;  %v712_v30 = vpop.f32.mrf.mxu3 }
  0xc9   : > { %1442 = vst [vmem:[%s1632_s12 + $0x90] sm:$0xff] %v1358_v27   ;;  %v594_v31 = vpop.f32.mrf.mxu0  ;;  %v634_v32 = vpop.f32.mrf.mxu1  ;;  %v673_v39 = vadd.f32 %v1601_v41, %v672_v29  ;;  %v713_v40 = vadd.f32 %v1601_v41, %v712_v30 }
  0xca   : > { %1450 = vst [vmem:[%s1632_s12 + $0xd0] sm:$0xff] %v1398_v28   ;;  %v595_v35 = vadd.f32 %v1601_v41, %v594_v31  ;;  %v635_v36 = vadd.f32 %v1601_v41, %v634_v32 }
  0xcb   : > { %v779_v52 = vmax.f32 %v673_v39, %v1607_v43  ;;  %v795_v53 = vmax.f32 %v713_v40, %v1607_v43 }
  0xcc   : > { %v748_v37 = vmax.f32 %v595_v35, %v1607_v43  ;;  %v764_v38 = vmax.f32 %v635_v36, %v1607_v43 }
  0xcd   : > { %v847_v60 = vmin.f32 %v779_v52, %v1614_v50  ;;  %v863_v61 = vmin.f32 %v795_v53, %v1614_v50 }
  0xce   : > { %v816_v45 = vmin.f32 %v748_v37, %v1614_v50  ;;  %v832_v46 = vmin.f32 %v764_v38, %v1614_v50 }
  0xd0   : > { %v1283_v47 = vpack.c.bf16 %v816_v45, %v815_v42  ;;  %v1323_v48 = vpack.c.bf16 %v832_v46, %v831_v44  ;;  %v674_v49 = vpop.f32.mrf.mxu2  ;;  %v714_v51 = vpop.f32.mrf.mxu3 }
  0xd1   : > { %v675_v54 = vadd.f32 %v1601_v41, %v674_v49  ;;  %v715_v55 = vadd.f32 %v1601_v41, %v714_v51  ;;  %v597_v56 = vpop.f32.mrf.mxu0  ;;  %v637_v57 = vpop.f32.mrf.mxu1 }
  0xd2   : > { %1427 = vst [vmem:[%s1632_s12 + $0x18] sm:$0xff] %v1283_v47   ;;  %v598_v0 = vadd.f32 %v1601_v41, %v597_v56  ;;  %v638_v1 = vadd.f32 %v1601_v41, %v637_v57 }
  0xd3   : > { %1435 = vst [vmem:[%s1632_s12 + $0x58] sm:$0xff] %v1323_v48   ;;  %v780_v58 = vmax.f32 %v675_v54, %v1607_v43  ;;  %v796_v59 = vmax.f32 %v715_v55, %v1607_v43 }
  0xd4   : > { %v749_v8 = vmax.f32 %v598_v0, %v1607_v43  ;;  %v765_v9 = vmax.f32 %v638_v1, %v1607_v43 }
  0xd5   : > { %v848_v62 = vmin.f32 %v780_v58, %v1614_v50  ;;  %v864_v63 = vmin.f32 %v796_v59, %v1614_v50 }
  0xd6   : > { %v817_v16 = vmin.f32 %v749_v8, %v1614_v50  ;;  %v833_v17 = vmin.f32 %v765_v9, %v1614_v50 }
  0xd7   : > { %v1363_v2 = vpack.c.bf16 %v848_v62, %v847_v60  ;;  %v1403_v3 = vpack.c.bf16 %v864_v63, %v863_v61 }
  0xd8   : > { %v677_v4 = vpop.f32.mrf.mxu2  ;;  %v717_v5 = vpop.f32.mrf.mxu3 }
  0xd9   : > { %1443 = vst [vmem:[%s1632_s12 + $0x98] sm:$0xff] %v1363_v2   ;;  %v599_v6 = vpop.f32.mrf.mxu0  ;;  %v639_v7 = vpop.f32.mrf.mxu1  ;;  %v678_v14 = vadd.f32 %v1601_v41, %v677_v4  ;;  %v718_v15 = vadd.f32 %v1601_v41, %v717_v5 }
  0xda   : > { %1451 = vst [vmem:[%s1632_s12 + $0xd8] sm:$0xff] %v1403_v3   ;;  %v600_v10 = vadd.f32 %v1601_v41, %v599_v6  ;;  %v640_v11 = vadd.f32 %v1601_v41, %v639_v7 }
  0xdb   : > { %v781_v24 = vmax.f32 %v678_v14, %v1607_v43  ;;  %v797_v25 = vmax.f32 %v718_v15, %v1607_v43 }
  0xdc   : > { %v750_v12 = vmax.f32 %v600_v10, %v1607_v43  ;;  %v766_v13 = vmax.f32 %v640_v11, %v1607_v43 }
  0xdd   : > { %v849_v32 = vmin.f32 %v781_v24, %v1614_v50  ;;  %v865_v33 = vmin.f32 %v797_v25, %v1614_v50 }
  0xde   : > { %v818_v18 = vmin.f32 %v750_v12, %v1614_v50  ;;  %v834_v19 = vmin.f32 %v766_v13, %v1614_v50 }
  0xe0   : > { %v1288_v20 = vpack.c.bf16 %v818_v18, %v817_v16  ;;  %v1328_v21 = vpack.c.bf16 %v834_v19, %v833_v17  ;;  %v679_v22 = vpop.f32.mrf.mxu2  ;;  %v719_v23 = vpop.f32.mrf.mxu3 }
  0xe1   : > { %v680_v26 = vadd.f32 %v1601_v41, %v679_v22  ;;  %v720_v27 = vadd.f32 %v1601_v41, %v719_v23  ;;  %v602_v28 = vpop.f32.mrf.mxu0  ;;  %v642_v29 = vpop.f32.mrf.mxu1 }
  0xe2   : > { %1428 = vst [vmem:[%s1632_s12 + $0x20] sm:$0xff] %v1288_v20   ;;  %v603_v36 = vadd.f32 %v1601_v41, %v602_v28  ;;  %v643_v37 = vadd.f32 %v1601_v41, %v642_v29 }
  0xe3   : > { %1436 = vst [vmem:[%s1632_s12 + $0x60] sm:$0xff] %v1328_v21   ;;  %v782_v30 = vmax.f32 %v680_v26, %v1607_v43  ;;  %v798_v31 = vmax.f32 %v720_v27, %v1607_v43 }
  0xe4   : > { %v751_v46 = vmax.f32 %v603_v36, %v1607_v43  ;;  %v767_v47 = vmax.f32 %v643_v37, %v1607_v43 }
  0xe5   : > { %v850_v34 = vmin.f32 %v782_v30, %v1614_v50  ;;  %v866_v35 = vmin.f32 %v798_v31, %v1614_v50 }
  0xe6   : > { %v819_v55 = vmin.f32 %v751_v46, %v1614_v50  ;;  %v835_v56 = vmin.f32 %v767_v47, %v1614_v50 }
  0xe7   : > { %v1368_v38 = vpack.c.bf16 %v850_v34, %v849_v32  ;;  %v1408_v39 = vpack.c.bf16 %v866_v35, %v865_v33 }
  0xe8   : > { %v682_v40 = vpop.f32.mrf.mxu2  ;;  %v722_v42 = vpop.f32.mrf.mxu3 }
  0xe9   : > { %1444 = vst [vmem:[%s1632_s12 + $0xa0] sm:$0xff] %v1368_v38   ;;  %v604_v44 = vpop.f32.mrf.mxu0  ;;  %v644_v45 = vpop.f32.mrf.mxu1  ;;  %v683_v53 = vadd.f32 %v1601_v41, %v682_v40  ;;  %v723_v54 = vadd.f32 %v1601_v41, %v722_v42 }
  0xea   : > { %1452 = vst [vmem:[%s1632_s12 + $0xe0] sm:$0xff] %v1408_v39   ;;  %v605_v48 = vadd.f32 %v1601_v41, %v604_v44  ;;  %v645_v49 = vadd.f32 %v1601_v41, %v644_v45 }
  0xeb   : > { %v783_v63 = vmax.f32 %v683_v53, %v1607_v43  ;;  %v799_v0 = vmax.f32 %v723_v54, %v1607_v43 }
  0xec   : > { %v752_v51 = vmax.f32 %v605_v48, %v1607_v43  ;;  %v768_v52 = vmax.f32 %v645_v49, %v1607_v43 }
  0xed   : > { %v851_v7 = vmin.f32 %v783_v63, %v1614_v50  ;;  %v867_v8 = vmin.f32 %v799_v0, %v1614_v50 }
  0xee   : > { %v820_v57 = vmin.f32 %v752_v51, %v1614_v50  ;;  %v836_v58 = vmin.f32 %v768_v52, %v1614_v50 }
  0xf0   : > { %v1293_v59 = vpack.c.bf16 %v820_v57, %v819_v55  ;;  %v1333_v60 = vpack.c.bf16 %v836_v58, %v835_v56  ;;  %v684_v61 = vpop.f32.mrf.mxu2  ;;  %v724_v62 = vpop.f32.mrf.mxu3 }
  0xf1   : > { %v685_v1 = vadd.f32 %v1601_v41, %v684_v61  ;;  %v725_v2 = vadd.f32 %v1601_v41, %v724_v62  ;;  %v607_v3 = vpop.f32.mrf.mxu0  ;;  %v647_v4 = vpop.f32.mrf.mxu1 }
  0xf2   : > { %1429 = vst [vmem:[%s1632_s12 + $0x28] sm:$0xff] %v1293_v59   ;;  %v608_v11 = vadd.f32 %v1601_v41, %v607_v3  ;;  %v648_v12 = vadd.f32 %v1601_v41, %v647_v4 }
  0xf3   : > { %1437 = vst [vmem:[%s1632_s12 + $0x68] sm:$0xff] %v1333_v60   ;;  %v784_v5 = vmax.f32 %v685_v1, %v1607_v43  ;;  %v800_v6 = vmax.f32 %v725_v2, %v1607_v43 }
  0xf4   : > { %v753_v19 = vmax.f32 %v608_v11, %v1607_v43  ;;  %v769_v20 = vmax.f32 %v648_v12, %v1607_v43 }
  0xf5   : > { %v852_v9 = vmin.f32 %v784_v5, %v1614_v50  ;;  %v868_v10 = vmin.f32 %v800_v6, %v1614_v50 }
  0xf6   : > { %v821_v27 = vmin.f32 %v753_v19, %v1614_v50  ;;  %v837_v28 = vmin.f32 %v769_v20, %v1614_v50 }
  0xf7   : > { %v1373_v13 = vpack.c.bf16 %v852_v9, %v851_v7  ;;  %v1413_v14 = vpack.c.bf16 %v868_v10, %v867_v8 }
  0xf8   : > { %v687_v15 = vpop.f32.mrf.mxu2  ;;  %v727_v16 = vpop.f32.mrf.mxu3 }
  0xf9   : > { %1445 = vst [vmem:[%s1632_s12 + $0xa8] sm:$0xff] %v1373_v13   ;;  %v609_v17 = vpop.f32.mrf.mxu0  ;;  %v649_v18 = vpop.f32.mrf.mxu1  ;;  %v688_v25 = vadd.f32 %v1601_v41, %v687_v15  ;;  %v728_v26 = vadd.f32 %v1601_v41, %v727_v16 }
  0xfa   : > { %1453 = vst [vmem:[%s1632_s12 + $0xe8] sm:$0xff] %v1413_v14   ;;  %v610_v21 = vadd.f32 %v1601_v41, %v609_v17  ;;  %v650_v22 = vadd.f32 %v1601_v41, %v649_v18 }
  0xfb   : > { %v785_v35 = vmax.f32 %v688_v25, %v1607_v43  ;;  %v801_v36 = vmax.f32 %v728_v26, %v1607_v43 }
  0xfc   : > { %v754_v23 = vmax.f32 %v610_v21, %v1607_v43  ;;  %v770_v24 = vmax.f32 %v650_v22, %v1607_v43 }
  0xfd   : > { %v853_v45 = vmin.f32 %v785_v35, %v1614_v50  ;;  %v869_v46 = vmin.f32 %v801_v36, %v1614_v50 }
  0xfe   : > { %v822_v29 = vmin.f32 %v754_v23, %v1614_v50  ;;  %v838_v30 = vmin.f32 %v770_v24, %v1614_v50 }
 0x100   : > { %v1298_v31 = vpack.c.bf16 %v822_v29, %v821_v27  ;;  %v1338_v32 = vpack.c.bf16 %v838_v30, %v837_v28  ;;  %v689_v33 = vpop.f32.mrf.mxu2  ;;  %v729_v34 = vpop.f32.mrf.mxu3 }
 0x101   : > { %v690_v37 = vadd.f32 %v1601_v41, %v689_v33  ;;  %v730_v38 = vadd.f32 %v1601_v41, %v729_v34  ;;  %v612_v39 = vpop.f32.mrf.mxu0  ;;  %v652_v40 = vpop.f32.mrf.mxu1 }
 0x102   : > { %1430 = vst [vmem:[%s1632_s12 + $0x30] sm:$0xff] %v1298_v31   ;;  %v613_v49 = vadd.f32 %v1601_v41, %v612_v39  ;;  %v653_v51 = vadd.f32 %v1601_v41, %v652_v40 }
 0x103   : > { %1438 = vst [vmem:[%s1632_s12 + $0x70] sm:$0xff] %v1338_v32   ;;  %v786_v42 = vmax.f32 %v690_v37, %v1607_v43  ;;  %v802_v44 = vmax.f32 %v730_v38, %v1607_v43 }
 0x104   : > { %v755_v58 = vmax.f32 %v613_v49, %v1607_v43  ;;  %v771_v59 = vmax.f32 %v653_v51, %v1607_v43 }
 0x105   : > { %v854_v47 = vmin.f32 %v786_v42, %v1614_v50  ;;  %v870_v48 = vmin.f32 %v802_v44, %v1614_v50 }
 0x106   : > { %v823_v2 = vmin.f32 %v755_v58, %v1614_v50  ;;  %v839_v3 = vmin.f32 %v771_v59, %v1614_v50 }
 0x107   : > { %v1378_v52 = vpack.c.bf16 %v854_v47, %v853_v45  ;;  %v1418_v53 = vpack.c.bf16 %v870_v48, %v869_v46 }
 0x108   : > { %v692_v54 = vpop.f32.mrf.mxu2  ;;  %v732_v55 = vpop.f32.mrf.mxu3 }
 0x109   : > { %1446 = vst [vmem:[%s1632_s12 + $0xb0] sm:$0xff] %v1378_v52   ;;  %v614_v56 = vpop.f32.mrf.mxu0  ;;  %v654_v57 = vpop.f32.mrf.mxu1  ;;  %v693_v0 = vadd.f32 %v1601_v41, %v692_v54  ;;  %v733_v1 = vadd.f32 %v1601_v41, %v732_v55 }
 0x10a   : > { %1454 = vst [vmem:[%s1632_s12 + $0xf0] sm:$0xff] %v1418_v53   ;;  %v615_v60 = vadd.f32 %v1601_v41, %v614_v56  ;;  %v655_v61 = vadd.f32 %v1601_v41, %v654_v57 }
 0x10b   : > { %v787_v10 = vmax.f32 %v693_v0, %v1607_v43  ;;  %v803_v11 = vmax.f32 %v733_v1, %v1607_v43 }
 0x10c   : > { %v756_v62 = vmax.f32 %v615_v60, %v1607_v43  ;;  %v772_v63 = vmax.f32 %v655_v61, %v1607_v43 }
 0x10d   : > { %v855_v16 = vmin.f32 %v787_v10, %v1614_v50  ;;  %v871_v17 = vmin.f32 %v803_v11, %v1614_v50 }
 0x10e   : > { %v824_v4 = vmin.f32 %v756_v62, %v1614_v50  ;;  %v840_v5 = vmin.f32 %v772_v63, %v1614_v50 }
 0x110   : > { %v1303_v6 = vpack.c.bf16 %v824_v4, %v823_v2  ;;  %v1343_v7 = vpack.c.bf16 %v840_v5, %v839_v3  ;;  %v694_v8 = vpop.f32.mrf.mxu2  ;;  %v734_v9 = vpop.f32.mrf.mxu3 }
 0x111   : > { %v695_v12 = vadd.f32 %v1601_v41, %v694_v8  ;;  %v735_v13 = vadd.f32 %v1601_v41, %v734_v9 }
 0x112   : > { %1431 = vst [vmem:[%s1632_s12 + $0x38] sm:$0xff] %v1303_v6  }
 0x113   : > { %1439 = vst [vmem:[%s1632_s12 + $0x78] sm:$0xff] %v1343_v7   ;;  %v788_v14 = vmax.f32 %v695_v12, %v1607_v43  ;;  %v804_v15 = vmax.f32 %v735_v13, %v1607_v43 }
 0x115   : > { %v856_v18 = vmin.f32 %v788_v14, %v1614_v50  ;;  %v872_v19 = vmin.f32 %v804_v15, %v1614_v50 }
 0x117   : > { %v1383_v20 = vpack.c.bf16 %v856_v18, %v855_v16  ;;  %v1423_v21 = vpack.c.bf16 %v872_v19, %v871_v17 }
 0x119   : > { %1447 = vst [vmem:[%s1632_s12 + $0xb8] sm:$0xff] %v1383_v20  }
 0x11a   : > { %1455 = vst [vmem:[%s1632_s12 + $0xf8] sm:$0xff] %v1423_v21  }
 0x11b PF: > { %s15_s18 = sadd.s32 1, %s1477_s18  }
 0x11c   : > { %p12_p4 = scmp.ge.s32.totalorder %s15_s18, 6  }
 0x11e   :  { %14 = sbr.rel (!%p12_p4) target bundleno = 1 (0x1), region = 70 }

// kernel: encoder_mnist_conv_forward.6
= control target key start
LH: loop header
LB: loop body
LE: loop exit
PB: predicated region body
PF: predicated region fallthrough
CT: control target
= control target key end

     0   :  { %vm1199_vm0 = vcmask 261120   ;;  %s4509_s1 = inlined_call_operand.vmem [shape: bf16[800,128], index: 1, kind: input, shape index: {}]   ;;  %s4510_s2 = inlined_call_operand.vmem [shape: f32[1,128], index: 2, kind: input, shape index: {}]   ;;  %s4511_s0 = inlined_call_operand.vmem [shape: bf16[288,800], index: 0, kind: input, shape index: {}]   ;;  %s4512_s3 = inlined_call_operand.vmem [shape: f32[1,128], index: 3, kind: input, shape index: {}]   ;;  %s4513_s4 = inlined_call_operand.vmem [shape: f32[1,128], index: 4, kind: input, shape index: {}]   ;;  %s4514_s5 = inlined_call_operand.vmem [shape: bf16[288,128], index: 5, kind: output, shape index: {}]  }
   0x1   :  { %v2958_v0 = vld [vmem:[%s4509_s1 + $0x38] sm:$0xff]  ;;  %v2957_v3 = vld [vmem:[%s4509_s1 + $0x30] sm:$0xff]  ;;  %v2956_v6 = vld [vmem:[%s4509_s1 + $0x28] sm:$0xff] }
   0x2   :  { %v3172_v1 = vld [vmem:[%s4509_s1 + $0x78] sm:$0xff]  ;;  %1254 = vmatpush.bf16.msra.mxu0 %v2958_v0  ;;  %3108 = vmatpush.bf16.msra.mxu3 %v2958_v0  ;;  %v3187_v4 = vld [vmem:[%s4509_s1 + $0x70] sm:$0xff]  ;;  %v3202_v7 = vld [vmem:[%s4509_s1 + $0x68] sm:$0xff] }
   0x3   :  { %v3177_v2 = vld [vmem:[%s4509_s1 + $0xb8] sm:$0xff]  ;;  %1353 = vmatpush.bf16.msra.mxu1 %v3172_v1  ;;  %v3192_v5 = vld [vmem:[%s4509_s1 + $0xb0] sm:$0xff]  ;;  %v3207_v8 = vld [vmem:[%s4509_s1 + $0xa8] sm:$0xff] }
   0x4   :  { %1452 = vmatpush.bf16.msra.mxu2 %v3177_v2  ;;  %v2955_v9 = vld [vmem:[%s4509_s1 + $0x20] sm:$0xff]  ;;  %v2954_v12 = vld [vmem:[%s4509_s1 + $0x18] sm:$0xff]  ;;  %v2953_v15 = vld [vmem:[%s4509_s1 + $0x10] sm:$0xff] }
   0x5   :  { %v3217_v10 = vld [vmem:[%s4509_s1 + $0x60] sm:$0xff]  ;;  %v3232_v13 = vld [vmem:[%s4509_s1 + $0x58] sm:$0xff]  ;;  %v3247_v16 = vld [vmem:[%s4509_s1 + $0x50] sm:$0xff] }
   0x6   :  { %1255 = vmatpush.bf16.msra.mxu0 %v2957_v3  ;;  %3109 = vmatpush.bf16.msra.mxu3 %v2957_v3  ;;  %v3222_v11 = vld [vmem:[%s4509_s1 + $0xa0] sm:$0xff]  ;;  %v3237_v14 = vld [vmem:[%s4509_s1 + $0x98] sm:$0xff]  ;;  %v3252_v17 = vld [vmem:[%s4509_s1 + $0x90] sm:$0xff] }
   0x7   :  { %1354 = vmatpush.bf16.msra.mxu1 %v3187_v4  ;;  %v2952_v18 = vld [vmem:[%s4509_s1 + $0x8] sm:$0xff]  ;;  %v2951_v21 = vld [vmem:[%s4509_s1] sm:$0xff]  ;;  %v2828_v25 = vld [vmem:[%s4511_s0 + $0x18] sm:$0xf0] }
   0x8   :  { %1453 = vmatpush.bf16.msra.mxu2 %v3192_v5  ;;  %v3262_v19 = vld [vmem:[%s4509_s1 + $0x48] sm:$0xff]  ;;  %v3275_v22 = vld [vmem:[%s4509_s1 + $0x40] sm:$0xff]  ;;  %v2497_v26 = vld [vmem:[%s4511_s0 + $0x310] sm:$0xf] }
   0x9   :  { %v3267_v20 = vld [vmem:[%s4509_s1 + $0x88] sm:$0xff]  ;;  %v3280_v23 = vld [vmem:[%s4509_s1 + $0x80] sm:$0xff]  ;;  %v2990_v33 = vld [vmem:[%s4509_s1 + $0x138] sm:$0xff] }
   0xa   :  { %1256 = vmatpush.bf16.msra.mxu0 %v2956_v6  ;;  %3110 = vmatpush.bf16.msra.mxu3 %v2956_v6  ;;  %v2105_v24 = vld [vmem:[%s4511_s0] sm:$0xf]  ;;  %v2926_v27 = vld [vmem:[%s4511_s0 + $0x328] sm:$0xf0]  ;;  %v2825_v28 = vld [vmem:[%s4511_s0 + $0x4] sm:$0xf] }
   0xb   :  { %1355 = vmatpush.bf16.msra.mxu1 %v3202_v7  ;;  %v2107_v29 = vld [vmem:[%s4511_s0 + $0x1c] sm:$0xf0]  ;;  %v2113_v30 = vld [vmem:[%s4511_s0 + $0x8] sm:$0xf]  ;;  %v2829_v31 = vld [vmem:[%s4511_s0 + $0x20] sm:$0xf0]  ;;  %v2106_v34 = vor.u32 %v2828_v25, %v2105_v24  ;;  %v2498_v35 = vor.u32 %v2926_v27, %v2497_v26 }
   0xc   :  { %1454 = vmatpush.bf16.msra.mxu2 %v3207_v8  ;;  %v3000_v32 = vld [vmem:[%s4509_s1 + $0x188] sm:$0xff]  ;;  %v2110_v36 = vor.u32 %v2825_v28, %v2107_v29  ;;  %v2114_v37 = vor.u32 %v2829_v31, %v2113_v30  ;;  %v2998_v38 = vld [vmem:[%s4509_s1 + $0x178] sm:$0xff]  ;;  %v2989_v39 = vld [vmem:[%s4509_s1 + $0x130] sm:$0xff] }
   0xd   :  { %v2997_v40 = vld [vmem:[%s4509_s1 + $0x170] sm:$0xff]  ;;  %v2133_v41 = vld [vmem:[%s4511_s0 + $0x38] sm:$0xf]  ;;  %v2525_v43 = vld [vmem:[%s4511_s0 + $0x348] sm:$0xf] }
   0xe   :  { %1257 = vmatpush.bf16.msra.mxu0 %v2955_v9  ;;  %3111 = vmatpush.bf16.msra.mxu3 %v2955_v9  ;;  %v2835_v42 = vld [vmem:[%s4511_s0 + $0x50] sm:$0xf0]  ;;  %v2933_v44 = vld [vmem:[%s4511_s0 + $0x360] sm:$0xf0]  ;;  %v2832_v45 = vld [vmem:[%s4511_s0 + $0x3c] sm:$0xf] }
   0xf   :  { %1356 = vmatpush.bf16.msra.mxu1 %v3217_v10  ;;  %v2135_v46 = vld [vmem:[%s4511_s0 + $0x54] sm:$0xf0]  ;;  %v2141_v47 = vld [vmem:[%s4511_s0 + $0x40] sm:$0xf]  ;;  %v2836_v48 = vld [vmem:[%s4511_s0 + $0x58] sm:$0xf0]  ;;  %v2134_v49 = vor.u32 %v2835_v42, %v2133_v41  ;;  %v2526_v50 = vor.u32 %v2933_v44, %v2525_v43 }
  0x10   :  { %1455 = vmatpush.bf16.msra.mxu2 %v3222_v11  ;;  %v2138_v51 = vor.u32 %v2832_v45, %v2135_v46  ;;  %v2142_v52 = vor.u32 %v2836_v48, %v2141_v47  ;;  %v2988_v53 = vld [vmem:[%s4509_s1 + $0x128] sm:$0xff]  ;;  %v2161_v55 = vld [vmem:[%s4511_s0 + $0x70] sm:$0xf]  ;;  %v2553_v57 = vld [vmem:[%s4511_s0 + $0x380] sm:$0xf] }
  0x11   :  { %v2996_v54 = vld [vmem:[%s4509_s1 + $0x168] sm:$0xff]  ;;  %v2940_v58 = vld [vmem:[%s4511_s0 + $0x398] sm:$0xf0]  ;;  %v2839_v59 = vld [vmem:[%s4511_s0 + $0x74] sm:$0xf] }
  0x12   :  { %1258 = vmatpush.bf16.msra.mxu0 %v2954_v12  ;;  %3112 = vmatpush.bf16.msra.mxu3 %v2954_v12  ;;  %v2842_v56 = vld [vmem:[%s4511_s0 + $0x88] sm:$0xf0]  ;;  %v2163_v60 = vld [vmem:[%s4511_s0 + $0x8c] sm:$0xf0]  ;;  %v2169_v61 = vld [vmem:[%s4511_s0 + $0x78] sm:$0xf]  ;;  %v2554_v0 = vor.u32 %v2940_v58, %v2553_v57 }
  0x13   :  { %1357 = vmatpush.bf16.msra.mxu1 %v3232_v13  ;;  %v2843_v62 = vld [vmem:[%s4511_s0 + $0x90] sm:$0xf0]  ;;  %v2162_v63 = vor.u32 %v2842_v56, %v2161_v55  ;;  %v2849_v6 = vld [vmem:[%s4511_s0 + $0xc0] sm:$0xf0]  ;;  %v2197_v9 = vld [vmem:[%s4511_s0 + $0xb0] sm:$0xf] }
  0x14   :  { %1456 = vmatpush.bf16.msra.mxu2 %v3237_v14  ;;  %v2170_v3 = vor.u32 %v2843_v62, %v2169_v61  ;;  %v2219_v24 = vld [vmem:[%s4511_s0 + $0xfc] sm:$0xf0]  ;;  %v2857_v25 = vld [vmem:[%s4511_s0 + $0x100] sm:$0xf0]  ;;  %v2245_v30 = vld [vmem:[%s4511_s0 + $0x118] sm:$0xf] }
  0x15   :  { %v2863_v31 = vld [vmem:[%s4511_s0 + $0x130] sm:$0xf0]  ;;  %v2999_v41 = vld [vmem:[%s4509_s1 + $0x180] sm:$0xff]  ;;  %v2986_v42 = vld [vmem:[%s4509_s1 + $0x118] sm:$0xff] }
  0x16   :  { %1259 = vmatpush.bf16.msra.mxu0 %v2953_v15  ;;  %3113 = vmatpush.bf16.msra.mxu3 %v2953_v15  ;;  %v2994_v43 = vld [vmem:[%s4509_s1 + $0x158] sm:$0xff]  ;;  %v2273_v44 = vld [vmem:[%s4511_s0 + $0x150] sm:$0xf]  ;;  %v2870_v45 = vld [vmem:[%s4511_s0 + $0x168] sm:$0xf0] }
  0x17   :  { %1358 = vmatpush.bf16.msra.mxu1 %v3247_v16  ;;  %v2867_v46 = vld [vmem:[%s4511_s0 + $0x154] sm:$0xf]  ;;  %v2937_v47 = vld [vmem:[%s4511_s0 + $0x384] sm:$0xf]  ;;  %v2555_v48 = vld [vmem:[%s4511_s0 + $0x39c] sm:$0xf0] }
  0x18   :  { %1457 = vmatpush.bf16.msra.mxu2 %v3252_v17  ;;  %v2301_v56 = vld [vmem:[%s4511_s0 + $0x188] sm:$0xf]  ;;  %v2877_v57 = vld [vmem:[%s4511_s0 + $0x1a0] sm:$0xf0]  ;;  %v2874_v58 = vld [vmem:[%s4511_s0 + $0x18c] sm:$0xf] }
  0x19   :  { %v2303_v61 = vld [vmem:[%s4511_s0 + $0x1a4] sm:$0xf0]  ;;  %v2309_v62 = vld [vmem:[%s4511_s0 + $0x190] sm:$0xf] }
  0x1a   :  { %1260 = vmatpush.bf16.msra.mxu0 %v2952_v18  ;;  %3114 = vmatpush.bf16.msra.mxu3 %v2952_v18  ;;  %v2987_v18 = vld [vmem:[%s4509_s1 + $0x120] sm:$0xff] }
  0x1b   :  { %1359 = vmatpush.bf16.msra.mxu1 %v3262_v19 }
  0x1c   :  { %1458 = vmatpush.bf16.msra.mxu2 %v3267_v20 }
  0x1e   :  { %1261 = vmatpush.bf16.msra.mxu0 %v2951_v21  ;;  %3115 = vmatpush.bf16.msra.mxu3 %v2951_v21  ;;  %v2853_v21 = vld [vmem:[%s4511_s0 + $0xe4] sm:$0xf] }
  0x1f   :  { %1360 = vmatpush.bf16.msra.mxu1 %v3275_v22  ;;  %v2222_v28 = vor.u32 %v2853_v21, %v2219_v24 }
  0x20   :  { %1459 = vmatpush.bf16.msra.mxu2 %v3280_v23 }
  0x21   :  { %1262 = vmatmul.bf16.vlgmr.msra.gmra.mxu0 %v2106_v34  ;;  %1332 = vmatmul.bf16.vlgmr.msra.gmra.mxu3 %v2498_v35  ;;  %v2247_v34 = vld [vmem:[%s4511_s0 + $0x134] sm:$0xf0]  ;;  %v2253_v35 = vld [vmem:[%s4511_s0 + $0x120] sm:$0xf] }
  0x22   :  { %1650 = vmatpush.bf16.msrb.mxu0 %v2990_v33  ;;  %1361 = vmatmul.bf16.vlgmr.msra.gmra.mxu1 %v2110_v36  ;;  %v2527_v33 = vld [vmem:[%s4511_s0 + $0x364] sm:$0xf0]  ;;  %v2864_v36 = vld [vmem:[%s4511_s0 + $0x138] sm:$0xf0] }
  0x23   :  { %1460 = vmatmul.bf16.vlgmr.msra.gmra.mxu2 %v2114_v37  ;;  %1749 = vmatpush.bf16.msrb.mxu1 %v2998_v38  ;;  %v2246_v37 = vor.u32 %v2863_v31, %v2245_v30 }
  0x24   :  { %1854 = vmatpush.bf16.msrb.mxu2 %v3000_v32  ;;  %3116 = vmatpush.bf16.msrb.mxu3 %v3172_v1  ;;  %v2166_v1 = vor.u32 %v2839_v59, %v2163_v60  ;;  %v2860_v32 = vld [vmem:[%s4511_s0 + $0x11c] sm:$0xf]  ;;  %v2583_v60 = vld [vmem:[%s4511_s0 + $0x3d4] sm:$0xf0] }
  0x25   :  { %v2944_v59 = vld [vmem:[%s4511_s0 + $0x3bc] sm:$0xf] }
  0x26   :  { %1651 = vmatpush.bf16.msrb.mxu0 %v2989_v39  ;;  %v2250_v39 = vor.u32 %v2860_v32, %v2247_v34  ;;  %v2357_v32 = vld [vmem:[%s4511_s0 + $0x1f8] sm:$0xf]  ;;  %v2980_v34 = vld [vmem:[%s4509_s1 + $0xe8] sm:$0xff] }
  0x27   :  { %1750 = vmatpush.bf16.msrb.mxu1 %v2997_v40  ;;  %v2254_v40 = vor.u32 %v2864_v36, %v2253_v35  ;;  %v2984_v35 = vld [vmem:[%s4509_s1 + $0x108] sm:$0xff]  ;;  %v2888_v36 = vld [vmem:[%s4511_s0 + $0x1fc] sm:$0xf] }
  0x28   :  { %3117 = vmatpush.bf16.msrb.mxu3 %v3187_v4  ;;  %v2189_v4 = vld [vmem:[%s4511_s0 + $0xa8] sm:$0xf]  ;;  %1855 = vmatpush.bf16.msrb.mxu2 %v2999_v41  ;;  %v2892_v41 = vld [vmem:[%s4511_s0 + $0x218] sm:$0xf0] }
  0x29   :  { %v2190_v12 = vor.u32 %v2849_v6, %v2189_v4  ;;  %v2985_v6 = vld [vmem:[%s4509_s1 + $0x110] sm:$0xff] }
  0x2a   :  { %1652 = vmatpush.bf16.msrb.mxu0 %v2988_v53  ;;  %v2558_v53 = vor.u32 %v2937_v47, %v2555_v48 }
  0x2b   :  { %1751 = vmatpush.bf16.msrb.mxu1 %v2996_v54 }
  0x2c   :  { %3118 = vmatpush.bf16.msrb.mxu3 %v3202_v7  ;;  %v2947_v7 = vld [vmem:[%s4511_s0 + $0x3d0] sm:$0xf0] }
  0x2e   :  { %1653 = vmatpush.bf16.msrb.mxu0 %v2987_v18  ;;  %v2885_v18 = vld [vmem:[%s4511_s0 + $0x1e0] sm:$0xf0] }
  0x30   :  { %3119 = vmatpush.bf16.msrb.mxu3 %v3217_v10  ;;  %v2850_v10 = vld [vmem:[%s4511_s0 + $0xc8] sm:$0xf0] }
  0x31   :  { %1267 = vmatmul.bf16.gmra.mxu0 %v2134_v49  ;;  %1337 = vmatmul.bf16.gmra.mxu3 %v2526_v50  ;;  %v2275_v49 = vld [vmem:[%s4511_s0 + $0x16c] sm:$0xf0]  ;;  %v2281_v50 = vld [vmem:[%s4511_s0 + $0x158] sm:$0xf] }
  0x32   :  { %1366 = vmatmul.bf16.gmra.mxu1 %v2138_v51  ;;  %1654 = vmatpush.bf16.msrb.mxu0 %v2986_v42  ;;  %v2871_v51 = vld [vmem:[%s4511_s0 + $0x170] sm:$0xf0]  ;;  %v2278_v54 = vor.u32 %v2867_v46, %v2275_v49  ;;  %v2979_v46 = vld [vmem:[%s4509_s1 + $0xe0] sm:$0xff] }
  0x33   :  { %1465 = vmatmul.bf16.gmra.mxu2 %v2142_v52  ;;  %v2274_v52 = vor.u32 %v2870_v45, %v2273_v44  ;;  %v2282_v55 = vor.u32 %v2871_v51, %v2281_v50  ;;  %v2992_v51 = vld [vmem:[%s4509_s1 + $0x148] sm:$0xff] }
  0x34   :  { %3120 = vmatpush.bf16.msrb.mxu3 %v3232_v13 }
  0x36   :  { %1655 = vmatpush.bf16.msrb.mxu0 %v2985_v6  ;;  %v2561_v6 = vld [vmem:[%s4511_s0 + $0x388] sm:$0xf] }
  0x38   :  { %3121 = vmatpush.bf16.msrb.mxu3 %v3247_v16  ;;  %v2198_v16 = vor.u32 %v2850_v10, %v2197_v9  ;;  %v2982_v9 = vld [vmem:[%s4509_s1 + $0xf8] sm:$0xff]  ;;  %v2881_v10 = vld [vmem:[%s4511_s0 + $0x1c4] sm:$0xf] }
  0x3a   :  { %1656 = vmatpush.bf16.msrb.mxu0 %v2984_v35  ;;  %v2902_v35 = vld [vmem:[%s4511_s0 + $0x26c] sm:$0xf] }
  0x3c   :  { %3122 = vmatpush.bf16.msrb.mxu3 %v3262_v19  ;;  %v2995_v19 = vld [vmem:[%s4509_s1 + $0x160] sm:$0xff] }
  0x3d   :  { %1752 = vmatpush.bf16.msrb.mxu1 %v2995_v19 }
  0x40   :  { %3123 = vmatpush.bf16.msrb.mxu3 %v3275_v22  ;;  %v2923_v22 = vld [vmem:[%s4511_s0 + $0x314] sm:$0xf] }
  0x41   :  { %1272 = vmatmul.bf16.gmra.mxu0 %v2162_v63  ;;  %1342 = vmatmul.bf16.gmra.mxu3 %v2554_v0  ;;  %v2878_v63 = vld [vmem:[%s4511_s0 + $0x1a8] sm:$0xf0]  ;;  %v2302_v0 = vor.u32 %v2877_v57, %v2301_v56 }
  0x42   :  { %1371 = vmatmul.bf16.gmra.mxu1 %v2166_v1  ;;  %v2586_v1 = vor.u32 %v2944_v59, %v2583_v60  ;;  %v2310_v4 = vor.u32 %v2878_v63, %v2309_v62 }
  0x43   :  { %1470 = vmatmul.bf16.gmra.mxu2 %v2170_v3  ;;  %1753 = vmatpush.bf16.msrb.mxu1 %v2994_v43  ;;  %v2306_v3 = vor.u32 %v2874_v58, %v2303_v61  ;;  %v2977_v58 = vld [vmem:[%s4509_s1 + $0xd0] sm:$0xff] }
  0x44   :  { %3124 = vmatpush.bf16.msra.mxu3 %v3177_v2  ;;  %v2581_v2 = vld [vmem:[%s4511_s0 + $0x3b8] sm:$0xf] }
  0x45   :  { %v2582_v13 = vor.u32 %v2947_v7, %v2581_v2  ;;  %v2993_v2 = vld [vmem:[%s4509_s1 + $0x150] sm:$0xff]  ;;  %v3539_v7 = vld [vmem:[%s4510_s2] ss:$0 sm:$0xff] }
  0x47   :  { %1754 = vmatpush.bf16.msrb.mxu1 %v2993_v2  ;;  %v2941_v2 = vld [vmem:[%s4511_s0 + $0x3a0] sm:$0xf0] }
  0x48   :  { %3125 = vmatpush.bf16.msra.mxu3 %v3192_v5  ;;  %v2846_v5 = vld [vmem:[%s4511_s0 + $0xac] sm:$0xf] }
  0x4b   :  { %1755 = vmatpush.bf16.msrb.mxu1 %v2992_v51 }
  0x4c   :  { %3126 = vmatpush.bf16.msra.mxu3 %v3207_v8  ;;  %v2191_v8 = vld [vmem:[%s4511_s0 + $0xc4] sm:$0xf0] }
  0x4d   :  { %v2194_v15 = vor.u32 %v2846_v5, %v2191_v8  ;;  %v2329_v5 = vld [vmem:[%s4511_s0 + $0x1c0] sm:$0xf]  ;;  %v2884_v8 = vld [vmem:[%s4511_s0 + $0x1d8] sm:$0xf0] }
  0x4e   :  { %v2330_v19 = vor.u32 %v2884_v8, %v2329_v5  ;;  %v2387_v5 = vld [vmem:[%s4511_s0 + $0x24c] sm:$0xf0]  ;;  %v2393_v8 = vld [vmem:[%s4511_s0 + $0x238] sm:$0xf] }
  0x50   :  { %3127 = vmatpush.bf16.msra.mxu3 %v3222_v11  ;;  %v2217_v11 = vld [vmem:[%s4511_s0 + $0xe0] sm:$0xf] }
  0x51   :  { %1277 = vmatmul.bf16.gmra.mxu0 %v2190_v12  ;;  %1347 = vmatmul.bf16.gmra.mxu3 %v2582_v13  ;;  %v2505_v12 = vld [vmem:[%s4511_s0 + $0x318] sm:$0xf]  ;;  %v2927_v13 = vld [vmem:[%s4511_s0 + $0x330] sm:$0xf0] }
  0x52   :  { %1376 = vmatmul.bf16.gmra.mxu1 %v2194_v15  ;;  %v2331_v15 = vld [vmem:[%s4511_s0 + $0x1dc] sm:$0xf0] }
  0x53   :  { %1475 = vmatmul.bf16.gmra.mxu2 %v2198_v16  ;;  %v2337_v16 = vld [vmem:[%s4511_s0 + $0x1c8] sm:$0xf]  ;;  %v2334_v21 = vor.u32 %v2881_v10, %v2331_v15  ;;  %v2562_v15 = vor.u32 %v2941_v2, %v2561_v6  ;;  %v2443_v6 = vld [vmem:[%s4511_s0 + $0x2bc] sm:$0xf0] }
  0x54   :  { %3128 = vmatpush.bf16.msra.mxu3 %v3237_v14  ;;  %v2856_v14 = vld [vmem:[%s4511_s0 + $0xf8] sm:$0xf0]  ;;  %v2449_v2 = vld [vmem:[%s4511_s0 + $0x2a8] sm:$0xf] }
  0x55   :  { %v2218_v26 = vor.u32 %v2856_v14, %v2217_v11  ;;  %v2506_v11 = vor.u32 %v2927_v13, %v2505_v12 }
  0x58   :  { %3129 = vmatpush.bf16.msra.mxu3 %v3252_v17  ;;  %v2499_v17 = vld [vmem:[%s4511_s0 + $0x32c] sm:$0xf0] }
  0x59   :  { %v2502_v27 = vor.u32 %v2923_v22, %v2499_v17  ;;  %v2338_v22 = vor.u32 %v2885_v18, %v2337_v16  ;;  %v2975_v16 = vld [vmem:[%s4509_s1 + $0xc0] sm:$0xff] }
  0x5c   :  { %3130 = vmatpush.bf16.msra.mxu3 %v3267_v20  ;;  %v2225_v20 = vld [vmem:[%s4511_s0 + $0xe8] sm:$0xf] }
  0x5d   :  { %v2226_v29 = vor.u32 %v2857_v25, %v2225_v20  ;;  %v2981_v25 = vld [vmem:[%s4509_s1 + $0xf0] sm:$0xff] }
  0x60   :  { %3131 = vmatpush.bf16.msra.mxu3 %v3280_v23  ;;  %v2930_v23 = vld [vmem:[%s4511_s0 + $0x34c] sm:$0xf] }
  0x61   :  { %1282 = vmatmul.bf16.gmra.mxu0 %v2218_v26  ;;  %1431 = vmatmul.bf16.vlgmr.msrb.gmra.mxu3 %v2502_v27  ;;  %v2530_v38 = vor.u32 %v2930_v23, %v2527_v33  ;;  %v2891_v33 = vld [vmem:[%s4511_s0 + $0x210] sm:$0xf0] }
  0x62   :  { %1381 = vmatmul.bf16.gmra.mxu1 %v2222_v28  ;;  %v2358_v44 = vor.u32 %v2891_v33, %v2357_v32  ;;  %v2983_v33 = vld [vmem:[%s4509_s1 + $0x100] sm:$0xff] }
  0x63   :  { %1480 = vmatmul.bf16.gmra.mxu2 %v2226_v29  ;;  %1657 = vmatpush.bf16.msrb.mxu0 %v2983_v33 }
  0x64   :  { %1551 = vmatpush.bf16.msrb.mxu3 %v2982_v9  ;;  %v2899_v9 = vld [vmem:[%s4511_s0 + $0x250] sm:$0xf0] }
  0x68   :  { %1552 = vmatpush.bf16.msrb.mxu3 %v2981_v25 }
  0x6c   :  { %1553 = vmatpush.bf16.msrb.mxu3 %v2980_v34  ;;  %v2991_v34 = vld [vmem:[%s4509_s1 + $0x140] sm:$0xff] }
  0x6d   :  { %1756 = vmatpush.bf16.msrb.mxu1 %v2991_v34  ;;  %v2469_v34 = vld [vmem:[%s4511_s0 + $0x2d8] sm:$0xf] }
  0x70   :  { %1554 = vmatpush.bf16.msrb.mxu3 %v2979_v46 }
  0x71   :  { %1287 = vmatmul.bf16.gmra.mxu0 %v2246_v37  ;;  %1436 = vmatmul.bf16.gmra.mxu3 %v2530_v38  ;;  %v2533_v37 = vld [vmem:[%s4511_s0 + $0x350] sm:$0xf]  ;;  %v2934_v38 = vld [vmem:[%s4511_s0 + $0x368] sm:$0xf0] }
  0x72   :  { %1386 = vmatmul.bf16.gmra.mxu1 %v2250_v39  ;;  %v2359_v39 = vld [vmem:[%s4511_s0 + $0x214] sm:$0xf0]  ;;  %v2534_v45 = vor.u32 %v2934_v38, %v2533_v37  ;;  %v2948_v37 = vld [vmem:[%s4511_s0 + $0x3d8] sm:$0xf0]  ;;  %v2415_v38 = vld [vmem:[%s4511_s0 + $0x284] sm:$0xf0] }
  0x73   :  { %1485 = vmatmul.bf16.gmra.mxu2 %v2254_v40  ;;  %v2365_v40 = vld [vmem:[%s4511_s0 + $0x200] sm:$0xf]  ;;  %v2362_v49 = vor.u32 %v2888_v36, %v2359_v39  ;;  %v2421_v39 = vld [vmem:[%s4511_s0 + $0x270] sm:$0xf] }
  0x74   :  { %v2366_v50 = vor.u32 %v2892_v41, %v2365_v40  ;;  %v2589_v36 = vld [vmem:[%s4511_s0 + $0x3c0] sm:$0xf]  ;;  %v2906_v40 = vld [vmem:[%s4511_s0 + $0x288] sm:$0xf0] }
  0x81   :  { %1292 = vmatmul.bf16.gmra.mxu0 %v2274_v52  ;;  %1441 = vmatmul.bf16.gmra.mxu3 %v2558_v53 }
  0x82   :  { %1391 = vmatmul.bf16.gmra.mxu1 %v2278_v54 }
  0x83   :  { %1490 = vmatmul.bf16.gmra.mxu2 %v2282_v55  ;;  %v2978_v55 = vld [vmem:[%s4509_s1 + $0xd8] sm:$0xff] }
  0x84   :  { %1555 = vmatpush.bf16.msrb.mxu3 %v2978_v55 }
  0x88   :  { %1556 = vmatpush.bf16.msrb.mxu3 %v2977_v58 }
  0x91   :  { %1297 = vmatmul.bf16.gmra.mxu0 %v2302_v0  ;;  %1446 = vmatmul.bf16.gmra.mxu3 %v2586_v1  ;;  %v2385_v0 = vld [vmem:[%s4511_s0 + $0x230] sm:$0xf]  ;;  %v2898_v1 = vld [vmem:[%s4511_s0 + $0x248] sm:$0xf0] }
  0x92   :  { %1396 = vmatmul.bf16.gmra.mxu1 %v2306_v3  ;;  %v2976_v3 = vld [vmem:[%s4509_s1 + $0xc8] sm:$0xff]  ;;  %v2386_v13 = vor.u32 %v2898_v1, %v2385_v0  ;;  %v2912_v0 = vld [vmem:[%s4511_s0 + $0x2b8] sm:$0xf0]  ;;  %v2909_v1 = vld [vmem:[%s4511_s0 + $0x2a4] sm:$0xf] }
  0x93   :  { %1495 = vmatmul.bf16.gmra.mxu2 %v2310_v4  ;;  %v2895_v4 = vld [vmem:[%s4511_s0 + $0x234] sm:$0xf]  ;;  %1557 = vmatpush.bf16.msrb.mxu3 %v2976_v3  ;;  %v2826_v3 = vld [vmem:[%s4511_s0 + $0xc] sm:$0xf] }
  0x97   :  { %1558 = vmatpush.bf16.msrb.mxu3 %v2975_v16 }
  0x9e   :  { %v1263_v14 = vpop.f32.mrf.mxu0 }
  0x9f   :  { %v1264_v17 = vadd.f32 %v3539_v7, %v1263_v14  ;;  %v1362_v24 = vpop.f32.mrf.mxu1  ;;  %v2394_v14 = vor.u32 %v2899_v9, %v2393_v8 }
  0xa1   :  { %v1363_v20 = vadd.f32 %v1362_v24, %v1264_v17  ;;  %1302 = vmatmul.bf16.gmra.mxu0 %v2330_v19  ;;  %1530 = vmatmul.bf16.vlgmr.msra.gmra.mxu3 %v2506_v11  ;;  %v2390_v11 = vor.u32 %v2895_v4, %v2387_v5  ;;  %v2115_v4 = vld [vmem:[%s4511_s0 + $0x24] sm:$0xf0]  ;;  %v2913_v5 = vld [vmem:[%s4511_s0 + $0x2c0] sm:$0xf0] }
  0xa2   :  { %1401 = vmatmul.bf16.gmra.mxu1 %v2334_v21 }
  0xa3   :  { %1500 = vmatmul.bf16.gmra.mxu2 %v2338_v22 }
  0xa4   :  { %v3572_v26 = vpop.f32.mrf.mxu3 }
  0xa6   :  { %v1461_v27 = vpop.f32.mrf.mxu2  ;;  %v1265_v29 = vpop.f32.mrf.mxu0 }
  0xa7   :  { %v3574_v28 = vadd.f32 %v1461_v27, %v1363_v20  ;;  %v1266_v30 = vadd.f32 %v3539_v7, %v1265_v29  ;;  %v1364_v31 = vpop.f32.mrf.mxu1 }
  0xa9   :  { %v1365_v23 = vadd.f32 %v1364_v31, %v1266_v30  ;;  %v2413_v31 = vld [vmem:[%s4511_s0 + $0x268] sm:$0xf] }
  0xac   :  { %v3607_v42 = vpop.f32.mrf.mxu3 }
  0xae   :  { %v1463_v43 = vpop.f32.mrf.mxu2  ;;  %v1268_v48 = vpop.f32.mrf.mxu0 }
  0xaf   :  { %v3612_v47 = vadd.f32 %v1463_v43, %v1365_v23  ;;  %v1269_v52 = vadd.f32 %v3539_v7, %v1268_v48  ;;  %v1367_v53 = vpop.f32.mrf.mxu1  ;;  %v2905_v23 = vld [vmem:[%s4511_s0 + $0x280] sm:$0xf0] }
  0xb1   :  { %v1368_v54 = vadd.f32 %v1367_v53, %v1269_v52  ;;  %1307 = vmatmul.bf16.gmra.mxu0 %v2358_v44  ;;  %1535 = vmatmul.bf16.gmra.mxu3 %v2534_v45  ;;  %v2414_v44 = vor.u32 %v2905_v23, %v2413_v31  ;;  %v2590_v45 = vor.u32 %v2948_v37, %v2589_v36  ;;  %v2833_v36 = vld [vmem:[%s4511_s0 + $0x44] sm:$0xf]  ;;  %v2143_v37 = vld [vmem:[%s4511_s0 + $0x5c] sm:$0xf0] }
  0xb2   :  { %1406 = vmatmul.bf16.gmra.mxu1 %v2362_v49  ;;  %v2418_v49 = vor.u32 %v2902_v35, %v2415_v38  ;;  %v2919_v35 = vld [vmem:[%s4511_s0 + $0x2f0] sm:$0xf0]  ;;  %v1336_v38 = vadd.f32 %v3539_v7, %v3607_v42 }
  0xb3   :  { %1505 = vmatmul.bf16.gmra.mxu2 %v2366_v50  ;;  %v2422_v50 = vor.u32 %v2906_v40, %v2421_v39  ;;  %v2471_v39 = vld [vmem:[%s4511_s0 + $0x2f4] sm:$0xf0]  ;;  %v2477_v40 = vld [vmem:[%s4511_s0 + $0x2e0] sm:$0xf] }
  0xb4   :  { %v3621_v56 = vpop.f32.mrf.mxu3 }
  0xb6   :  { %v1466_v57 = vpop.f32.mrf.mxu2  ;;  %v1270_v60 = vpop.f32.mrf.mxu0 }
  0xb7   :  { %v3626_v59 = vadd.f32 %v1466_v57, %v1368_v54  ;;  %v1271_v61 = vadd.f32 %v3539_v7, %v1270_v60  ;;  %v1369_v62 = vpop.f32.mrf.mxu1 }
  0xb9   :  { %v1370_v63 = vadd.f32 %v1369_v62, %v1271_v61 }
  0xbc   :  { %v3656_v10 = vpop.f32.mrf.mxu3 }
  0xbe   :  { %v1468_v12 = vpop.f32.mrf.mxu2  ;;  %v1273_v19 = vpop.f32.mrf.mxu0 }
  0xbf   :  { %v3661_v18 = vadd.f32 %v1468_v12, %v1370_v63  ;;  %v1274_v21 = vadd.f32 %v3539_v7, %v1273_v19  ;;  %v1372_v22 = vpop.f32.mrf.mxu1  ;;  %v2441_v63 = vld [vmem:[%s4511_s0 + $0x2a0] sm:$0xf]  ;;  %v2446_v19 = vor.u32 %v2909_v1, %v2443_v6 }
  0xc0   :  { %v2442_v12 = vor.u32 %v2912_v0, %v2441_v63 }
  0xc1   :  { %v1373_v17 = vadd.f32 %v1372_v22, %v1274_v21  ;;  %1312 = vmatmul.bf16.gmra.mxu0 %v2386_v13  ;;  %1540 = vmatmul.bf16.gmra.mxu3 %v2562_v15  ;;  %v2118_v13 = vor.u32 %v2826_v3, %v2115_v4 }
  0xc2   :  { %1411 = vmatmul.bf16.gmra.mxu1 %v2390_v11  ;;  %v2450_v11 = vor.u32 %v2913_v5, %v2449_v2  ;;  %v2840_v5 = vld [vmem:[%s4511_s0 + $0x7c] sm:$0xf] }
  0xc3   :  { %1510 = vmatmul.bf16.gmra.mxu2 %v2394_v14 }
  0xc4   :  { %v3664_v24 = vpop.f32.mrf.mxu3 }
  0xc6   :  { %v1471_v20 = vpop.f32.mrf.mxu2  ;;  %v1275_v27 = vpop.f32.mrf.mxu0 }
  0xc7   :  { %v3666_v25 = vadd.f32 %v1471_v20, %v1373_v17  ;;  %v1276_v29 = vadd.f32 %v3539_v7, %v1275_v27  ;;  %v1374_v30 = vpop.f32.mrf.mxu1  ;;  %v1334_v17 = vadd.f32 %v3539_v7, %v3572_v26  ;;  %v2916_v26 = vld [vmem:[%s4511_s0 + $0x2dc] sm:$0xf] }
  0xc9   :  { %v1375_v32 = vadd.f32 %v1374_v30, %v1276_v29 }
  0xcc   :  { %v3699_v41 = vpop.f32.mrf.mxu3 }
  0xce   :  { %v1473_v43 = vpop.f32.mrf.mxu2  ;;  %v1278_v48 = vpop.f32.mrf.mxu0 }
  0xcf   :  { %v3701_v46 = vadd.f32 %v1473_v43, %v1375_v32  ;;  %v1279_v51 = vadd.f32 %v3539_v7, %v1278_v48  ;;  %v1377_v52 = vpop.f32.mrf.mxu1  ;;  %v2920_v43 = vld [vmem:[%s4511_s0 + $0x2f8] sm:$0xf0] }
  0xd1   :  { %v1378_v53 = vadd.f32 %v1377_v52, %v1279_v51  ;;  %1317 = vmatmul.bf16.gmra.mxu0 %v2414_v44  ;;  %1545 = vmatmul.bf16.gmra.mxu3 %v2590_v45  ;;  %v2474_v52 = vor.u32 %v2916_v26, %v2471_v39  ;;  %v1344_v26 = vadd.f32 %v3539_v7, %v3664_v24  ;;  %v2149_v24 = vld [vmem:[%s4511_s0 + $0x48] sm:$0xf] }
  0xd2   :  { %1416 = vmatmul.bf16.gmra.mxu1 %v2418_v49  ;;  %v2470_v49 = vor.u32 %v2919_v35, %v2469_v34 }
  0xd3   :  { %1515 = vmatmul.bf16.gmra.mxu2 %v2422_v50  ;;  %v2146_v50 = vor.u32 %v2833_v36, %v2143_v37 }
  0xd4   :  { %v3704_v54 = vpop.f32.mrf.mxu3 }
  0xd6   :  { %v1476_v55 = vpop.f32.mrf.mxu2  ;;  %v1280_v58 = vpop.f32.mrf.mxu0 }
  0xd7   :  { %v3706_v57 = vadd.f32 %v1476_v55, %v1378_v53  ;;  %v1281_v60 = vadd.f32 %v3539_v7, %v1280_v58  ;;  %v1379_v61 = vpop.f32.mrf.mxu1  ;;  %v2478_v53 = vor.u32 %v2920_v43, %v2477_v40 }
  0xd9   :  { %v1380_v62 = vadd.f32 %v1379_v61, %v1281_v60  ;;  %v1339_v61 = vadd.f32 %v3539_v7, %v3621_v56  ;;  %v2121_v56 = vld [vmem:[%s4511_s0 + $0x10] sm:$0xf] }
  0xdc   :  { %v3733_v8 = vpop.f32.mrf.mxu3 }
  0xde   :  { %v1478_v9 = vpop.f32.mrf.mxu2  ;;  %v1283_v16 = vpop.f32.mrf.mxu0 }
  0xdf   :  { %v3735_v15 = vadd.f32 %v1478_v9, %v1380_v62  ;;  %v1284_v14 = vadd.f32 %v3539_v7, %v1283_v16  ;;  %v1382_v21 = vpop.f32.mrf.mxu1  ;;  %v2171_v9 = vld [vmem:[%s4511_s0 + $0x94] sm:$0xf0]  ;;  %v1341_v16 = vadd.f32 %v3539_v7, %v3656_v10 }
  0xe1   :  { %v1383_v22 = vadd.f32 %v1382_v21, %v1284_v14  ;;  %1322 = vmatmul.bf16.gmra.mxu0 %v2442_v12  ;;  %1559 = vmatmul.bf16.vlgmr.msrb.gmra.mxu3 %v2118_v13  ;;  %v2830_v12 = vld [vmem:[%s4511_s0 + $0x28] sm:$0xf0]  ;;  %v2827_v13 = vld [vmem:[%s4511_s0 + $0x14] sm:$0xf] }
  0xe2   :  { %1421 = vmatmul.bf16.gmra.mxu1 %v2446_v19  ;;  %v2123_v19 = vld [vmem:[%s4511_s0 + $0x2c] sm:$0xf0]  ;;  %v2831_v14 = vld [vmem:[%s4511_s0 + $0x30] sm:$0xf0] }
  0xe3   :  { %1520 = vmatmul.bf16.gmra.mxu2 %v2450_v11  ;;  %v2129_v11 = vld [vmem:[%s4511_s0 + $0x18] sm:$0xf] }
  0xe4   :  { %v1432_v20 = vpop.f32.mrf.mxu3 }
  0xe5   :  { %v3740_v27 = vadd.f32 %v1432_v20, %v1334_v17  ;;  %v2174_v20 = vor.u32 %v2840_v5, %v2171_v9 }
  0xe6   :  { %v1481_v29 = vpop.f32.mrf.mxu2  ;;  %v1285_v31 = vpop.f32.mrf.mxu0 }
  0xe7   :  { %v3742_v30 = vadd.f32 %v1481_v29, %v1383_v22  ;;  %v1286_v32 = vadd.f32 %v3539_v7, %v1285_v31  ;;  %v1384_v23 = vpop.f32.mrf.mxu1  ;;  %v2122_v29 = vor.u32 %v2830_v12, %v2121_v56 }
  0xe9   :  { %v1385_v33 = vadd.f32 %v1384_v23, %v1286_v32  ;;  %v2126_v32 = vor.u32 %v2827_v13, %v2123_v19  ;;  %v2130_v23 = vor.u32 %v2831_v14, %v2129_v11  ;;  %v1349_v13 = vadd.f32 %v3539_v7, %v3704_v54  ;;  %v2177_v54 = vld [vmem:[%s4511_s0 + $0x80] sm:$0xf] }
  0xec   :  { %v1434_v44 = vpop.f32.mrf.mxu3 }
  0xed   :  { %v3771_v45 = vadd.f32 %v1434_v44, %v1336_v38 }
  0xee   :  { %v1483_v48 = vpop.f32.mrf.mxu2  ;;  %v1288_v42 = vpop.f32.mrf.mxu0 }
  0xef   :  { %v3773_v51 = vadd.f32 %v1483_v48, %v1385_v33  ;;  %v1289_v55 = vadd.f32 %v3539_v7, %v1288_v42  ;;  %v1387_v58 = vpop.f32.mrf.mxu1  ;;  %v2837_v42 = vld [vmem:[%s4511_s0 + $0x60] sm:$0xf0] }
  0xf1   :  { %v1388_v60 = vadd.f32 %v1387_v58, %v1289_v55  ;;  %1327 = vmatmul.bf16.gmra.mxu0 %v2470_v49  ;;  %1564 = vmatmul.bf16.gmra.mxu3 %v2146_v50  ;;  %v2847_v49 = vld [vmem:[%s4511_s0 + $0xb4] sm:$0xf]  ;;  %v2199_v50 = vld [vmem:[%s4511_s0 + $0xcc] sm:$0xf0]  ;;  %v2151_v55 = vld [vmem:[%s4511_s0 + $0x64] sm:$0xf0] }
  0xf2   :  { %1426 = vmatmul.bf16.gmra.mxu1 %v2474_v52  ;;  %v2834_v52 = vld [vmem:[%s4511_s0 + $0x4c] sm:$0xf]  ;;  %v2157_v58 = vld [vmem:[%s4511_s0 + $0x50] sm:$0xf] }
  0xf3   :  { %1525 = vmatmul.bf16.gmra.mxu2 %v2478_v53  ;;  %v1346_v53 = vadd.f32 %v3539_v7, %v3699_v41 }
  0xf4   :  { %v1437_v62 = vpop.f32.mrf.mxu3 }
  0xf5   :  { %v3778_v63 = vadd.f32 %v1437_v62, %v1339_v61 }
  0xf6   :  { %v1486_v0 = vpop.f32.mrf.mxu2  ;;  %v1290_v3 = vpop.f32.mrf.mxu0 }
  0xf7   :  { %v3780_v1 = vadd.f32 %v1486_v0, %v1388_v60  ;;  %v1291_v4 = vadd.f32 %v3539_v7, %v1290_v3  ;;  %v1389_v6 = vpop.f32.mrf.mxu1  ;;  %v2838_v60 = vld [vmem:[%s4511_s0 + $0x68] sm:$0xf0]  ;;  %v2202_v3 = vor.u32 %v2847_v49, %v2199_v50 }
  0xf8   :  { %v2158_v5 = vor.u32 %v2838_v60, %v2157_v58 }
  0xf9   :  { %v1390_v2 = vadd.f32 %v1389_v6, %v1291_v4  ;;  %v2150_v4 = vor.u32 %v2837_v42, %v2149_v24 }
  0xfc   :  { %v1439_v21 = vpop.f32.mrf.mxu3 }
  0xfd   :  { %v3809_v22 = vadd.f32 %v1439_v21, %v1341_v16 }
  0xfe   :  { %v1488_v17 = vpop.f32.mrf.mxu2  ;;  %v1293_v10 = vpop.f32.mrf.mxu0 }
  0xff   :  { %v3811_v31 = vadd.f32 %v1488_v17, %v1390_v2  ;;  %v1294_v33 = vadd.f32 %v3539_v7, %v1293_v10  ;;  %v1392_v34 = vpop.f32.mrf.mxu1  ;;  %v2154_v2 = vor.u32 %v2834_v52, %v2151_v55  ;;  %v2854_v10 = vld [vmem:[%s4511_s0 + $0xec] sm:$0xf] }
 0x101   :  { %v1393_v35 = vadd.f32 %v1392_v34, %v1294_v33  ;;  %1569 = vmatmul.bf16.gmra.mxu3 %v2174_v20  ;;  %1658 = vmatmul.bf16.vlgmr.msrb.gmra.mxu0 %v2122_v29  ;;  %v2841_v33 = vld [vmem:[%s4511_s0 + $0x84] sm:$0xf]  ;;  %v1351_v34 = vadd.f32 %v3539_v7, %v3733_v8 }
 0x102   :  { %1757 = vmatmul.bf16.vlgmr.msrb.gmra.mxu1 %v2126_v32  ;;  %v2227_v32 = vld [vmem:[%s4511_s0 + $0x104] sm:$0xf0] }
 0x103   :  { %2807 = vmatmul.msk.bf16.vlgmr.msrb.gmra.mxu2 %vm1199_vm0, %v2130_v23  ;;  %v2844_v23 = vld [vmem:[%s4511_s0 + $0x98] sm:$0xf0] }
 0x104   :  { %v1442_v36 = vpop.f32.mrf.mxu3 }
 0x105   :  { %v3817_v37 = vadd.f32 %v1442_v36, %v1344_v26  ;;  %v2185_v26 = vld [vmem:[%s4511_s0 + $0x88] sm:$0xf]  ;;  %v2845_v36 = vld [vmem:[%s4511_s0 + $0xa0] sm:$0xf0] }
 0x106   :  { %v1491_v38 = vpop.f32.mrf.mxu2  ;;  %v1295_v40 = vpop.f32.mrf.mxu0  ;;  %v2186_v24 = vor.u32 %v2845_v36, %v2185_v26 }
 0x107   :  { %v3819_v39 = vadd.f32 %v1491_v38, %v1393_v35  ;;  %v1296_v43 = vadd.f32 %v3539_v7, %v1295_v40  ;;  %v1394_v44 = vpop.f32.mrf.mxu1  ;;  %v2179_v35 = vld [vmem:[%s4511_s0 + $0x9c] sm:$0xf0] }
 0x108   :  { %v2182_v50 = vor.u32 %v2841_v33, %v2179_v35 }
 0x109   :  { %v1395_v48 = vadd.f32 %v1394_v44, %v1296_v43  ;;  %v2230_v44 = vor.u32 %v2854_v10, %v2227_v32 }
 0x10c   :  { %v1444_v61 = vpop.f32.mrf.mxu3 }
 0x10d   :  { %v3848_v62 = vadd.f32 %v1444_v61, %v1346_v53 }
 0x10e   :  { %v1493_v0 = vpop.f32.mrf.mxu2  ;;  %v1298_v41 = vpop.f32.mrf.mxu0 }
 0x10f   :  { %v3850_v6 = vadd.f32 %v1493_v0, %v1395_v48  ;;  %v1299_v9 = vadd.f32 %v3539_v7, %v1298_v41  ;;  %v1397_v56 = vpop.f32.mrf.mxu1  ;;  %v2178_v48 = vor.u32 %v2844_v23, %v2177_v54 }
 0x111   :  { %v1398_v12 = vadd.f32 %v1397_v56, %v1299_v9  ;;  %1574 = vmatmul.bf16.gmra.mxu3 %v2202_v3  ;;  %1663 = vmatmul.bf16.gmra.mxu0 %v2150_v4  ;;  %v2851_v9 = vld [vmem:[%s4511_s0 + $0xd0] sm:$0xf0]  ;;  %v2848_v56 = vld [vmem:[%s4511_s0 + $0xbc] sm:$0xf] }
 0x112   :  { %1762 = vmatmul.bf16.gmra.mxu1 %v2154_v2  ;;  %v2861_v2 = vld [vmem:[%s4511_s0 + $0x124] sm:$0xf] }
 0x113   :  { %2808 = vmatmul.msk.bf16.gmra.mxu2 %vm1199_vm0, %v2158_v5  ;;  %v2255_v5 = vld [vmem:[%s4511_s0 + $0x13c] sm:$0xf0] }
 0x114   :  { %v1447_v16 = vpop.f32.mrf.mxu3 }
 0x115   :  { %v3856_v19 = vadd.f32 %v1447_v16, %v1349_v13  ;;  %v2213_v13 = vld [vmem:[%s4511_s0 + $0xc0] sm:$0xf]  ;;  %v2852_v16 = vld [vmem:[%s4511_s0 + $0xd8] sm:$0xf0] }
 0x116   :  { %v1496_v11 = vpop.f32.mrf.mxu2  ;;  %v1300_v21 = vpop.f32.mrf.mxu0  ;;  %v2214_v23 = vor.u32 %v2852_v16, %v2213_v13 }
 0x117   :  { %v3858_v14 = vadd.f32 %v1496_v11, %v1398_v12  ;;  %v1301_v17 = vadd.f32 %v3539_v7, %v1300_v21  ;;  %v1399_v20 = vpop.f32.mrf.mxu1  ;;  %v2207_v12 = vld [vmem:[%s4511_s0 + $0xd4] sm:$0xf0] }
 0x118   :  { %v2210_v54 = vor.u32 %v2848_v56, %v2207_v12 }
 0x119   :  { %v1400_v29 = vadd.f32 %v1399_v20, %v1301_v17  ;;  %v2258_v20 = vor.u32 %v2861_v2, %v2255_v5 }
 0x11c   :  { %v1449_v38 = vpop.f32.mrf.mxu3 }
 0x11d   :  { %v3887_v40 = vadd.f32 %v1449_v38, %v1351_v34 }
 0x11e   :  { %v1498_v43 = vpop.f32.mrf.mxu2  ;;  %v1303_v8 = vpop.f32.mrf.mxu0 }
 0x11f   :  { %v3889_v49 = vadd.f32 %v1498_v43, %v1400_v29  ;;  %v1304_v42 = vadd.f32 %v3539_v7, %v1303_v8  ;;  %v1402_v52 = vpop.f32.mrf.mxu1 }
 0x121   :  { %v1403_v53 = vadd.f32 %v1402_v52, %v1304_v42  ;;  %1579 = vmatmul.bf16.gmra.mxu3 %v2230_v44  ;;  %1668 = vmatmul.bf16.gmra.mxu0 %v2178_v48  ;;  %v2858_v42 = vld [vmem:[%s4511_s0 + $0x108] sm:$0xf0]  ;;  %v2855_v52 = vld [vmem:[%s4511_s0 + $0xf4] sm:$0xf] }
 0x122   :  { %1767 = vmatmul.bf16.gmra.mxu1 %v2182_v50  ;;  %v2868_v50 = vld [vmem:[%s4511_s0 + $0x15c] sm:$0xf] }
 0x123   :  { %2809 = vmatmul.msk.bf16.gmra.mxu2 %vm1199_vm0, %v2186_v24  ;;  %v2283_v24 = vld [vmem:[%s4511_s0 + $0x174] sm:$0xf0] }
 0x124   :  { %v1531_v55 = vpop.f32.mrf.mxu3 }
 0x125   :  { %v3894_v60 = vadd.f32 %v1531_v55, %v3740_v27  ;;  %v2205_v27 = vld [vmem:[%s4511_s0 + $0xb8] sm:$0xf] }
 0x126   :  { %v1501_v58 = vpop.f32.mrf.mxu2  ;;  %v1305_v0 = vpop.f32.mrf.mxu0  ;;  %v2206_v29 = vor.u32 %v2851_v9, %v2205_v27  ;;  %v2241_v55 = vld [vmem:[%s4511_s0 + $0xf8] sm:$0xf] }
 0x127   :  { %v3896_v61 = vadd.f32 %v1501_v58, %v1403_v53  ;;  %v1306_v3 = vadd.f32 %v3539_v7, %v1305_v0  ;;  %v1404_v4 = vpop.f32.mrf.mxu1  ;;  %v2235_v53 = vld [vmem:[%s4511_s0 + $0x10c] sm:$0xf0]  ;;  %v2859_v58 = vld [vmem:[%s4511_s0 + $0x110] sm:$0xf0] }
 0x128   :  { %v2238_v9 = vor.u32 %v2855_v52, %v2235_v53  ;;  %v2242_v56 = vor.u32 %v2859_v58, %v2241_v55 }
 0x129   :  { %v1405_v41 = vadd.f32 %v1404_v4, %v1306_v3 }
 0x12c   :  { %v1533_v11 = vpop.f32.mrf.mxu3 }
 0x12d   :  { %v3924_v17 = vadd.f32 %v1533_v11, %v3771_v45 }
 0x12e   :  { %v1503_v21 = vpop.f32.mrf.mxu2  ;;  %v1308_v32 = vpop.f32.mrf.mxu0 }
 0x12f   :  { %v3926_v10 = vadd.f32 %v1503_v21, %v1405_v41  ;;  %v1309_v33 = vadd.f32 %v3539_v7, %v1308_v32  ;;  %v1407_v34 = vpop.f32.mrf.mxu1  ;;  %v2286_v41 = vor.u32 %v2868_v50, %v2283_v24 }
 0x131   :  { %v1408_v35 = vadd.f32 %v1407_v34, %v1309_v33  ;;  %1584 = vmatmul.bf16.gmra.mxu3 %v2258_v20  ;;  %1673 = vmatmul.bf16.gmra.mxu0 %v2206_v29  ;;  %v2875_v33 = vld [vmem:[%s4511_s0 + $0x194] sm:$0xf]  ;;  %v2311_v34 = vld [vmem:[%s4511_s0 + $0x1ac] sm:$0xf0] }
 0x132   :  { %1772 = vmatmul.bf16.gmra.mxu1 %v2210_v54  ;;  %v2314_v24 = vor.u32 %v2875_v33, %v2311_v34 }
 0x133   :  { %2810 = vmatmul.msk.bf16.gmra.mxu2 %vm1199_vm0, %v2214_v23 }
 0x134   :  { %v1536_v26 = vpop.f32.mrf.mxu3 }
 0x135   :  { %v3931_v45 = vadd.f32 %v1536_v26, %v3778_v63  ;;  %v2233_v63 = vld [vmem:[%s4511_s0 + $0xf0] sm:$0xf]  ;;  %v2862_v26 = vld [vmem:[%s4511_s0 + $0x12c] sm:$0xf] }
 0x136   :  { %v1506_v36 = vpop.f32.mrf.mxu2  ;;  %v1310_v43 = vpop.f32.mrf.mxu0  ;;  %v2234_v2 = vor.u32 %v2858_v42, %v2233_v63 }
 0x137   :  { %v3933_v38 = vadd.f32 %v1506_v36, %v1408_v35  ;;  %v1311_v44 = vadd.f32 %v3539_v7, %v1310_v43  ;;  %v1409_v48 = vpop.f32.mrf.mxu1  ;;  %v2865_v35 = vld [vmem:[%s4511_s0 + $0x140] sm:$0xf0]  ;;  %v2263_v36 = vld [vmem:[%s4511_s0 + $0x144] sm:$0xf0]  ;;  %v2269_v43 = vld [vmem:[%s4511_s0 + $0x130] sm:$0xf] }
 0x138   :  { %v2266_v53 = vor.u32 %v2862_v26, %v2263_v36 }
 0x139   :  { %v1410_v8 = vadd.f32 %v1409_v48, %v1311_v44  ;;  %v2866_v44 = vld [vmem:[%s4511_s0 + $0x148] sm:$0xf0] }
 0x13a   :  { %v2270_v55 = vor.u32 %v2866_v44, %v2269_v43 }
 0x13c   :  { %v1538_v0 = vpop.f32.mrf.mxu3 }
 0x13d   :  { %v3961_v4 = vadd.f32 %v1538_v0, %v3809_v22 }
 0x13e   :  { %v1508_v3 = vpop.f32.mrf.mxu2  ;;  %v1313_v27 = vpop.f32.mrf.mxu0 }
 0x13f   :  { %v3963_v5 = vadd.f32 %v1508_v3, %v1410_v8  ;;  %v1314_v12 = vadd.f32 %v3539_v7, %v1313_v27  ;;  %v1412_v13 = vpop.f32.mrf.mxu1 }
 0x141   :  { %v1413_v16 = vadd.f32 %v1412_v13, %v1314_v12  ;;  %1589 = vmatmul.bf16.gmra.mxu3 %v2286_v41  ;;  %1678 = vmatmul.bf16.gmra.mxu0 %v2234_v2 }
 0x142   :  { %1777 = vmatmul.bf16.gmra.mxu1 %v2238_v9 }
 0x143   :  { %2811 = vmatmul.msk.bf16.gmra.mxu2 %vm1199_vm0, %v2242_v56 }
 0x144   :  { %v1541_v11 = vpop.f32.mrf.mxu3 }
 0x145   :  { %v3968_v22 = vadd.f32 %v1541_v11, %v3817_v37  ;;  %v2261_v37 = vld [vmem:[%s4511_s0 + $0x128] sm:$0xf] }
 0x146   :  { %v1511_v21 = vpop.f32.mrf.mxu2  ;;  %v1315_v29 = vpop.f32.mrf.mxu0  ;;  %v2262_v63 = vor.u32 %v2865_v35, %v2261_v37  ;;  %v2339_v11 = vld [vmem:[%s4511_s0 + $0x1e4] sm:$0xf0] }
 0x147   :  { %v3970_v20 = vadd.f32 %v1511_v21, %v1413_v16  ;;  %v1316_v32 = vadd.f32 %v3539_v7, %v1315_v29  ;;  %v1414_v54 = vpop.f32.mrf.mxu1  ;;  %v2882_v16 = vld [vmem:[%s4511_s0 + $0x1cc] sm:$0xf]  ;;  %v2872_v21 = vld [vmem:[%s4511_s0 + $0x178] sm:$0xf0]  ;;  %v2869_v29 = vld [vmem:[%s4511_s0 + $0x164] sm:$0xf] }
 0x148   :  { %v2342_v35 = vor.u32 %v2882_v16, %v2339_v11  ;;  %v2325_v16 = vld [vmem:[%s4511_s0 + $0x1a0] sm:$0xf]  ;;  %v2880_v11 = vld [vmem:[%s4511_s0 + $0x1b8] sm:$0xf0] }
 0x149   :  { %v1415_v23 = vadd.f32 %v1414_v54, %v1316_v32  ;;  %v2291_v32 = vld [vmem:[%s4511_s0 + $0x17c] sm:$0xf0]  ;;  %v2297_v54 = vld [vmem:[%s4511_s0 + $0x168] sm:$0xf] }
 0x14a   :  { %v2294_v44 = vor.u32 %v2869_v29, %v2291_v32 }
 0x14c   :  { %v1543_v48 = vpop.f32.mrf.mxu3 }
 0x14d   :  { %v3998_v50 = vadd.f32 %v1543_v48, %v3848_v62 }
 0x14e   :  { %v1513_v8 = vpop.f32.mrf.mxu2  ;;  %v1318_v52 = vpop.f32.mrf.mxu0 }
 0x14f   :  { %v4000_v42 = vadd.f32 %v1513_v8, %v1415_v23  ;;  %v1319_v58 = vadd.f32 %v3539_v7, %v1318_v52  ;;  %v1417_v0 = vpop.f32.mrf.mxu1  ;;  %v2873_v23 = vld [vmem:[%s4511_s0 + $0x180] sm:$0xf0] }
 0x150   :  { %v2298_v48 = vor.u32 %v2873_v23, %v2297_v54 }
 0x151   :  { %v1418_v3 = vadd.f32 %v1417_v0, %v1319_v58  ;;  %1594 = vmatmul.bf16.gmra.mxu3 %v2314_v24  ;;  %1683 = vmatmul.bf16.gmra.mxu0 %v2262_v63 }
 0x152   :  { %1782 = vmatmul.bf16.gmra.mxu1 %v2266_v53 }
 0x153   :  { %2812 = vmatmul.msk.bf16.gmra.mxu2 %vm1199_vm0, %v2270_v55 }
 0x154   :  { %v1546_v41 = vpop.f32.mrf.mxu3 }
 0x155   :  { %v4005_v62 = vadd.f32 %v1546_v41, %v3856_v19  ;;  %v2289_v19 = vld [vmem:[%s4511_s0 + $0x160] sm:$0xf]  ;;  %v2889_v41 = vld [vmem:[%s4511_s0 + $0x204] sm:$0xf] }
 0x156   :  { %v1516_v2 = vpop.f32.mrf.mxu2  ;;  %v1320_v9 = vpop.f32.mrf.mxu0  ;;  %v2290_v26 = vor.u32 %v2872_v21, %v2289_v19 }
 0x157   :  { %v4007_v27 = vadd.f32 %v1516_v2, %v1418_v3  ;;  %v1321_v56 = vadd.f32 %v3539_v7, %v1320_v9  ;;  %v1419_v12 = vpop.f32.mrf.mxu1  ;;  %v2367_v2 = vld [vmem:[%s4511_s0 + $0x21c] sm:$0xf0]  ;;  %v2317_v9 = vld [vmem:[%s4511_s0 + $0x198] sm:$0xf] }
 0x158   :  { %v2370_v29 = vor.u32 %v2889_v41, %v2367_v2  ;;  %v2886_v41 = vld [vmem:[%s4511_s0 + $0x1e8] sm:$0xf0]  ;;  %v2347_v2 = vld [vmem:[%s4511_s0 + $0x1ec] sm:$0xf0] }
 0x159   :  { %v1420_v13 = vadd.f32 %v1419_v12, %v1321_v56  ;;  %v2879_v56 = vld [vmem:[%s4511_s0 + $0x1b0] sm:$0xf0]  ;;  %v2876_v12 = vld [vmem:[%s4511_s0 + $0x19c] sm:$0xf] }
 0x15a   :  { %v2318_v32 = vor.u32 %v2879_v56, %v2317_v9  ;;  %v2353_v9 = vld [vmem:[%s4511_s0 + $0x1d8] sm:$0xf]  ;;  %v2887_v56 = vld [vmem:[%s4511_s0 + $0x1f0] sm:$0xf0] }
 0x15c   :  { %v1548_v33 = vpop.f32.mrf.mxu3 }
 0x15d   :  { %v4035_v37 = vadd.f32 %v1548_v33, %v3887_v40 }
 0x15e   :  { %v1518_v34 = vpop.f32.mrf.mxu2  ;;  %v1323_v43 = vpop.f32.mrf.mxu0 }
 0x15f   :  { %v4037_v36 = vadd.f32 %v1518_v34, %v1420_v13  ;;  %v1324_v8 = vadd.f32 %v3539_v7, %v1323_v43  ;;  %v1422_v24 = vpop.f32.mrf.mxu1  ;;  %v2319_v13 = vld [vmem:[%s4511_s0 + $0x1b4] sm:$0xf0]  ;;  %v2326_v34 = vor.u32 %v2880_v11, %v2325_v16 }
 0x160   :  { %v2322_v33 = vor.u32 %v2876_v12, %v2319_v13 }
 0x161   :  { %v1423_v63 = vadd.f32 %v1422_v24, %v1324_v8  ;;  %1599 = vmatmul.bf16.gmra.mxu3 %v2342_v35  ;;  %1688 = vmatmul.bf16.gmra.mxu0 %v2290_v26 }
 0x162   :  { %1787 = vmatmul.bf16.gmra.mxu1 %v2294_v44 }
 0x163   :  { %2813 = vmatmul.msk.bf16.gmra.mxu2 %vm1199_vm0, %v2298_v48 }
 0x164   :  { %v1560_v52 = vpop.f32.mrf.mxu3 }
 0x166   :  { %v1521_v53 = vpop.f32.mrf.mxu2  ;;  %v1325_v55 = vpop.f32.mrf.mxu0 }
 0x167   :  { %v4041_v40 = vadd.f32 %v1521_v53, %v1423_v63  ;;  %v1326_v58 = vadd.f32 %v3539_v7, %v1325_v55  ;;  %v1424_v0 = vpop.f32.mrf.mxu1 }
 0x169   :  { %v1425_v3 = vadd.f32 %v1424_v0, %v1326_v58  ;;  %v2896_v58 = vld [vmem:[%s4511_s0 + $0x23c] sm:$0xf]  ;;  %v2395_v0 = vld [vmem:[%s4511_s0 + $0x254] sm:$0xf0] }
 0x16a   :  { %v2398_v16 = vor.u32 %v2896_v58, %v2395_v0  ;;  %v4109_v58 = vld [vmem:[%s4512_s3] ss:$0 sm:$0xff] }
 0x16c   :  { %v1562_v19 = vpop.f32.mrf.mxu3 }
 0x16e   :  { %v1523_v21 = vpop.f32.mrf.mxu2  ;;  %v1328_v23 = vpop.f32.mrf.mxu0 }
 0x16f   :  { %v4068_v54 = vadd.f32 %v1523_v21, %v1425_v3  ;;  %v1329_v35 = vadd.f32 %v3539_v7, %v1328_v23  ;;  %v1427_v26 = vpop.f32.mrf.mxu1  ;;  %v2345_v3 = vld [vmem:[%s4511_s0 + $0x1d0] sm:$0xf]  ;;  %v2354_v23 = vor.u32 %v2887_v56, %v2353_v9 }
 0x170   :  { %v2346_v11 = vor.u32 %v2886_v41, %v2345_v3  ;;  %v2890_v3 = vld [vmem:[%s4511_s0 + $0x20c] sm:$0xf]  ;;  %v2375_v41 = vld [vmem:[%s4511_s0 + $0x224] sm:$0xf0] }
 0x171   :  { %v1428_v43 = vadd.f32 %v1427_v26, %v1329_v35  ;;  %1604 = vmatmul.bf16.gmra.mxu3 %v2370_v29  ;;  %1693 = vmatmul.bf16.gmra.mxu0 %v2318_v32 }
 0x172   :  { %1792 = vmatmul.bf16.gmra.mxu1 %v2322_v33 }
 0x173   :  { %2814 = vmatmul.msk.bf16.gmra.mxu2 %vm1199_vm0, %v2326_v34  ;;  %v1561_v34 = vadd.f32 %v1560_v52, %v3574_v28  ;;  %v2903_v28 = vld [vmem:[%s4511_s0 + $0x274] sm:$0xf]  ;;  %v2423_v52 = vld [vmem:[%s4511_s0 + $0x28c] sm:$0xf0] }
 0x174   :  { %v1565_v44 = vpop.f32.mrf.mxu3 }
 0x176   :  { %v1526_v48 = vpop.f32.mrf.mxu2  ;;  %v1330_v24 = vpop.f32.mrf.mxu0 }
 0x177   :  { %v4072_v8 = vadd.f32 %v1526_v48, %v1428_v43  ;;  %v1331_v63 = vadd.f32 %v3539_v7, %v1330_v24  ;;  %v1429_v53 = vpop.f32.mrf.mxu1  ;;  %v2883_v7 = vld [vmem:[%s4511_s0 + $0x1d4] sm:$0xf]  ;;  %v1563_v48 = vadd.f32 %v1562_v19, %v3612_v47  ;;  %v2373_v47 = vld [vmem:[%s4511_s0 + $0x208] sm:$0xf]  ;;  %v2893_v19 = vld [vmem:[%s4511_s0 + $0x220] sm:$0xf0] }
 0x178   :  { %v2350_v32 = vor.u32 %v2883_v7, %v2347_v2  ;;  %v2381_v7 = vld [vmem:[%s4511_s0 + $0x210] sm:$0xf]  ;;  %v2894_v2 = vld [vmem:[%s4511_s0 + $0x228] sm:$0xf0] }
 0x179   :  { %v1430_v55 = vadd.f32 %v1429_v53, %v1331_v63 }
 0x17c   :  { %v1567_v12 = vpop.f32.mrf.mxu3 }
 0x17e   :  { %v1528_v13 = vpop.f32.mrf.mxu2  ;;  %v1659_v29 = vpop.f32.mrf.mxu0 }
 0x17f   :  { %v4099_v21 = vadd.f32 %v1528_v13, %v1430_v55  ;;  %v1758_v33 = vpop.f32.mrf.mxu1  ;;  %v1660_v35 = vadd.f32 %v1659_v29, %v1561_v34  ;;  %v2378_v34 = vor.u32 %v2890_v3, %v2375_v41  ;;  %v2910_v41 = vld [vmem:[%s4511_s0 + $0x2ac] sm:$0xf] }
 0x181   :  { %1609 = vmatmul.bf16.gmra.mxu3 %v2398_v16  ;;  %1698 = vmatmul.bf16.gmra.mxu0 %v2346_v11  ;;  %v1759_v53 = vadd.f32 %v1758_v33, %v1660_v35  ;;  %v2426_v16 = vor.u32 %v2903_v28, %v2423_v52  ;;  %v2374_v11 = vor.u32 %v2893_v19, %v2373_v47 }
 0x182   :  { %1797 = vmatmul.bf16.gmra.mxu1 %v2350_v32  ;;  %v4139_v32 = vld [vmem:[%s4513_s4] ss:$0 sm:$0xff]  ;;  %v2382_v35 = vor.u32 %v2894_v2, %v2381_v7  ;;  %v1568_v47 = vadd.f32 %v1567_v12, %v3661_v18  ;;  %v2451_v7 = vld [vmem:[%s4511_s0 + $0x2c4] sm:$0xf0]  ;;  %v2900_v12 = vld [vmem:[%s4511_s0 + $0x258] sm:$0xf0] }
 0x183   :  { %2815 = vmatmul.msk.bf16.gmra.mxu2 %vm1199_vm0, %v2354_v23  ;;  %v2401_v18 = vld [vmem:[%s4511_s0 + $0x240] sm:$0xf] }
 0x184   :  { %v4103_v26 = vpop.f32.mrf.mxu3 }
 0x186   :  { %v1857_v43 = vpop.f32.mrf.mxu2  ;;  %v1661_v24 = vpop.f32.mrf.mxu0 }
 0x187   :  { %v1760_v63 = vpop.f32.mrf.mxu1  ;;  %v1662_v55 = vadd.f32 %v1661_v24, %v1563_v48  ;;  %v1858_v0 = vadd.f32 %v1857_v43, %v1759_v53  ;;  %v1566_v24 = vadd.f32 %v1565_v44, %v3626_v59 }
 0x189   :  { %v1761_v9 = vadd.f32 %v1760_v63, %v1662_v55  ;;  %v1951_v29 = vmax.f32 %v1858_v0, %v4109_v58 }
 0x18b   :  { %v1991_v63 = vmin.f32 %v1951_v29, %v4139_v32 }
 0x18c   :  { %v1572_v56 = vpop.f32.mrf.mxu3 }
 0x18e   :  { %v1859_v13 = vpop.f32.mrf.mxu2  ;;  %v1664_v33 = vpop.f32.mrf.mxu0 }
 0x18f   :  { %v1860_v23 = vadd.f32 %v1859_v13, %v1761_v9  ;;  %v1763_v43 = vpop.f32.mrf.mxu1  ;;  %v1665_v28 = vadd.f32 %v1664_v33, %v1566_v24  ;;  %v2897_v9 = vld [vmem:[%s4511_s0 + $0x244] sm:$0xf]  ;;  %v2403_v13 = vld [vmem:[%s4511_s0 + $0x25c] sm:$0xf0] }
 0x191   :  { %v1952_v48 = vmax.f32 %v1860_v23, %v4109_v58  ;;  %1614 = vmatmul.bf16.gmra.mxu3 %v2426_v16  ;;  %1703 = vmatmul.bf16.gmra.mxu0 %v2374_v11  ;;  %v1764_v44 = vadd.f32 %v1763_v43, %v1665_v28  ;;  %v2409_v16 = vld [vmem:[%s4511_s0 + $0x248] sm:$0xf]  ;;  %v2901_v11 = vld [vmem:[%s4511_s0 + $0x260] sm:$0xf0] }
 0x192   :  { %1802 = vmatmul.bf16.gmra.mxu1 %v2378_v34  ;;  %v2454_v34 = vor.u32 %v2910_v41, %v2451_v7  ;;  %v1573_v7 = vadd.f32 %v1572_v56, %v3701_v46  ;;  %v2429_v46 = vld [vmem:[%s4511_s0 + $0x278] sm:$0xf]  ;;  %v2907_v56 = vld [vmem:[%s4511_s0 + $0x290] sm:$0xf0] }
 0x193   :  { %v1992_v53 = vmin.f32 %v1952_v48, %v4139_v32  ;;  %2816 = vmatmul.msk.bf16.gmra.mxu2 %vm1199_vm0, %v2382_v35  ;;  %v2402_v35 = vor.u32 %v2900_v12, %v2401_v18  ;;  %v2917_v12 = vld [vmem:[%s4511_s0 + $0x2e4] sm:$0xf] }
 0x194   :  { %v4146_v52 = vpop.f32.mrf.mxu3 }
 0x195   :  { %v3004_v55 = vpack.c.bf16 %v1992_v53, %v1991_v63  ;;  %v2406_v63 = vor.u32 %v2897_v9, %v2403_v13  ;;  %v2410_v53 = vor.u32 %v2901_v11, %v2409_v16  ;;  %v2479_v9 = vld [vmem:[%s4511_s0 + $0x2fc] sm:$0xf0]  ;;  %v2904_v16 = vld [vmem:[%s4511_s0 + $0x27c] sm:$0xf]  ;;  %v2431_v11 = vld [vmem:[%s4511_s0 + $0x294] sm:$0xf0] }
 0x196   :  { %v1862_v0 = vpop.f32.mrf.mxu2  ;;  %v1666_v19 = vpop.f32.mrf.mxu0 }
 0x197   :  { %3005 = vst [vmem:[%s4514_s5] sm:$0xff] %v3004_v55   ;;  %v1765_v59 = vpop.f32.mrf.mxu1  ;;  %v1667_v3 = vadd.f32 %v1666_v19, %v1568_v47  ;;  %v1863_v2 = vadd.f32 %v1862_v0, %v1764_v44  ;;  %v1571_v0 = vadd.f32 %v4103_v26, %v3666_v25 }
 0x199   :  { %v1766_v29 = vadd.f32 %v1765_v59, %v1667_v3  ;;  %v1953_v43 = vmax.f32 %v1863_v2, %v4109_v58 }
 0x19b   :  { %v1993_v47 = vmin.f32 %v1953_v43, %v4139_v32 }
 0x19c   :  { %v1577_v23 = vpop.f32.mrf.mxu3 }
 0x19e   :  { %v1864_v33 = vpop.f32.mrf.mxu2  ;;  %v1669_v24 = vpop.f32.mrf.mxu0 }
 0x19f   :  { %v1865_v48 = vadd.f32 %v1864_v33, %v1766_v29  ;;  %v1768_v55 = vpop.f32.mrf.mxu1  ;;  %v1670_v44 = vadd.f32 %v1669_v24, %v1571_v0  ;;  %v2437_v29 = vld [vmem:[%s4511_s0 + $0x280] sm:$0xf]  ;;  %v2908_v33 = vld [vmem:[%s4511_s0 + $0x298] sm:$0xf0]  ;;  %v2430_v24 = vor.u32 %v2907_v56, %v2429_v46  ;;  %v2507_v46 = vld [vmem:[%s4511_s0 + $0x334] sm:$0xf0] }
 0x1a0   :  { %v2438_v0 = vor.u32 %v2908_v33, %v2437_v29  ;;  %v2465_v29 = vld [vmem:[%s4511_s0 + $0x2b8] sm:$0xf]  ;;  %v2915_v33 = vld [vmem:[%s4511_s0 + $0x2d0] sm:$0xf0] }
 0x1a1   :  { %v1954_v28 = vmax.f32 %v1865_v48, %v4109_v58  ;;  %1619 = vmatmul.bf16.gmra.mxu3 %v2454_v34  ;;  %1708 = vmatmul.bf16.gmra.mxu0 %v2402_v35  ;;  %v1769_v26 = vadd.f32 %v1768_v55, %v1670_v44  ;;  %v2482_v48 = vor.u32 %v2917_v12, %v2479_v9 }
 0x1a2   :  { %1807 = vmatmul.bf16.gmra.mxu1 %v2406_v63 }
 0x1a3   :  { %v1994_v19 = vmin.f32 %v1954_v28, %v4139_v32  ;;  %2817 = vmatmul.msk.bf16.gmra.mxu2 %vm1199_vm0, %v2410_v53  ;;  %v2434_v28 = vor.u32 %v2904_v16, %v2431_v11  ;;  %v2911_v16 = vld [vmem:[%s4511_s0 + $0x2b4] sm:$0xf]  ;;  %v2459_v11 = vld [vmem:[%s4511_s0 + $0x2cc] sm:$0xf0] }
 0x1a4   :  { %v4183_v3 = vpop.f32.mrf.mxu3 }
 0x1a5   :  { %v3009_v59 = vpack.c.bf16 %v1994_v19, %v1993_v47 }
 0x1a6   :  { %v1867_v41 = vpop.f32.mrf.mxu2  ;;  %v1671_v2 = vpop.f32.mrf.mxu0 }
 0x1a7   :  { %3091 = vst [vmem:[%s4514_s5 + $0x8] sm:$0xff] %v3009_v59   ;;  %v1770_v25 = vpop.f32.mrf.mxu1  ;;  %v1672_v18 = vadd.f32 %v1671_v2, %v1573_v7  ;;  %v1868_v13 = vadd.f32 %v1867_v41, %v1769_v26  ;;  %v1576_v59 = vadd.f32 %v4146_v52, %v3706_v57 }
 0x1a9   :  { %v1771_v34 = vadd.f32 %v1770_v25, %v1672_v18  ;;  %v1955_v63 = vmax.f32 %v1868_v13, %v4109_v58  ;;  %v1578_v18 = vadd.f32 %v1577_v23, %v3735_v15  ;;  %v2924_v13 = vld [vmem:[%s4511_s0 + $0x31c] sm:$0xf]  ;;  %v2457_v15 = vld [vmem:[%s4511_s0 + $0x2b0] sm:$0xf]  ;;  %v2914_v23 = vld [vmem:[%s4511_s0 + $0x2c8] sm:$0xf0] }
 0x1ab   :  { %v1995_v44 = vmin.f32 %v1955_v63, %v4139_v32  ;;  %v2458_v63 = vor.u32 %v2914_v23, %v2457_v15  ;;  %v2918_v15 = vld [vmem:[%s4511_s0 + $0x2ec] sm:$0xf]  ;;  %v2487_v23 = vld [vmem:[%s4511_s0 + $0x304] sm:$0xf0] }
 0x1ac   :  { %v1582_v35 = vpop.f32.mrf.mxu3 }
 0x1ae   :  { %v1869_v43 = vpop.f32.mrf.mxu2  ;;  %v1674_v55 = vpop.f32.mrf.mxu0 }
 0x1af   :  { %v1870_v53 = vadd.f32 %v1869_v43, %v1771_v34  ;;  %v1773_v47 = vpop.f32.mrf.mxu1  ;;  %v1675_v2 = vadd.f32 %v1674_v55, %v1576_v59 }
 0x1b1   :  { %v1956_v19 = vmax.f32 %v1870_v53, %v4109_v58  ;;  %1624 = vmatmul.bf16.gmra.mxu3 %v2482_v48  ;;  %1713 = vmatmul.bf16.gmra.mxu0 %v2430_v24  ;;  %v1774_v52 = vadd.f32 %v1773_v47, %v1675_v2  ;;  %v2510_v24 = vor.u32 %v2924_v13, %v2507_v46  ;;  %v2931_v13 = vld [vmem:[%s4511_s0 + $0x354] sm:$0xf]  ;;  %v2535_v46 = vld [vmem:[%s4511_s0 + $0x36c] sm:$0xf0] }
 0x1b2   :  { %1812 = vmatmul.bf16.gmra.mxu1 %v2434_v28  ;;  %v2466_v47 = vor.u32 %v2915_v33, %v2465_v29 }
 0x1b3   :  { %v1996_v41 = vmin.f32 %v1956_v19, %v4139_v32  ;;  %2818 = vmatmul.msk.bf16.gmra.mxu2 %vm1199_vm0, %v2438_v0  ;;  %v2462_v0 = vor.u32 %v2911_v16, %v2459_v11  ;;  %v2493_v16 = vld [vmem:[%s4511_s0 + $0x2f0] sm:$0xf]  ;;  %v2922_v11 = vld [vmem:[%s4511_s0 + $0x308] sm:$0xf0] }
 0x1b4   :  { %v4220_v25 = vpop.f32.mrf.mxu3 }
 0x1b5   :  { %v3014_v7 = vpack.c.bf16 %v1996_v41, %v1995_v44  ;;  %v1581_v44 = vadd.f32 %v4183_v3, %v3742_v30 }
 0x1b6   :  { %v1872_v26 = vpop.f32.mrf.mxu2  ;;  %v1676_v12 = vpop.f32.mrf.mxu0 }
 0x1b7   :  { %3092 = vst [vmem:[%s4514_s5 + $0x10] sm:$0xff] %v3014_v7   ;;  %v1775_v57 = vpop.f32.mrf.mxu1  ;;  %v1677_v9 = vadd.f32 %v1676_v12, %v1578_v18  ;;  %v1873_v56 = vadd.f32 %v1872_v26, %v1774_v52 }
 0x1b9   :  { %v1776_v34 = vadd.f32 %v1775_v57, %v1677_v9  ;;  %v1957_v53 = vmax.f32 %v1873_v56, %v4109_v58  ;;  %v1583_v57 = vadd.f32 %v1582_v35, %v3773_v51  ;;  %v2485_v51 = vld [vmem:[%s4511_s0 + $0x2e8] sm:$0xf]  ;;  %v2921_v35 = vld [vmem:[%s4511_s0 + $0x300] sm:$0xf0] }
 0x1bb   :  { %v1997_v41 = vmin.f32 %v1957_v53, %v4139_v32 }
 0x1bc   :  { %v1587_v43 = vpop.f32.mrf.mxu3 }
 0x1be   :  { %v1874_v48 = vpop.f32.mrf.mxu2  ;;  %v1679_v28 = vpop.f32.mrf.mxu0 }
 0x1bf   :  { %v1875_v55 = vadd.f32 %v1874_v48, %v1776_v34  ;;  %v1778_v19 = vpop.f32.mrf.mxu1  ;;  %v1680_v26 = vadd.f32 %v1679_v28, %v1581_v44  ;;  %v2538_v48 = vor.u32 %v2931_v13, %v2535_v46  ;;  %v2490_v28 = vor.u32 %v2918_v15, %v2487_v23  ;;  %v2925_v46 = vld [vmem:[%s4511_s0 + $0x324] sm:$0xf] }
 0x1c1   :  { %v1958_v59 = vmax.f32 %v1875_v55, %v4109_v58  ;;  %1629 = vmatmul.bf16.gmra.mxu3 %v2510_v24  ;;  %1718 = vmatmul.bf16.gmra.mxu0 %v2458_v63  ;;  %v1779_v3 = vadd.f32 %v1778_v19, %v1680_v26  ;;  %v2486_v24 = vor.u32 %v2921_v35, %v2485_v51  ;;  %v2521_v51 = vld [vmem:[%s4511_s0 + $0x328] sm:$0xf]  ;;  %v2929_v35 = vld [vmem:[%s4511_s0 + $0x340] sm:$0xf0] }
 0x1c2   :  { %1817 = vmatmul.bf16.gmra.mxu1 %v2462_v0  ;;  %v2494_v0 = vor.u32 %v2922_v11, %v2493_v16 }
 0x1c3   :  { %v1998_v7 = vmin.f32 %v1958_v59, %v4139_v32  ;;  %2819 = vmatmul.msk.bf16.gmra.mxu2 %vm1199_vm0, %v2466_v47  ;;  %v1586_v59 = vadd.f32 %v4220_v25, %v3780_v1 }
 0x1c4   :  { %v4257_v18 = vpop.f32.mrf.mxu3 }
 0x1c5   :  { %v3019_v2 = vpack.c.bf16 %v1998_v7, %v1997_v41 }
 0x1c6   :  { %v1877_v12 = vpop.f32.mrf.mxu2  ;;  %v1681_v52 = vpop.f32.mrf.mxu0 }
 0x1c7   :  { %3093 = vst [vmem:[%s4514_s5 + $0x18] sm:$0xff] %v3019_v2   ;;  %v1780_v30 = vpop.f32.mrf.mxu1  ;;  %v1682_v9 = vadd.f32 %v1681_v52, %v1583_v57  ;;  %v1878_v56 = vadd.f32 %v1877_v12, %v1779_v3  ;;  %v1588_v57 = vadd.f32 %v1587_v43, %v3811_v31  ;;  %v2938_v3 = vld [vmem:[%s4511_s0 + $0x38c] sm:$0xf]  ;;  %v2513_v31 = vld [vmem:[%s4511_s0 + $0x320] sm:$0xf] }
 0x1c8   :  { %v2928_v43 = vld [vmem:[%s4511_s0 + $0x338] sm:$0xf0] }
 0x1c9   :  { %v1781_v29 = vadd.f32 %v1780_v30, %v1682_v9  ;;  %v1959_v63 = vmax.f32 %v1878_v56, %v4109_v58  ;;  %v2563_v9 = vld [vmem:[%s4511_s0 + $0x3a4] sm:$0xf0]  ;;  %v2515_v56 = vld [vmem:[%s4511_s0 + $0x33c] sm:$0xf0] }
 0x1ca   :  { %v2566_v11 = vor.u32 %v2938_v3, %v2563_v9  ;;  %v2543_v3 = vld [vmem:[%s4511_s0 + $0x374] sm:$0xf0]  ;;  %v2549_v9 = vld [vmem:[%s4511_s0 + $0x360] sm:$0xf] }
 0x1cb   :  { %v1999_v44 = vmin.f32 %v1959_v63, %v4139_v32  ;;  %v2518_v63 = vor.u32 %v2925_v46, %v2515_v56 }
 0x1cc   :  { %v1592_v33 = vpop.f32.mrf.mxu3 }
 0x1ce   :  { %v1879_v34 = vpop.f32.mrf.mxu2  ;;  %v1684_v55 = vpop.f32.mrf.mxu0 }
 0x1cf   :  { %v1880_v53 = vadd.f32 %v1879_v34, %v1781_v29  ;;  %v1783_v47 = vpop.f32.mrf.mxu1  ;;  %v1685_v2 = vadd.f32 %v1684_v55, %v1586_v59  ;;  %v2514_v29 = vor.u32 %v2928_v43, %v2513_v31 }
 0x1d1   :  { %v1960_v19 = vmax.f32 %v1880_v53, %v4109_v58  ;;  %1634 = vmatmul.bf16.gmra.mxu3 %v2538_v48  ;;  %1723 = vmatmul.bf16.gmra.mxu0 %v2486_v24  ;;  %v1784_v25 = vadd.f32 %v1783_v47, %v1685_v2  ;;  %v2522_v53 = vor.u32 %v2929_v35, %v2521_v51 }
 0x1d2   :  { %1822 = vmatmul.bf16.gmra.mxu1 %v2490_v28  ;;  %v1593_v2 = vadd.f32 %v1592_v33, %v3850_v6  ;;  %v2541_v6 = vld [vmem:[%s4511_s0 + $0x358] sm:$0xf]  ;;  %v2935_v33 = vld [vmem:[%s4511_s0 + $0x370] sm:$0xf0] }
 0x1d3   :  { %v2000_v41 = vmin.f32 %v1960_v19, %v4139_v32  ;;  %2820 = vmatmul.msk.bf16.gmra.mxu2 %vm1199_vm0, %v2494_v0  ;;  %v1591_v0 = vadd.f32 %v4257_v18, %v3819_v39  ;;  %v2542_v51 = vor.u32 %v2935_v33, %v2541_v6 }
 0x1d4   :  { %v4294_v26 = vpop.f32.mrf.mxu3 }
 0x1d5   :  { %v3024_v7 = vpack.c.bf16 %v2000_v41, %v1999_v44 }
 0x1d6   :  { %v1882_v12 = vpop.f32.mrf.mxu2  ;;  %v1686_v52 = vpop.f32.mrf.mxu0 }
 0x1d7   :  { %3094 = vst [vmem:[%s4514_s5 + $0x20] sm:$0xff] %v3024_v7   ;;  %v1785_v1 = vpop.f32.mrf.mxu1  ;;  %v1687_v30 = vadd.f32 %v1686_v52, %v1588_v57  ;;  %v1883_v13 = vadd.f32 %v1882_v12, %v1784_v25  ;;  %v2945_v52 = vld [vmem:[%s4511_s0 + $0x3c4] sm:$0xf] }
 0x1d9   :  { %v1786_v15 = vadd.f32 %v1785_v1, %v1687_v30  ;;  %v1961_v34 = vmax.f32 %v1883_v13, %v4109_v58  ;;  %v2591_v1 = vld [vmem:[%s4511_s0 + $0x3dc] sm:$0xf0]  ;;  %v2932_v30 = vld [vmem:[%s4511_s0 + $0x35c] sm:$0xf] }
 0x1da   :  { %v2936_v13 = vld [vmem:[%s4511_s0 + $0x378] sm:$0xf0]  ;;  %v2594_v56 = vor.u32 %v2945_v52, %v2591_v1 }
 0x1db   :  { %v2001_v47 = vmin.f32 %v1961_v34, %v4139_v32 }
 0x1dc   :  { %v1597_v23 = vpop.f32.mrf.mxu3 }
 0x1de   :  { %v1884_v16 = vpop.f32.mrf.mxu2  ;;  %v1689_v24 = vpop.f32.mrf.mxu0 }
 0x1df   :  { %v1885_v48 = vadd.f32 %v1884_v16, %v1786_v15  ;;  %v1788_v55 = vpop.f32.mrf.mxu1  ;;  %v1690_v44 = vadd.f32 %v1689_v24, %v1591_v0  ;;  %v1596_v24 = vadd.f32 %v4294_v26, %v3858_v14 }
 0x1e1   :  { %v1962_v28 = vmax.f32 %v1885_v48, %v4109_v58  ;;  %1639 = vmatmul.bf16.gmra.mxu3 %v2566_v11  ;;  %1728 = vmatmul.bf16.gmra.mxu0 %v2514_v29  ;;  %v1789_v18 = vadd.f32 %v1788_v55, %v1690_v44  ;;  %v2546_v11 = vor.u32 %v2932_v30, %v2543_v3 }
 0x1e2   :  { %1827 = vmatmul.bf16.gmra.mxu1 %v2518_v63  ;;  %v2550_v29 = vor.u32 %v2936_v13, %v2549_v9 }
 0x1e3   :  { %v2002_v19 = vmin.f32 %v1962_v28, %v4139_v32  ;;  %2821 = vmatmul.msk.bf16.gmra.mxu2 %vm1199_vm0, %v2522_v53 }
 0x1e4   :  { %v4331_v41 = vpop.f32.mrf.mxu3 }
 0x1e5   :  { %v3029_v59 = vpack.c.bf16 %v2002_v19, %v2001_v47  ;;  %v1598_v19 = vadd.f32 %v1597_v23, %v3889_v49  ;;  %v2939_v49 = vld [vmem:[%s4511_s0 + $0x394] sm:$0xf]  ;;  %v2571_v23 = vld [vmem:[%s4511_s0 + $0x3ac] sm:$0xf0] }
 0x1e6   :  { %v1887_v7 = vpop.f32.mrf.mxu2  ;;  %v1691_v12 = vpop.f32.mrf.mxu0  ;;  %v2574_v3 = vor.u32 %v2939_v49, %v2571_v23 }
 0x1e7   :  { %3095 = vst [vmem:[%s4514_s5 + $0x28] sm:$0xff] %v3029_v59   ;;  %v1790_v39 = vpop.f32.mrf.mxu1  ;;  %v1692_v57 = vadd.f32 %v1691_v12, %v1593_v2  ;;  %v1888_v25 = vadd.f32 %v1887_v7, %v1789_v18  ;;  %v2569_v2 = vld [vmem:[%s4511_s0 + $0x390] sm:$0xf]  ;;  %v2942_v12 = vld [vmem:[%s4511_s0 + $0x3a8] sm:$0xf0] }
 0x1e8   :  { %v2943_v18 = vld [vmem:[%s4511_s0 + $0x3b0] sm:$0xf0] }
 0x1e9   :  { %v1791_v31 = vadd.f32 %v1790_v39, %v1692_v57  ;;  %v1963_v35 = vmax.f32 %v1888_v25, %v4109_v58  ;;  %v2577_v39 = vld [vmem:[%s4511_s0 + $0x398] sm:$0xf]  ;;  %v2570_v25 = vor.u32 %v2942_v12, %v2569_v2 }
 0x1ea   :  { %v2578_v9 = vor.u32 %v2943_v18, %v2577_v39 }
 0x1eb   :  { %v2003_v63 = vmin.f32 %v1963_v35, %v4139_v32 }
 0x1ec   :  { %v1602_v43 = vpop.f32.mrf.mxu3 }
 0x1ee   :  { %v1889_v46 = vpop.f32.mrf.mxu2  ;;  %v1694_v16 = vpop.f32.mrf.mxu0 }
 0x1ef   :  { %v1890_v15 = vadd.f32 %v1889_v46, %v1791_v31  ;;  %v1793_v34 = vpop.f32.mrf.mxu1  ;;  %v1695_v28 = vadd.f32 %v1694_v16, %v1596_v24  ;;  %v1601_v46 = vadd.f32 %v4331_v41, %v3896_v61 }
 0x1f1   :  { %v1964_v48 = vmax.f32 %v1890_v15, %v4109_v58  ;;  %1644 = vmatmul.bf16.gmra.mxu3 %v2594_v56  ;;  %1733 = vmatmul.bf16.gmra.mxu0 %v2542_v51  ;;  %v1794_v14 = vadd.f32 %v1793_v34, %v1695_v28  ;;  %v2950_v28 = vld [vmem:[%s4511_s0 + $0x3e8] sm:$0xf0] }
 0x1f2   :  { %1832 = vmatmul.bf16.gmra.mxu1 %v2546_v11 }
 0x1f3   :  { %v2004_v53 = vmin.f32 %v1964_v48, %v4139_v32  ;;  %2822 = vmatmul.msk.bf16.gmra.mxu2 %vm1199_vm0, %v2550_v29  ;;  %v1603_v29 = vadd.f32 %v1602_v43, %v3926_v10  ;;  %v2946_v10 = vld [vmem:[%s4511_s0 + $0x3cc] sm:$0xf]  ;;  %v2599_v43 = vld [vmem:[%s4511_s0 + $0x3e4] sm:$0xf0] }
 0x1f4   :  { %v1605_v0 = vpop.f32.mrf.mxu3  ;;  %v2602_v2 = vor.u32 %v2946_v10, %v2599_v43 }
 0x1f5   :  { %v3034_v55 = vpack.c.bf16 %v2004_v53, %v2003_v63  ;;  %v2597_v63 = vld [vmem:[%s4511_s0 + $0x3c8] sm:$0xf]  ;;  %v2949_v53 = vld [vmem:[%s4511_s0 + $0x3e0] sm:$0xf0]  ;;  %v1606_v39 = vadd.f32 %v1605_v0, %v3933_v38 }
 0x1f6   :  { %v1892_v47 = vpop.f32.mrf.mxu2  ;;  %v1696_v59 = vpop.f32.mrf.mxu0 }
 0x1f7   :  { %3096 = vst [vmem:[%s4514_s5 + $0x30] sm:$0xff] %v3034_v55   ;;  %v1795_v44 = vpop.f32.mrf.mxu1  ;;  %v1697_v26 = vadd.f32 %v1696_v59, %v1598_v19  ;;  %v1893_v7 = vadd.f32 %v1892_v47, %v1794_v14  ;;  %v2605_v55 = vld [vmem:[%s4511_s0 + $0x3d0] sm:$0xf] }
 0x1f8   :  { %v2606_v12 = vor.u32 %v2950_v28, %v2605_v55 }
 0x1f9   :  { %v1796_v57 = vadd.f32 %v1795_v44, %v1697_v26  ;;  %v1965_v6 = vmax.f32 %v1893_v7, %v4109_v58  ;;  %v2598_v44 = vor.u32 %v2949_v53, %v2597_v63 }
 0x1fb   :  { %v2005_v56 = vmin.f32 %v1965_v6, %v4139_v32 }
 0x1fc   :  { %v1607_v52 = vpop.f32.mrf.mxu3 }
 0x1fe   :  { %v1894_v1 = vpop.f32.mrf.mxu2  ;;  %v1699_v30 = vpop.f32.mrf.mxu0 }
 0x1ff   :  { %v1895_v33 = vadd.f32 %v1894_v1, %v1796_v57  ;;  %v1798_v13 = vpop.f32.mrf.mxu1  ;;  %v1700_v15 = vadd.f32 %v1699_v30, %v1601_v46  ;;  %v1608_v30 = vadd.f32 %v1607_v52, %v3963_v5 }
 0x201   :  { %v1966_v31 = vmax.f32 %v1895_v33, %v4109_v58  ;;  %1738 = vmatmul.bf16.gmra.mxu0 %v2570_v25  ;;  %v1799_v61 = vadd.f32 %v1798_v13, %v1700_v15 }
 0x202   :  { %1837 = vmatmul.bf16.gmra.mxu1 %v2574_v3 }
 0x203   :  { %v2006_v51 = vmin.f32 %v1966_v31, %v4139_v32  ;;  %2823 = vmatmul.msk.bf16.gmra.mxu2 %vm1199_vm0, %v2578_v9 }
 0x204   :  { %v1610_v16 = vpop.f32.mrf.mxu3 }
 0x205   :  { %v3039_v35 = vpack.c.bf16 %v2006_v51, %v2005_v56  ;;  %v1611_v5 = vadd.f32 %v1610_v16, %v3970_v20 }
 0x206   :  { %v1897_v11 = vpop.f32.mrf.mxu2  ;;  %v1701_v34 = vpop.f32.mrf.mxu0 }
 0x207   :  { %3097 = vst [vmem:[%s4514_s5 + $0x38] sm:$0xff] %v3039_v35   ;;  %v1800_v48 = vpop.f32.mrf.mxu1  ;;  %v1702_v41 = vadd.f32 %v1701_v34, %v1603_v29  ;;  %v1898_v24 = vadd.f32 %v1897_v11, %v1799_v61 }
 0x209   :  { %v1801_v47 = vadd.f32 %v1800_v48, %v1702_v41  ;;  %v1967_v14 = vmax.f32 %v1898_v24, %v4109_v58 }
 0x20b   :  { %v2007_v18 = vmin.f32 %v1967_v14, %v4139_v32 }
 0x20c   :  { %v1612_v19 = vpop.f32.mrf.mxu3 }
 0x20d   :  { %v1613_v63 = vadd.f32 %v1612_v19, %v4000_v42 }
 0x20e   :  { %v1899_v59 = vpop.f32.mrf.mxu2  ;;  %v1704_v7 = vpop.f32.mrf.mxu0 }
 0x20f   :  { %v1900_v26 = vadd.f32 %v1899_v59, %v1801_v47  ;;  %v1803_v49 = vpop.f32.mrf.mxu1  ;;  %v1705_v25 = vadd.f32 %v1704_v7, %v1606_v39 }
 0x211   :  { %v1968_v23 = vmax.f32 %v1900_v26, %v4109_v58  ;;  %1743 = vmatmul.bf16.gmra.mxu0 %v2598_v44  ;;  %v1804_v38 = vadd.f32 %v1803_v49, %v1705_v25 }
 0x212   :  { %1842 = vmatmul.bf16.gmra.mxu1 %v2602_v2 }
 0x213   :  { %v2008_v57 = vmin.f32 %v1968_v23, %v4139_v32  ;;  %2824 = vmatmul.msk.bf16.gmra.mxu2 %vm1199_vm0, %v2606_v12 }
 0x214   :  { %v1615_v6 = vpop.f32.mrf.mxu3 }
 0x215   :  { %v3044_v1 = vpack.c.bf16 %v2008_v57, %v2007_v18  ;;  %v1616_v42 = vadd.f32 %v1615_v6, %v4007_v27 }
 0x216   :  { %v1902_v33 = vpop.f32.mrf.mxu2  ;;  %v1706_v3 = vpop.f32.mrf.mxu0 }
 0x217   :  { %3098 = vst [vmem:[%s4514_s5 + $0x40] sm:$0xff] %v3044_v1   ;;  %v1805_v9 = vpop.f32.mrf.mxu1  ;;  %v1707_v0 = vadd.f32 %v1706_v3, %v1608_v30  ;;  %v1903_v13 = vadd.f32 %v1902_v33, %v1804_v38 }
 0x219   :  { %v1806_v31 = vadd.f32 %v1805_v9, %v1707_v0  ;;  %v1969_v51 = vmax.f32 %v1903_v13, %v4109_v58 }
 0x21b   :  { %v2009_v52 = vmin.f32 %v1969_v51, %v4139_v32 }
 0x21c   :  { %v1617_v46 = vpop.f32.mrf.mxu3 }
 0x21d   :  { %v1618_v39 = vadd.f32 %v1617_v46, %v4037_v36 }
 0x21e   :  { %v1904_v56 = vpop.f32.mrf.mxu2  ;;  %v1709_v15 = vpop.f32.mrf.mxu0 }
 0x21f   :  { %v1905_v35 = vadd.f32 %v1904_v56, %v1806_v31  ;;  %v1808_v11 = vpop.f32.mrf.mxu1  ;;  %v1710_v61 = vadd.f32 %v1709_v15, %v1611_v5 }
 0x221   :  { %v1970_v29 = vmax.f32 %v1905_v35, %v4109_v58  ;;  %v1809_v43 = vadd.f32 %v1808_v11, %v1710_v61 }
 0x223   :  { %v2010_v34 = vmin.f32 %v1970_v29, %v4139_v32 }
 0x224   :  { %v1620_v41 = vpop.f32.mrf.mxu3 }
 0x225   :  { %v3049_v48 = vpack.c.bf16 %v2010_v34, %v2009_v52  ;;  %v1621_v36 = vadd.f32 %v1620_v41, %v4041_v40 }
 0x226   :  { %v1907_v24 = vpop.f32.mrf.mxu2  ;;  %v1711_v53 = vpop.f32.mrf.mxu0 }
 0x227   :  { %3099 = vst [vmem:[%s4514_s5 + $0x48] sm:$0xff] %v3049_v48   ;;  %v1810_v10 = vpop.f32.mrf.mxu1  ;;  %v1712_v55 = vadd.f32 %v1711_v53, %v1613_v63  ;;  %v1908_v28 = vadd.f32 %v1907_v24, %v1809_v43 }
 0x229   :  { %v1811_v20 = vadd.f32 %v1810_v10, %v1712_v55  ;;  %v1971_v47 = vmax.f32 %v1908_v28, %v4109_v58 }
 0x22b   :  { %v2011_v19 = vmin.f32 %v1971_v47, %v4139_v32 }
 0x22c   :  { %v1622_v14 = vpop.f32.mrf.mxu3 }
 0x22d   :  { %v1623_v11 = vadd.f32 %v1622_v14, %v4068_v54 }
 0x22e   :  { %v1909_v16 = vpop.f32.mrf.mxu2  ;;  %v1714_v44 = vpop.f32.mrf.mxu0 }
 0x22f   :  { %v1910_v59 = vadd.f32 %v1909_v16, %v1811_v20  ;;  %v1813_v26 = vpop.f32.mrf.mxu1  ;;  %v1715_v49 = vadd.f32 %v1714_v44, %v1616_v42 }
 0x231   :  { %v1972_v7 = vmax.f32 %v1910_v59, %v4109_v58  ;;  %v1814_v1 = vadd.f32 %v1813_v26, %v1715_v49 }
 0x233   :  { %v2012_v2 = vmin.f32 %v1972_v7, %v4139_v32 }
 0x234   :  { %v1625_v33 = vpop.f32.mrf.mxu3 }
 0x235   :  { %v3054_v12 = vpack.c.bf16 %v2012_v2, %v2011_v19  ;;  %v1626_v54 = vadd.f32 %v1625_v33, %v4072_v8 }
 0x236   :  { %v1912_v23 = vpop.f32.mrf.mxu2  ;;  %v1716_v18 = vpop.f32.mrf.mxu0 }
 0x237   :  { %3100 = vst [vmem:[%s4514_s5 + $0x50] sm:$0xff] %v3054_v12   ;;  %v1815_v57 = vpop.f32.mrf.mxu1  ;;  %v1717_v25 = vadd.f32 %v1716_v18, %v1618_v39  ;;  %v1913_v30 = vadd.f32 %v1912_v23, %v1814_v1 }
 0x239   :  { %v1816_v27 = vadd.f32 %v1815_v57, %v1717_v25  ;;  %v1973_v3 = vmax.f32 %v1913_v30, %v4109_v58 }
 0x23b   :  { %v2013_v31 = vmin.f32 %v1973_v3, %v4139_v32 }
 0x23c   :  { %v1627_v56 = vpop.f32.mrf.mxu3 }
 0x23d   :  { %v1628_v59 = vadd.f32 %v1627_v56, %v4099_v21 }
 0x23e   :  { %v1914_v6 = vpop.f32.mrf.mxu2  ;;  %v1719_v38 = vpop.f32.mrf.mxu0 }
 0x23f   :  { %v1915_v9 = vadd.f32 %v1914_v6, %v1816_v27  ;;  %v1818_v0 = vpop.f32.mrf.mxu1  ;;  %v1720_v35 = vadd.f32 %v1719_v38, %v1621_v36 }
 0x241   :  { %v1974_v13 = vmax.f32 %v1915_v9, %v4109_v58  ;;  %v1819_v52 = vadd.f32 %v1818_v0, %v1720_v35 }
 0x243   :  { %v2014_v46 = vmin.f32 %v1974_v13, %v4139_v32 }
 0x244   :  { %v1630_v61 = vpop.f32.mrf.mxu3 }
 0x245   :  { %v3059_v51 = vpack.c.bf16 %v2014_v46, %v2013_v31  ;;  %v1631_v57 = vadd.f32 %v1630_v61, %v3894_v60 }
 0x246   :  { %v1917_v15 = vpop.f32.mrf.mxu2  ;;  %v1721_v29 = vpop.f32.mrf.mxu0 }
 0x247   :  { %3101 = vst [vmem:[%s4514_s5 + $0x58] sm:$0xff] %v3059_v51   ;;  %v1820_v5 = vpop.f32.mrf.mxu1  ;;  %v1722_v34 = vadd.f32 %v1721_v29, %v1623_v11  ;;  %v1918_v48 = vadd.f32 %v1917_v15, %v1819_v52 }
 0x249   :  { %v1821_v40 = vadd.f32 %v1820_v5, %v1722_v34  ;;  %v1975_v24 = vmax.f32 %v1918_v48, %v4109_v58 }
 0x24b   :  { %v2015_v55 = vmin.f32 %v1975_v24, %v4139_v32 }
 0x24c   :  { %v1632_v14 = vpop.f32.mrf.mxu3 }
 0x24d   :  { %v1633_v6 = vadd.f32 %v1632_v14, %v3924_v17 }
 0x24e   :  { %v1919_v41 = vpop.f32.mrf.mxu2  ;;  %v1724_v53 = vpop.f32.mrf.mxu0 }
 0x24f   :  { %v1920_v63 = vadd.f32 %v1919_v41, %v1821_v40  ;;  %v1823_v10 = vpop.f32.mrf.mxu1  ;;  %v1725_v16 = vadd.f32 %v1724_v53, %v1626_v54 }
 0x251   :  { %v1976_v43 = vmax.f32 %v1920_v63, %v4109_v58  ;;  %v1824_v7 = vadd.f32 %v1823_v10, %v1725_v16 }
 0x253   :  { %v2016_v28 = vmin.f32 %v1976_v43, %v4139_v32 }
 0x254   :  { %v1635_v21 = vpop.f32.mrf.mxu3 }
 0x255   :  { %v3064_v20 = vpack.c.bf16 %v2016_v28, %v2015_v55  ;;  %v1636_v17 = vadd.f32 %v1635_v21, %v3931_v45 }
 0x256   :  { %v1922_v47 = vpop.f32.mrf.mxu2  ;;  %v1726_v44 = vpop.f32.mrf.mxu0 }
 0x257   :  { %3102 = vst [vmem:[%s4514_s5 + $0x60] sm:$0xff] %v3064_v20   ;;  %v1825_v26 = vpop.f32.mrf.mxu1  ;;  %v1727_v42 = vadd.f32 %v1726_v44, %v1628_v59  ;;  %v1923_v19 = vadd.f32 %v1922_v47, %v1824_v7 }
 0x259   :  { %v1826_v8 = vadd.f32 %v1825_v26, %v1727_v42  ;;  %v1977_v12 = vmax.f32 %v1923_v19, %v4109_v58 }
 0x25b   :  { %v2017_v1 = vmin.f32 %v1977_v12, %v4139_v32 }
 0x25c   :  { %v1637_v36 = vpop.f32.mrf.mxu3 }
 0x25d   :  { %v1638_v40 = vadd.f32 %v1637_v36, %v3961_v4 }
 0x25e   :  { %v1924_v2 = vpop.f32.mrf.mxu2  ;;  %v1729_v23 = vpop.f32.mrf.mxu0 }
 0x25f   :  { %v1925_v49 = vadd.f32 %v1924_v2, %v1826_v8  ;;  %v1828_v39 = vpop.f32.mrf.mxu1  ;;  %v1730_v30 = vadd.f32 %v1729_v23, %v1631_v57 }
 0x261   :  { %v1978_v18 = vmax.f32 %v1925_v49, %v4109_v58  ;;  %v1829_v38 = vadd.f32 %v1828_v39, %v1730_v30 }
 0x263   :  { %v2018_v25 = vmin.f32 %v1978_v18, %v4139_v32 }
 0x264   :  { %v1640_v34 = vpop.f32.mrf.mxu3 }
 0x265   :  { %v3069_v33 = vpack.c.bf16 %v2018_v25, %v2017_v1  ;;  %v1641_v4 = vadd.f32 %v1640_v34, %v3968_v22 }
 0x266   :  { %v1927_v27 = vpop.f32.mrf.mxu2  ;;  %v1731_v3 = vpop.f32.mrf.mxu0 }
 0x267   :  { %3103 = vst [vmem:[%s4514_s5 + $0x68] sm:$0xff] %v3069_v33   ;;  %v1830_v9 = vpop.f32.mrf.mxu1  ;;  %v1732_v0 = vadd.f32 %v1731_v3, %v1633_v6  ;;  %v1928_v13 = vadd.f32 %v1927_v27, %v1829_v38 }
 0x269   :  { %v1831_v60 = vadd.f32 %v1830_v9, %v1732_v0  ;;  %v1979_v46 = vmax.f32 %v1928_v13, %v4109_v58 }
 0x26b   :  { %v2019_v11 = vmin.f32 %v1979_v46, %v4139_v32 }
 0x26c   :  { %v1642_v28 = vpop.f32.mrf.mxu3 }
 0x26d   :  { %v1643_v7 = vadd.f32 %v1642_v28, %v3998_v50 }
 0x26e   :  { %v1929_v31 = vpop.f32.mrf.mxu2  ;;  %v1734_v51 = vpop.f32.mrf.mxu0 }
 0x26f   :  { %v1930_v56 = vadd.f32 %v1929_v31, %v1831_v60  ;;  %v1833_v35 = vpop.f32.mrf.mxu1  ;;  %v1735_v52 = vadd.f32 %v1734_v51, %v1636_v17  ;;  %v3135_v31 = vld [vmem:[%s4512_s3] ss:$0 sm:$0xff] }
 0x271   :  { %v1980_v15 = vmax.f32 %v1930_v56, %v4109_v58  ;;  %v1834_v24 = vadd.f32 %v1833_v35, %v1735_v52 }
 0x273   :  { %v2020_v29 = vmin.f32 %v1980_v15, %v4139_v32 }
 0x274   :  { %v1645_v12 = vpop.f32.mrf.mxu3 }
 0x275   :  { %v3074_v5 = vpack.c.bf16 %v2020_v29, %v2019_v11  ;;  %v1646_v50 = vadd.f32 %v1645_v12, %v4005_v62 }
 0x276   :  { %v1932_v48 = vpop.f32.mrf.mxu2  ;;  %v1736_v61 = vpop.f32.mrf.mxu0 }
 0x277   :  { %3104 = vst [vmem:[%s4514_s5 + $0x70] sm:$0xff] %v3074_v5   ;;  %v1835_v41 = vpop.f32.mrf.mxu1  ;;  %v1737_v63 = vadd.f32 %v1736_v61, %v1638_v40  ;;  %v1933_v53 = vadd.f32 %v1932_v48, %v1834_v24 }
 0x279   :  { %v1836_v45 = vadd.f32 %v1835_v41, %v1737_v63  ;;  %v1981_v43 = vmax.f32 %v1933_v53, %v4109_v58 }
 0x27b   :  { %v2021_v47 = vmin.f32 %v1981_v43, %v4139_v32 }
 0x27c   :  { %v1647_v30 = vpop.f32.mrf.mxu3 }
 0x27d   :  { %v1648_v9 = vadd.f32 %v1647_v30, %v4035_v37 }
 0x27e   :  { %v1934_v10 = vpop.f32.mrf.mxu2  ;;  %v1739_v55 = vpop.f32.mrf.mxu0 }
 0x27f   :  { %v1935_v54 = vadd.f32 %v1934_v10, %v1836_v45  ;;  %v1838_v20 = vpop.f32.mrf.mxu1  ;;  %v1740_v14 = vadd.f32 %v1739_v55, %v1641_v4 }
 0x281   :  { %v1982_v16 = vmax.f32 %v1935_v54, %v4109_v58  ;;  %v1839_v8 = vadd.f32 %v1838_v20, %v1740_v14 }
 0x283   :  { %v2022_v59 = vmin.f32 %v1982_v16, %v4139_v32 }
 0x285   :  { %v3079_v44 = vpack.c.bf16 %v2022_v59, %v2021_v47 }
 0x286   :  { %v1937_v26 = vpop.f32.mrf.mxu2  ;;  %v1741_v42 = vpop.f32.mrf.mxu0 }
 0x287   :  { %3105 = vst [vmem:[%s4514_s5 + $0x78] sm:$0xff] %v3079_v44   ;;  %v1840_v19 = vpop.f32.mrf.mxu1  ;;  %v1742_v2 = vadd.f32 %v1741_v42, %v1643_v7  ;;  %v1938_v49 = vadd.f32 %v1937_v26, %v1839_v8 }
 0x289   :  { %v1841_v22 = vadd.f32 %v1840_v19, %v1742_v2  ;;  %v1983_v39 = vmax.f32 %v1938_v49, %v4109_v58 }
 0x28b   :  { %v2023_v25 = vmin.f32 %v1983_v39, %v4139_v32 }
 0x28e   :  { %v1939_v23 = vpop.f32.mrf.mxu2  ;;  %v1744_v21 = vpop.f32.mrf.mxu0 }
 0x28f   :  { %v1940_v18 = vadd.f32 %v1939_v23, %v1841_v22  ;;  %v1843_v1 = vpop.f32.mrf.mxu1  ;;  %v1745_v6 = vadd.f32 %v1744_v21, %v1646_v50 }
 0x291   :  { %v1984_v57 = vmax.f32 %v1940_v18, %v4109_v58  ;;  %v1844_v0 = vadd.f32 %v1843_v1, %v1745_v6 }
 0x293   :  { %v2024_v33 = vmin.f32 %v1984_v57, %v4139_v32 }
 0x295   :  { %v3084_v27 = vpack.c.bf16 %v2024_v33, %v2023_v25 }
 0x296   :  { %v1942_v3 = vpop.f32.mrf.mxu2  ;;  %v1746_v38 = vpop.f32.mrf.mxu0 }
 0x297   :  { %3106 = vst [vmem:[%s4514_s5 + $0x80] sm:$0xff] %v3084_v27   ;;  %v1747_v58 = vadd.f32 %v1746_v38, %v1648_v9  ;;  %v1943_v13 = vadd.f32 %v1942_v3, %v1844_v0  ;;  %v1845_v36 = vpop.f32.mrf.mxu1 }
 0x299   :  { %v1846_v62 = vadd.f32 %v1845_v36, %v1747_v58  ;;  %v1985_v46 = vmax.f32 %v1943_v13, %v3135_v31 }
 0x29b   :  { %v2025_v37 = vmin.f32 %v1985_v46, %v4139_v32 }
 0x29e   :  { %v1944_v60 = vpop.f32.mrf.mxu2 }
 0x29f   :  { %v1945_v56 = vadd.f32 %v1944_v60, %v1846_v62 }
 0x2a1   :  { %v1986_v51 = vmax.f32 %v1945_v56, %v3135_v31 }
 0x2a3   :  { %v2026_v35 = vmin.f32 %v1986_v51, %v4139_v32 }
 0x2a5   :  { %v3089_v15 = vpack.c.bf16 %v2026_v35, %v2025_v37 }
 0x2a7   :  { %3107 = vst [vmem:[%s4514_s5 + $0x88] sm:$0xff] %v3089_v15  }

// kernel: encoder_mnist_conv_forward.7
= control target key start
LH: loop header
LB: loop body
LE: loop exit
PB: predicated region body
PF: predicated region fallthrough
CT: control target
= control target key end

     0   :  { %vm983_vm0 = vcmask 523264   ;;  %s2416_s1 = inlined_call_operand.vmem [shape: bf16[1600,128], index: 1, kind: input, shape index: {}]   ;;  %s2417_s0 = inlined_call_operand.vmem [shape: bf16[32,1600], index: 0, kind: input, shape index: {}]   ;;  %s2418_s2 = inlined_call_operand.vmem [shape: f32[1,128], index: 2, kind: input, shape index: {}]   ;;  %s2419_s3 = inlined_call_operand.vmem [shape: f32[1,128], index: 3, kind: input, shape index: {}]   ;;  %s2420_s4 = inlined_call_operand.vmem [shape: f32[1,128], index: 4, kind: input, shape index: {}]   ;;  %s2421_s5 = inlined_call_operand.vmem [shape: bf16[32,128], index: 5, kind: output, shape index: {}]  }
   0x1   :  { %v1804_v0 = vld [vmem:[%s2416_s1 + $0x38] sm:$0xff]  ;;  %v1803_v4 = vld [vmem:[%s2416_s1 + $0x30] sm:$0xff]  ;;  %v1802_v8 = vld [vmem:[%s2416_s1 + $0x28] sm:$0xff] }
   0x2   :  { %v1812_v1 = vld [vmem:[%s2416_s1 + $0x78] sm:$0xff]  ;;  %990 = vmatpush.bf16.msra.mxu0 %v1804_v0  ;;  %v1811_v5 = vld [vmem:[%s2416_s1 + $0x70] sm:$0xff]  ;;  %v1810_v9 = vld [vmem:[%s2416_s1 + $0x68] sm:$0xff] }
   0x3   :  { %v1820_v2 = vld [vmem:[%s2416_s1 + $0xb8] sm:$0xff]  ;;  %1009 = vmatpush.bf16.msra.mxu1 %v1812_v1  ;;  %v1819_v6 = vld [vmem:[%s2416_s1 + $0xb0] sm:$0xff]  ;;  %v1818_v10 = vld [vmem:[%s2416_s1 + $0xa8] sm:$0xff] }
   0x4   :  { %v1828_v3 = vld [vmem:[%s2416_s1 + $0xf8] sm:$0xff]  ;;  %1028 = vmatpush.bf16.msra.mxu2 %v1820_v2  ;;  %v1827_v7 = vld [vmem:[%s2416_s1 + $0xf0] sm:$0xff]  ;;  %v1826_v11 = vld [vmem:[%s2416_s1 + $0xe8] sm:$0xff] }
   0x5   :  { %1047 = vmatpush.bf16.msra.mxu3 %v1828_v3  ;;  %v1801_v12 = vld [vmem:[%s2416_s1 + $0x20] sm:$0xff]  ;;  %v1800_v16 = vld [vmem:[%s2416_s1 + $0x18] sm:$0xff]  ;;  %v1799_v20 = vld [vmem:[%s2416_s1 + $0x10] sm:$0xff] }
   0x6   :  { %991 = vmatpush.bf16.msra.mxu0 %v1803_v4  ;;  %v1809_v13 = vld [vmem:[%s2416_s1 + $0x60] sm:$0xff]  ;;  %v1808_v17 = vld [vmem:[%s2416_s1 + $0x58] sm:$0xff]  ;;  %v1807_v21 = vld [vmem:[%s2416_s1 + $0x50] sm:$0xff] }
   0x7   :  { %1010 = vmatpush.bf16.msra.mxu1 %v1811_v5  ;;  %v1817_v14 = vld [vmem:[%s2416_s1 + $0xa0] sm:$0xff]  ;;  %v1816_v18 = vld [vmem:[%s2416_s1 + $0x98] sm:$0xff]  ;;  %v1815_v22 = vld [vmem:[%s2416_s1 + $0x90] sm:$0xff] }
   0x8   :  { %1029 = vmatpush.bf16.msra.mxu2 %v1819_v6  ;;  %v1825_v15 = vld [vmem:[%s2416_s1 + $0xe0] sm:$0xff]  ;;  %v1824_v19 = vld [vmem:[%s2416_s1 + $0xd8] sm:$0xff]  ;;  %v1823_v23 = vld [vmem:[%s2416_s1 + $0xd0] sm:$0xff] }
   0x9   :  { %1048 = vmatpush.bf16.msra.mxu3 %v1827_v7  ;;  %v1798_v24 = vld [vmem:[%s2416_s1 + $0x8] sm:$0xff]  ;;  %v1797_v28 = vld [vmem:[%s2416_s1] sm:$0xff]  ;;  %v1777_v33 = vld [vmem:[%s2417_s0 + $0x30] sm:$0xf0] }
   0xa   :  { %992 = vmatpush.bf16.msra.mxu0 %v1802_v8  ;;  %v1806_v25 = vld [vmem:[%s2416_s1 + $0x48] sm:$0xff]  ;;  %v1805_v29 = vld [vmem:[%s2416_s1 + $0x40] sm:$0xff]  ;;  %v1269_v35 = vld [vmem:[%s2417_s0 + $0x34] sm:$0xf0] }
   0xb   :  { %1011 = vmatpush.bf16.msra.mxu1 %v1810_v9  ;;  %v1814_v26 = vld [vmem:[%s2416_s1 + $0x88] sm:$0xff]  ;;  %v1813_v30 = vld [vmem:[%s2416_s1 + $0x80] sm:$0xff]  ;;  %v1778_v37 = vld [vmem:[%s2417_s0 + $0x38] sm:$0xf0] }
   0xc   :  { %1030 = vmatpush.bf16.msra.mxu2 %v1818_v10  ;;  %v1822_v27 = vld [vmem:[%s2416_s1 + $0xc8] sm:$0xff]  ;;  %v1821_v31 = vld [vmem:[%s2416_s1 + $0xc0] sm:$0xff]  ;;  %v1836_v40 = vld [vmem:[%s2416_s1 + $0x138] sm:$0xff] }
   0xd   :  { %1049 = vmatpush.bf16.msra.mxu3 %v1826_v11  ;;  %v1267_v32 = vld [vmem:[%s2417_s0] sm:$0xf]  ;;  %v1771_v34 = vld [vmem:[%s2417_s0 + $0x4] sm:$0xf]  ;;  %v1275_v36 = vld [vmem:[%s2417_s0 + $0x8] sm:$0xf] }
   0xe   :  { %993 = vmatpush.bf16.msra.mxu0 %v1801_v12  ;;  %v1772_v38 = vld [vmem:[%s2417_s0 + $0xc] sm:$0xf]  ;;  %v1277_v39 = vld [vmem:[%s2417_s0 + $0x3c] sm:$0xf0]  ;;  %v1844_v41 = vld [vmem:[%s2416_s1 + $0x178] sm:$0xff]  ;;  %v1268_v42 = vor.u32 %v1777_v33, %v1267_v32  ;;  %v1272_v43 = vor.u32 %v1771_v34, %v1269_v35  ;;  %v1276_v44 = vor.u32 %v1778_v37, %v1275_v36 }
   0xf   :  { %1012 = vmatpush.bf16.msra.mxu1 %v1809_v13  ;;  %v1280_v45 = vor.u32 %v1772_v38, %v1277_v39  ;;  %v1852_v46 = vld [vmem:[%s2416_s1 + $0x1b8] sm:$0xff]  ;;  %v1835_v48 = vld [vmem:[%s2416_s1 + $0x130] sm:$0xff]  ;;  %v1834_v52 = vld [vmem:[%s2416_s1 + $0x128] sm:$0xff] }
  0x10   :  { %1031 = vmatpush.bf16.msra.mxu2 %v1817_v14  ;;  %v1860_v47 = vld [vmem:[%s2416_s1 + $0x1f8] sm:$0xff]  ;;  %v1843_v49 = vld [vmem:[%s2416_s1 + $0x170] sm:$0xff]  ;;  %v1842_v53 = vld [vmem:[%s2416_s1 + $0x168] sm:$0xff] }
  0x11   :  { %1050 = vmatpush.bf16.msra.mxu3 %v1825_v15  ;;  %v1851_v50 = vld [vmem:[%s2416_s1 + $0x1b0] sm:$0xff]  ;;  %v1850_v54 = vld [vmem:[%s2416_s1 + $0x1a8] sm:$0xff]  ;;  %v1833_v56 = vld [vmem:[%s2416_s1 + $0x120] sm:$0xff] }
  0x12   :  { %994 = vmatpush.bf16.msra.mxu0 %v1800_v16  ;;  %v1859_v51 = vld [vmem:[%s2416_s1 + $0x1f0] sm:$0xff]  ;;  %v1858_v55 = vld [vmem:[%s2416_s1 + $0x1e8] sm:$0xff]  ;;  %v1841_v57 = vld [vmem:[%s2416_s1 + $0x160] sm:$0xff] }
  0x13   :  { %1013 = vmatpush.bf16.msra.mxu1 %v1808_v17  ;;  %v1849_v58 = vld [vmem:[%s2416_s1 + $0x1a0] sm:$0xff]  ;;  %v1319_v60 = vld [vmem:[%s2417_s0 + $0x68] sm:$0xf]  ;;  %v1790_v61 = vld [vmem:[%s2417_s0 + $0x98] sm:$0xf0] }
  0x14   :  { %1032 = vmatpush.bf16.msra.mxu2 %v1816_v18  ;;  %v1857_v59 = vld [vmem:[%s2416_s1 + $0x1e0] sm:$0xff]  ;;  %v1784_v62 = vld [vmem:[%s2417_s0 + $0x6c] sm:$0xf]  ;;  %v1327_v0 = vld [vmem:[%s2417_s0 + $0x70] sm:$0xf]  ;;  %v1320_v6 = vor.u32 %v1790_v61, %v1319_v60 }
  0x15   :  { %1051 = vmatpush.bf16.msra.mxu3 %v1824_v19  ;;  %v1321_v63 = vld [vmem:[%s2417_s0 + $0x9c] sm:$0xf0]  ;;  %v1791_v1 = vld [vmem:[%s2417_s0 + $0xa0] sm:$0xf0]  ;;  %v1785_v2 = vld [vmem:[%s2417_s0 + $0x74] sm:$0xf] }
  0x16   :  { %995 = vmatpush.bf16.msra.mxu0 %v1799_v20  ;;  %v1329_v3 = vld [vmem:[%s2417_s0 + $0xa4] sm:$0xf0]  ;;  %v1832_v4 = vld [vmem:[%s2416_s1 + $0x118] sm:$0xff]  ;;  %v1324_v7 = vor.u32 %v1784_v62, %v1321_v63  ;;  %v1328_v8 = vor.u32 %v1791_v1, %v1327_v0  ;;  %v1831_v12 = vld [vmem:[%s2416_s1 + $0x110] sm:$0xff] }
  0x17   :  { %1014 = vmatpush.bf16.msra.mxu1 %v1807_v21  ;;  %v1840_v5 = vld [vmem:[%s2416_s1 + $0x158] sm:$0xff]  ;;  %v1332_v9 = vor.u32 %v1785_v2, %v1329_v3  ;;  %v1839_v13 = vld [vmem:[%s2416_s1 + $0x150] sm:$0xff]  ;;  %v1830_v16 = vld [vmem:[%s2416_s1 + $0x108] sm:$0xff] }
  0x18   :  { %1033 = vmatpush.bf16.msra.mxu2 %v1815_v22  ;;  %v1848_v10 = vld [vmem:[%s2416_s1 + $0x198] sm:$0xff]  ;;  %v1847_v14 = vld [vmem:[%s2416_s1 + $0x190] sm:$0xff]  ;;  %v1838_v17 = vld [vmem:[%s2416_s1 + $0x148] sm:$0xff] }
  0x19   :  { %1052 = vmatpush.bf16.msra.mxu3 %v1823_v23  ;;  %v1856_v11 = vld [vmem:[%s2416_s1 + $0x1d8] sm:$0xff]  ;;  %v1855_v15 = vld [vmem:[%s2416_s1 + $0x1d0] sm:$0xff]  ;;  %v1846_v18 = vld [vmem:[%s2416_s1 + $0x188] sm:$0xff] }
  0x1a   :  { %996 = vmatpush.bf16.msra.mxu0 %v1798_v24  ;;  %v1854_v19 = vld [vmem:[%s2416_s1 + $0x1c8] sm:$0xff]  ;;  %v1829_v20 = vld [vmem:[%s2416_s1 + $0x100] sm:$0xff]  ;;  %v1283_v22 = vld [vmem:[%s2417_s0 + $0x10] sm:$0xf] }
  0x1b   :  { %1015 = vmatpush.bf16.msra.mxu1 %v1806_v25  ;;  %v1837_v21 = vld [vmem:[%s2416_s1 + $0x140] sm:$0xff]  ;;  %v1774_v32 = vld [vmem:[%s2417_s0 + $0x1c] sm:$0xf]  ;;  %v1293_v33 = vld [vmem:[%s2417_s0 + $0x4c] sm:$0xf0] }
  0x1c   :  { %1034 = vmatpush.bf16.msra.mxu2 %v1814_v26  ;;  %v1845_v23 = vld [vmem:[%s2416_s1 + $0x180] sm:$0xff]  ;;  %v1868_v26 = vld [vmem:[%s2416_s1 + $0x238] sm:$0xff]  ;;  %v1296_v39 = vor.u32 %v1774_v32, %v1293_v33  ;;  %v1351_v32 = vld [vmem:[%s2417_s0 + $0x88] sm:$0xf] }
  0x1d   :  { %1053 = vmatpush.bf16.msra.mxu3 %v1822_v27  ;;  %v1853_v24 = vld [vmem:[%s2416_s1 + $0x1c0] sm:$0xff]  ;;  %v1876_v27 = vld [vmem:[%s2416_s1 + $0x278] sm:$0xff] }
  0x1e   :  { %997 = vmatpush.bf16.msra.mxu0 %v1797_v28  ;;  %v1779_v25 = vld [vmem:[%s2417_s0 + $0x40] sm:$0xf0]  ;;  %v1773_v28 = vld [vmem:[%s2417_s0 + $0x14] sm:$0xf]  ;;  %v1884_v34 = vld [vmem:[%s2416_s1 + $0x2b8] sm:$0xff] }
  0x1f   :  { %1016 = vmatpush.bf16.msra.mxu1 %v1805_v29  ;;  %v1285_v29 = vld [vmem:[%s2417_s0 + $0x44] sm:$0xf0]  ;;  %v1892_v35 = vld [vmem:[%s2416_s1 + $0x2f8] sm:$0xff]  ;;  %v1284_v36 = vor.u32 %v1779_v25, %v1283_v22 }
  0x20   :  { %1035 = vmatpush.bf16.msra.mxu2 %v1813_v30  ;;  %v1291_v30 = vld [vmem:[%s2417_s0 + $0x18] sm:$0xf]  ;;  %v1288_v37 = vor.u32 %v1773_v28, %v1285_v29  ;;  %v1782_v22 = vld [vmem:[%s2417_s0 + $0x58] sm:$0xf0]  ;;  %v1895_v29 = vld [vmem:[%s2416_s1 + $0x310] sm:$0xff] }
  0x21   :  { %1054 = vmatpush.bf16.msra.mxu3 %v1821_v31  ;;  %998 = vmatmul.bf16.vlgmr.msra.gmra.mxu0 %v1268_v42  ;;  %v1780_v31 = vld [vmem:[%s2417_s0 + $0x48] sm:$0xf0]  ;;  %v1883_v42 = vld [vmem:[%s2416_s1 + $0x2b0] sm:$0xff]  ;;  %v1864_v60 = vld [vmem:[%s2416_s1 + $0x218] sm:$0xff] }
  0x22   :  { %1066 = vmatpush.bf16.msrb.mxu0 %v1836_v40  ;;  %1017 = vmatmul.bf16.vlgmr.msra.gmra.mxu1 %v1272_v43  ;;  %v1292_v38 = vor.u32 %v1780_v31, %v1291_v30  ;;  %v1867_v40 = vld [vmem:[%s2416_s1 + $0x230] sm:$0xff]  ;;  %v1872_v61 = vld [vmem:[%s2416_s1 + $0x258] sm:$0xff]  ;;  %v1894_v30 = vld [vmem:[%s2416_s1 + $0x308] sm:$0xff] }
  0x23   :  { %1085 = vmatpush.bf16.msrb.mxu1 %v1844_v41  ;;  %1036 = vmatmul.bf16.vlgmr.msra.gmra.mxu2 %v1276_v44  ;;  %v1875_v41 = vld [vmem:[%s2416_s1 + $0x270] sm:$0xff]  ;;  %v1866_v44 = vld [vmem:[%s2416_s1 + $0x228] sm:$0xff]  ;;  %v1880_v62 = vld [vmem:[%s2416_s1 + $0x298] sm:$0xff] }
  0x24   :  { %1055 = vmatmul.bf16.vlgmr.msra.gmra.mxu3 %v1280_v45  ;;  %1104 = vmatpush.bf16.msrb.mxu2 %v1852_v46  ;;  %v1891_v43 = vld [vmem:[%s2416_s1 + $0x2f0] sm:$0xff]  ;;  %v1874_v45 = vld [vmem:[%s2416_s1 + $0x268] sm:$0xff]  ;;  %v1888_v63 = vld [vmem:[%s2416_s1 + $0x2d8] sm:$0xff] }
  0x25   :  { %1123 = vmatpush.bf16.msrb.mxu3 %v1860_v47  ;;  %v1882_v46 = vld [vmem:[%s2416_s1 + $0x2a8] sm:$0xff]  ;;  %v1893_v31 = vld [vmem:[%s2416_s1 + $0x300] sm:$0xff]  ;;  %v1794_v33 = vld [vmem:[%s2417_s0 + $0xb8] sm:$0xf0] }
  0x26   :  { %1067 = vmatpush.bf16.msrb.mxu0 %v1835_v48  ;;  %v1890_v47 = vld [vmem:[%s2416_s1 + $0x2e8] sm:$0xff]  ;;  %v1865_v48 = vld [vmem:[%s2416_s1 + $0x220] sm:$0xff] }
  0x27   :  { %1086 = vmatpush.bf16.msrb.mxu1 %v1843_v49  ;;  %v1873_v49 = vld [vmem:[%s2416_s1 + $0x260] sm:$0xff] }
  0x28   :  { %1105 = vmatpush.bf16.msrb.mxu2 %v1851_v50  ;;  %v1881_v50 = vld [vmem:[%s2416_s1 + $0x2a0] sm:$0xff] }
  0x29   :  { %1124 = vmatpush.bf16.msrb.mxu3 %v1859_v51  ;;  %v1889_v51 = vld [vmem:[%s2416_s1 + $0x2e0] sm:$0xff] }
  0x2a   :  { %1068 = vmatpush.bf16.msrb.mxu0 %v1834_v52  ;;  %v1335_v52 = vld [vmem:[%s2417_s0 + $0x78] sm:$0xf] }
  0x2b   :  { %1087 = vmatpush.bf16.msrb.mxu1 %v1842_v53  ;;  %v1792_v53 = vld [vmem:[%s2417_s0 + $0xa8] sm:$0xf0] }
  0x2c   :  { %1106 = vmatpush.bf16.msrb.mxu2 %v1850_v54  ;;  %v1786_v54 = vld [vmem:[%s2417_s0 + $0x7c] sm:$0xf]  ;;  %v1336_v0 = vor.u32 %v1792_v53, %v1335_v52 }
  0x2d   :  { %1125 = vmatpush.bf16.msrb.mxu3 %v1858_v55  ;;  %v1337_v55 = vld [vmem:[%s2417_s0 + $0xac] sm:$0xf0] }
  0x2e   :  { %1069 = vmatpush.bf16.msrb.mxu0 %v1833_v56  ;;  %v1343_v56 = vld [vmem:[%s2417_s0 + $0x80] sm:$0xf]  ;;  %v1340_v1 = vor.u32 %v1786_v54, %v1337_v55 }
  0x2f   :  { %1088 = vmatpush.bf16.msrb.mxu1 %v1841_v57  ;;  %v1793_v57 = vld [vmem:[%s2417_s0 + $0xb0] sm:$0xf0] }
  0x30   :  { %1107 = vmatpush.bf16.msrb.mxu2 %v1849_v58  ;;  %v1787_v58 = vld [vmem:[%s2417_s0 + $0x84] sm:$0xf]  ;;  %v1344_v2 = vor.u32 %v1793_v57, %v1343_v56 }
  0x31   :  { %1126 = vmatpush.bf16.msrb.mxu3 %v1857_v59  ;;  %1003 = vmatmul.bf16.gmra.mxu0 %v1320_v6  ;;  %v1345_v59 = vld [vmem:[%s2417_s0 + $0xb4] sm:$0xf0]  ;;  %v1879_v6 = vld [vmem:[%s2416_s1 + $0x290] sm:$0xff] }
  0x32   :  { %1070 = vmatpush.bf16.msrb.mxu0 %v1832_v4  ;;  %1022 = vmatmul.bf16.gmra.mxu1 %v1324_v7  ;;  %v1348_v3 = vor.u32 %v1787_v58, %v1345_v59  ;;  %v1863_v4 = vld [vmem:[%s2416_s1 + $0x210] sm:$0xff] }
  0x33   :  { %1089 = vmatpush.bf16.msrb.mxu1 %v1840_v5  ;;  %1041 = vmatmul.bf16.gmra.mxu2 %v1328_v8  ;;  %v1871_v5 = vld [vmem:[%s2416_s1 + $0x250] sm:$0xff]  ;;  %v1862_v8 = vld [vmem:[%s2416_s1 + $0x208] sm:$0xff] }
  0x34   :  { %1060 = vmatmul.bf16.gmra.mxu3 %v1332_v9  ;;  %1108 = vmatpush.bf16.msrb.mxu2 %v1848_v10  ;;  %v1887_v7 = vld [vmem:[%s2416_s1 + $0x2d0] sm:$0xff]  ;;  %v1870_v9 = vld [vmem:[%s2416_s1 + $0x248] sm:$0xff] }
  0x35   :  { %1127 = vmatpush.bf16.msrb.mxu3 %v1856_v11  ;;  %v1878_v10 = vld [vmem:[%s2416_s1 + $0x288] sm:$0xff] }
  0x36   :  { %1071 = vmatpush.bf16.msrb.mxu0 %v1831_v12  ;;  %v1886_v11 = vld [vmem:[%s2416_s1 + $0x2c8] sm:$0xff]  ;;  %v1861_v12 = vld [vmem:[%s2416_s1 + $0x200] sm:$0xff] }
  0x37   :  { %1090 = vmatpush.bf16.msrb.mxu1 %v1839_v13  ;;  %v1869_v13 = vld [vmem:[%s2416_s1 + $0x240] sm:$0xff] }
  0x38   :  { %1109 = vmatpush.bf16.msrb.mxu2 %v1847_v14  ;;  %v1877_v14 = vld [vmem:[%s2416_s1 + $0x280] sm:$0xff] }
  0x39   :  { %1128 = vmatpush.bf16.msrb.mxu3 %v1855_v15  ;;  %v1885_v15 = vld [vmem:[%s2416_s1 + $0x2c0] sm:$0xff] }
  0x3a   :  { %1072 = vmatpush.bf16.msrb.mxu0 %v1830_v16  ;;  %v1299_v16 = vld [vmem:[%s2417_s0 + $0x20] sm:$0xf] }
  0x3b   :  { %1091 = vmatpush.bf16.msrb.mxu1 %v1838_v17  ;;  %v1781_v17 = vld [vmem:[%s2417_s0 + $0x50] sm:$0xf0] }
  0x3c   :  { %1110 = vmatpush.bf16.msrb.mxu2 %v1846_v18  ;;  %v1896_v18 = vld [vmem:[%s2416_s1 + $0x318] sm:$0xff]  ;;  %v1300_v25 = vor.u32 %v1781_v17, %v1299_v16 }
  0x3d   :  { %1129 = vmatpush.bf16.msrb.mxu3 %v1854_v19  ;;  %v1775_v19 = vld [vmem:[%s2417_s0 + $0x24] sm:$0xf] }
  0x3e   :  { %1073 = vmatpush.bf16.msrb.mxu0 %v1829_v20  ;;  %v1301_v20 = vld [vmem:[%s2417_s0 + $0x54] sm:$0xf0] }
  0x3f   :  { %1092 = vmatpush.bf16.msrb.mxu1 %v1837_v21  ;;  %v1307_v21 = vld [vmem:[%s2417_s0 + $0x28] sm:$0xf] }
  0x40   :  { %1111 = vmatpush.bf16.msrb.mxu2 %v1845_v23  ;;  %v1776_v23 = vld [vmem:[%s2417_s0 + $0x2c] sm:$0xf] }
  0x41   :  { %1130 = vmatpush.bf16.msrb.mxu3 %v1853_v24  ;;  %1074 = vmatmul.bf16.vlgmr.msrb.gmra.mxu0 %v1284_v36  ;;  %v1309_v24 = vld [vmem:[%s2417_s0 + $0x5c] sm:$0xf0]  ;;  %v1359_v36 = vld [vmem:[%s2417_s0 + $0x90] sm:$0xf] }
  0x42   :  { %1142 = vmatpush.bf16.msra.mxu0 %v1868_v26  ;;  %1093 = vmatmul.bf16.vlgmr.msrb.gmra.mxu1 %v1288_v37  ;;  %v1304_v26 = vor.u32 %v1775_v19, %v1301_v20  ;;  %v1312_v28 = vor.u32 %v1776_v23, %v1309_v24  ;;  %v1795_v37 = vld [vmem:[%s2417_s0 + $0xc0] sm:$0xf0] }
  0x43   :  { %1161 = vmatpush.bf16.msra.mxu1 %v1876_v27  ;;  %1112 = vmatmul.bf16.vlgmr.msrb.gmra.mxu2 %v1292_v38  ;;  %v1308_v27 = vor.u32 %v1782_v22, %v1307_v21  ;;  %v1789_v38 = vld [vmem:[%s2417_s0 + $0x94] sm:$0xf] }
  0x44   :  { %1180 = vmatpush.bf16.msra.mxu2 %v1884_v34  ;;  %1131 = vmatmul.bf16.vlgmr.msrb.gmra.mxu3 %v1296_v39  ;;  %v1788_v34 = vld [vmem:[%s2417_s0 + $0x8c] sm:$0xf]  ;;  %v1361_v39 = vld [vmem:[%s2417_s0 + $0xc4] sm:$0xf0] }
  0x45   :  { %1199 = vmatpush.bf16.msra.mxu3 %v1892_v35  ;;  %v1353_v35 = vld [vmem:[%s2417_s0 + $0xbc] sm:$0xf0] }
  0x46   :  { %1143 = vmatpush.bf16.msra.mxu0 %v1867_v40  ;;  %v1352_v40 = vor.u32 %v1794_v33, %v1351_v32 }
  0x47   :  { %1162 = vmatpush.bf16.msra.mxu1 %v1875_v41  ;;  %v1356_v41 = vor.u32 %v1788_v34, %v1353_v35 }
  0x48   :  { %1181 = vmatpush.bf16.msra.mxu2 %v1883_v42  ;;  %v1360_v42 = vor.u32 %v1795_v37, %v1359_v36 }
  0x49   :  { %1200 = vmatpush.bf16.msra.mxu3 %v1891_v43  ;;  %v1364_v43 = vor.u32 %v1789_v38, %v1361_v39 }
  0x4a   :  { %1144 = vmatpush.bf16.msra.mxu0 %v1866_v44  ;;  %v1315_v44 = vld [vmem:[%s2417_s0 + $0x30] sm:$0xf] }
  0x4b   :  { %1163 = vmatpush.bf16.msra.mxu1 %v1874_v45  ;;  %v1783_v45 = vld [vmem:[%s2417_s0 + $0x60] sm:$0xf0] }
  0x4c   :  { %1182 = vmatpush.bf16.msra.mxu2 %v1882_v46  ;;  %v1367_v46 = vld [vmem:[%s2417_s0 + $0x98] sm:$0xf] }
  0x4d   :  { %1201 = vmatpush.bf16.msra.mxu3 %v1890_v47  ;;  %v1796_v47 = vld [vmem:[%s2417_s0 + $0xc8] sm:$0xf0] }
  0x4e   :  { %1145 = vmatpush.bf16.msra.mxu0 %v1865_v48  ;;  %v1316_v48 = vor.u32 %v1783_v45, %v1315_v44 }
  0x4f   :  { %1164 = vmatpush.bf16.msra.mxu1 %v1873_v49  ;;  %v1368_v49 = vor.u32 %v1796_v47, %v1367_v46 }
  0x50   :  { %1183 = vmatpush.bf16.msra.mxu2 %v1881_v50  ;;  %v1912_v50 = vld [vmem:[%s2418_s2] ss:$0 sm:$0xff] }
  0x51   :  { %1202 = vmatpush.bf16.msra.mxu3 %v1889_v51  ;;  %1079 = vmatmul.bf16.gmra.mxu0 %v1336_v0 }
  0x52   :  { %1146 = vmatpush.bf16.msra.mxu0 %v1864_v60  ;;  %1098 = vmatmul.bf16.gmra.mxu1 %v1340_v1 }
  0x53   :  { %1165 = vmatpush.bf16.msra.mxu1 %v1872_v61  ;;  %1117 = vmatmul.bf16.gmra.mxu2 %v1344_v2 }
  0x54   :  { %1184 = vmatpush.bf16.msra.mxu2 %v1880_v62  ;;  %1136 = vmatmul.bf16.gmra.mxu3 %v1348_v3 }
  0x55   :  { %1203 = vmatpush.bf16.msra.mxu3 %v1888_v63 }
  0x56   :  { %1147 = vmatpush.bf16.msra.mxu0 %v1863_v4 }
  0x57   :  { %1166 = vmatpush.bf16.msra.mxu1 %v1871_v5 }
  0x58   :  { %1185 = vmatpush.bf16.msra.mxu2 %v1879_v6 }
  0x59   :  { %1204 = vmatpush.bf16.msra.mxu3 %v1887_v7 }
  0x5a   :  { %1148 = vmatpush.bf16.msra.mxu0 %v1862_v8 }
  0x5b   :  { %1167 = vmatpush.bf16.msra.mxu1 %v1870_v9 }
  0x5c   :  { %1186 = vmatpush.bf16.msra.mxu2 %v1878_v10 }
  0x5d   :  { %1205 = vmatpush.bf16.msra.mxu3 %v1886_v11 }
  0x5e   :  { %1149 = vmatpush.bf16.msra.mxu0 %v1861_v12 }
  0x5f   :  { %1168 = vmatpush.bf16.msra.mxu1 %v1869_v13 }
  0x60   :  { %1187 = vmatpush.bf16.msra.mxu2 %v1877_v14 }
  0x61   :  { %1206 = vmatpush.bf16.msra.mxu3 %v1885_v15  ;;  %1150 = vmatmul.bf16.vlgmr.msra.gmra.mxu0 %v1300_v25 }
  0x62   :  { %1222 = vmatpush.bf16.msrb.mxu0 %v1896_v18  ;;  %1169 = vmatmul.bf16.vlgmr.msra.gmra.mxu1 %v1304_v26 }
  0x63   :  { %1908 = vmatpush.bf16.msrb.mxu1 %v1896_v18  ;;  %1188 = vmatmul.bf16.vlgmr.msra.gmra.mxu2 %v1308_v27 }
  0x64   :  { %1207 = vmatmul.bf16.vlgmr.msra.gmra.mxu3 %v1312_v28 }
  0x66   :  { %1223 = vmatpush.bf16.msrb.mxu0 %v1895_v29 }
  0x67   :  { %1909 = vmatpush.bf16.msrb.mxu1 %v1895_v29 }
  0x6a   :  { %1224 = vmatpush.bf16.msrb.mxu0 %v1894_v30 }
  0x6b   :  { %1910 = vmatpush.bf16.msrb.mxu1 %v1894_v30 }
  0x6e   :  { %1225 = vmatpush.bf16.msrb.mxu0 %v1893_v31 }
  0x6f   :  { %1911 = vmatpush.bf16.msrb.mxu1 %v1893_v31 }
  0x71   :  { %1155 = vmatmul.bf16.gmra.mxu0 %v1352_v40 }
  0x72   :  { %1174 = vmatmul.bf16.gmra.mxu1 %v1356_v41 }
  0x73   :  { %1193 = vmatmul.bf16.gmra.mxu2 %v1360_v42 }
  0x74   :  { %1212 = vmatmul.bf16.gmra.mxu3 %v1364_v43 }
  0x81   :  { %1769 = vmatmul.msk.bf16.vlgmr.msrb.gmra.mxu0 %vm983_vm0, %v1316_v48 }
  0x82   :  { %1770 = vmatmul.msk.bf16.vlgmr.msrb.gmra.mxu1 %vm983_vm0, %v1368_v49 }
  0x9e   :  { %v999_v51 = vpop.f32.mrf.mxu0 }
  0x9f   :  { %v1018_v52 = vpop.f32.mrf.mxu1  ;;  %v1000_v53 = vadd.f32 %v1912_v50, %v999_v51 }
  0xa1   :  { %v1019_v54 = vadd.f32 %v1018_v52, %v1000_v53 }
  0xa6   :  { %v1037_v55 = vpop.f32.mrf.mxu2  ;;  %v1001_v58 = vpop.f32.mrf.mxu0 }
  0xa7   :  { %v1056_v56 = vpop.f32.mrf.mxu3  ;;  %v1038_v57 = vadd.f32 %v1037_v55, %v1019_v54  ;;  %v1020_v59 = vpop.f32.mrf.mxu1  ;;  %v1002_v60 = vadd.f32 %v1912_v50, %v1001_v58 }
  0xa9   :  { %v1057_v61 = vadd.f32 %v1056_v56, %v1038_v57  ;;  %v1021_v62 = vadd.f32 %v1020_v59, %v1002_v60 }
  0xae   :  { %v1039_v63 = vpop.f32.mrf.mxu2  ;;  %v1004_v1 = vpop.f32.mrf.mxu0 }
  0xaf   :  { %v1058_v0 = vpop.f32.mrf.mxu3  ;;  %v1023_v2 = vpop.f32.mrf.mxu1  ;;  %v1005_v3 = vadd.f32 %v1912_v50, %v1004_v1  ;;  %v1040_v36 = vadd.f32 %v1039_v63, %v1021_v62 }
  0xb1   :  { %v1024_v4 = vadd.f32 %v1023_v2, %v1005_v3  ;;  %v1059_v41 = vadd.f32 %v1058_v0, %v1040_v36 }
  0xb6   :  { %v1042_v5 = vpop.f32.mrf.mxu2  ;;  %v1006_v7 = vpop.f32.mrf.mxu0 }
  0xb7   :  { %v1061_v6 = vpop.f32.mrf.mxu3  ;;  %v1025_v8 = vpop.f32.mrf.mxu1  ;;  %v1007_v29 = vadd.f32 %v1912_v50, %v1006_v7  ;;  %v1043_v30 = vadd.f32 %v1042_v5, %v1024_v4 }
  0xb9   :  { %v1026_v35 = vadd.f32 %v1025_v8, %v1007_v29  ;;  %v1062_v37 = vadd.f32 %v1061_v6, %v1043_v30 }
  0xbe   :  { %v1044_v9 = vpop.f32.mrf.mxu2  ;;  %v1075_v11 = vpop.f32.mrf.mxu0 }
  0xbf   :  { %v1063_v10 = vpop.f32.mrf.mxu3  ;;  %v1094_v12 = vpop.f32.mrf.mxu1  ;;  %v1045_v38 = vadd.f32 %v1044_v9, %v1026_v35  ;;  %v1076_v39 = vadd.f32 %v1075_v11, %v1057_v61 }
  0xc1   :  { %v1064_v42 = vadd.f32 %v1063_v10, %v1045_v38  ;;  %v1095_v46 = vadd.f32 %v1094_v12, %v1076_v39 }
  0xc6   :  { %v1113_v13 = vpop.f32.mrf.mxu2  ;;  %v1077_v15 = vpop.f32.mrf.mxu0 }
  0xc7   :  { %v1132_v14 = vpop.f32.mrf.mxu3  ;;  %v1096_v16 = vpop.f32.mrf.mxu1  ;;  %v1078_v47 = vadd.f32 %v1077_v15, %v1059_v41  ;;  %v1114_v51 = vadd.f32 %v1113_v13, %v1095_v46 }
  0xc9   :  { %v1097_v53 = vadd.f32 %v1096_v16, %v1078_v47  ;;  %v1133_v55 = vadd.f32 %v1132_v14, %v1114_v51 }
  0xce   :  { %v1115_v17 = vpop.f32.mrf.mxu2  ;;  %v1080_v19 = vpop.f32.mrf.mxu0 }
  0xcf   :  { %v1134_v18 = vpop.f32.mrf.mxu3  ;;  %v1099_v20 = vpop.f32.mrf.mxu1  ;;  %v1081_v40 = vadd.f32 %v1080_v19, %v1062_v37  ;;  %v1116_v56 = vadd.f32 %v1115_v17, %v1097_v53 }
  0xd1   :  { %v1100_v48 = vadd.f32 %v1099_v20, %v1081_v40  ;;  %v1135_v0 = vadd.f32 %v1134_v18, %v1116_v56  ;;  %v1913_v18 = vld [vmem:[%s2419_s3] ss:$0 sm:$0xff] }
  0xd6   :  { %v1118_v21 = vpop.f32.mrf.mxu2  ;;  %v1082_v23 = vpop.f32.mrf.mxu0 }
  0xd7   :  { %v1137_v22 = vpop.f32.mrf.mxu3  ;;  %v1101_v24 = vpop.f32.mrf.mxu1  ;;  %v1083_v49 = vadd.f32 %v1082_v23, %v1064_v42  ;;  %v1119_v52 = vadd.f32 %v1118_v21, %v1100_v48 }
  0xd9   :  { %v1102_v54 = vadd.f32 %v1101_v24, %v1083_v49  ;;  %v1138_v57 = vadd.f32 %v1137_v22, %v1119_v52 }
  0xde   :  { %v1120_v25 = vpop.f32.mrf.mxu2  ;;  %v1151_v27 = vpop.f32.mrf.mxu0 }
  0xdf   :  { %v1139_v26 = vpop.f32.mrf.mxu3  ;;  %v1170_v28 = vpop.f32.mrf.mxu1  ;;  %v1121_v58 = vadd.f32 %v1120_v25, %v1102_v54  ;;  %v1152_v62 = vadd.f32 %v1151_v27, %v1133_v55  ;;  %v1914_v27 = vld [vmem:[%s2420_s4] ss:$0 sm:$0xff] }
  0xe1   :  { %v1140_v1 = vadd.f32 %v1139_v26, %v1121_v58  ;;  %v1171_v3 = vadd.f32 %v1170_v28, %v1152_v62 }
  0xe6   :  { %v1189_v31 = vpop.f32.mrf.mxu2  ;;  %v1153_v33 = vpop.f32.mrf.mxu0 }
  0xe7   :  { %v1208_v32 = vpop.f32.mrf.mxu3  ;;  %v1172_v34 = vpop.f32.mrf.mxu1  ;;  %v1154_v4 = vadd.f32 %v1153_v33, %v1135_v0  ;;  %v1190_v7 = vadd.f32 %v1189_v31, %v1171_v3 }
  0xe9   :  { %v1173_v12 = vadd.f32 %v1172_v34, %v1154_v4  ;;  %v1209_v14 = vadd.f32 %v1208_v32, %v1190_v7 }
  0xee   :  { %v1191_v43 = vpop.f32.mrf.mxu2  ;;  %v1156_v44 = vpop.f32.mrf.mxu0 }
  0xef   :  { %v1175_v45 = vpop.f32.mrf.mxu1  ;;  %v1210_v50 = vpop.f32.mrf.mxu3  ;;  %v1157_v63 = vadd.f32 %v1156_v44, %v1138_v57  ;;  %v1192_v15 = vadd.f32 %v1191_v43, %v1173_v12 }
  0xf1   :  { %v1176_v5 = vadd.f32 %v1175_v45, %v1157_v63  ;;  %v1211_v22 = vadd.f32 %v1210_v50, %v1192_v15 }
  0xf6   :  { %v1194_v59 = vpop.f32.mrf.mxu2  ;;  %v1158_v60 = vpop.f32.mrf.mxu0 }
  0xf7   :  { %v1177_v61 = vpop.f32.mrf.mxu1  ;;  %v1213_v2 = vpop.f32.mrf.mxu3  ;;  %v1159_v6 = vadd.f32 %v1158_v60, %v1140_v1  ;;  %v1195_v8 = vadd.f32 %v1194_v59, %v1176_v5 }
  0xf9   :  { %v1178_v13 = vadd.f32 %v1177_v61, %v1159_v6  ;;  %v1214_v16 = vadd.f32 %v1213_v2, %v1195_v8 }
  0xfe   :  { %v1196_v9 = vpop.f32.mrf.mxu2  ;;  %v1227_v10 = vpop.f32.mrf.mxu0 }
  0xff   :  { %v1232_v11 = vpop.f32.mrf.mxu1  ;;  %v1197_v17 = vadd.f32 %v1196_v9, %v1178_v13  ;;  %v1228_v19 = vadd.f32 %v1227_v10, %v1209_v14  ;;  %v1215_v21 = vpop.f32.mrf.mxu3 }
 0x100   :  { %v1233_v20 = vadd.f32 %v1232_v11, %v1214_v16 }
 0x101   :  { %v1216_v23 = vadd.f32 %v1215_v21, %v1197_v17  ;;  %v1241_v26 = vmax.f32 %v1228_v19, %v1913_v18 }
 0x102   :  { %v1243_v28 = vmax.f32 %v1233_v20, %v1913_v18 }
 0x103   :  { %v1249_v33 = vmin.f32 %v1241_v26, %v1914_v27 }
 0x104   :  { %v1251_v34 = vmin.f32 %v1243_v28, %v1914_v27 }
 0x106   :  { %v1229_v24 = vpop.f32.mrf.mxu0 }
 0x107   :  { %v1234_v25 = vpop.f32.mrf.mxu1  ;;  %v1230_v29 = vadd.f32 %v1229_v24, %v1211_v22 }
 0x108   :  { %v1235_v30 = vadd.f32 %v1234_v25, %v1216_v23 }
 0x109   :  { %v1242_v31 = vmax.f32 %v1230_v29, %v1913_v18 }
 0x10a   :  { %v1244_v32 = vmax.f32 %v1235_v30, %v1913_v18 }
 0x10b   :  { %v1250_v35 = vmin.f32 %v1242_v31, %v1914_v27 }
 0x10c   :  { %v1252_v36 = vmin.f32 %v1244_v32, %v1914_v27 }
 0x10d   :  { %v1900_v37 = vpack.c.bf16 %v1250_v35, %v1249_v33 }
 0x10e   :  { %v1905_v38 = vpack.c.bf16 %v1252_v36, %v1251_v34 }
 0x10f   :  { %1901 = vst [vmem:[%s2421_s5] sm:$0xff] %v1900_v37  }
 0x110   :  { %1907 = vst [vmem:[%s2421_s5 + $0x8] sm:$0xff] %v1905_v38  }

// kernel: encoder_mnist_conv_forward.8
= control target key start
LH: loop header
LB: loop body
LE: loop exit
PB: predicated region body
PF: predicated region fallthrough
CT: control target
= control target key end

     0   :  { %s2990_s1 = inlined_call_operand.vmem [shape: bf16[1152,256], index: 1, kind: input, shape index: {}]   ;;  %s2991_s0 = inlined_call_operand.vmem [shape: bf16[16,1152], index: 0, kind: input, shape index: {}]   ;;  %s2992_s2 = inlined_call_operand.vmem [shape: f32[1,256], index: 2, kind: input, shape index: {}]   ;;  %s2993_s3 = inlined_call_operand.vmem [shape: f32[1,256], index: 3, kind: input, shape index: {}]   ;;  %s2994_s4 = inlined_call_operand.vmem [shape: f32[1,256], index: 4, kind: input, shape index: {}]   ;;  %s2995_s5 = inlined_call_operand.vmem [shape: bf16[16,256], index: 5, kind: output, shape index: {}]  }
   0x1   :  { %v1320_v0 = vld [vmem:[%s2990_s1 + $0x70] sm:$0xf]  ;;  %v1862_v1 = vld [vmem:[%s2990_s1 + $0x74] sm:$0xf0]  ;;  %v1312_v11 = vld [vmem:[%s2990_s1 + $0x60] sm:$0xf] }
   0x2   :  { %v1384_v2 = vld [vmem:[%s2990_s1 + $0xf0] sm:$0xf]  ;;  %v1321_v3 = vor.u32 %v1862_v1, %v1320_v0  ;;  %v1878_v4 = vld [vmem:[%s2990_s1 + $0xf4] sm:$0xf0]  ;;  %v1860_v13 = vld [vmem:[%s2990_s1 + $0x64] sm:$0xf0] }
   0x3   :  { %v1448_v5 = vld [vmem:[%s2990_s1 + $0x170] sm:$0xf]  ;;  %v1894_v6 = vld [vmem:[%s2990_s1 + $0x174] sm:$0xf0]  ;;  %v1385_v7 = vor.u32 %v1878_v4, %v1384_v2  ;;  %v1376_v14 = vld [vmem:[%s2990_s1 + $0xe0] sm:$0xf]  ;;  %v1313_v16 = vor.u32 %v1860_v13, %v1312_v11 }
   0x4   :  { %v1449_v8 = vor.u32 %v1894_v6, %v1448_v5  ;;  %v1512_v9 = vld [vmem:[%s2990_s1 + $0x1f0] sm:$0xf]  ;;  %v1910_v10 = vld [vmem:[%s2990_s1 + $0x1f4] sm:$0xf0]  ;;  %946 = vmatpush.bf16.msra.mxu0 %v1321_v3  ;;  %v1876_v15 = vld [vmem:[%s2990_s1 + $0xe4] sm:$0xf0] }
   0x5   :  { %v1513_v12 = vor.u32 %v1910_v10, %v1512_v9  ;;  %960 = vmatpush.bf16.msra.mxu1 %v1385_v7  ;;  %v1377_v17 = vor.u32 %v1876_v15, %v1376_v14  ;;  %v1440_v18 = vld [vmem:[%s2990_s1 + $0x160] sm:$0xf]  ;;  %v1892_v19 = vld [vmem:[%s2990_s1 + $0x164] sm:$0xf0]  ;;  %v1304_v23 = vld [vmem:[%s2990_s1 + $0x50] sm:$0xf] }
   0x6   :  { %974 = vmatpush.bf16.msra.mxu2 %v1449_v8  ;;  %v1504_v20 = vld [vmem:[%s2990_s1 + $0x1e0] sm:$0xf]  ;;  %v1441_v21 = vor.u32 %v1892_v19, %v1440_v18  ;;  %v1908_v22 = vld [vmem:[%s2990_s1 + $0x1e4] sm:$0xf0]  ;;  %v1858_v24 = vld [vmem:[%s2990_s1 + $0x54] sm:$0xf0] }
   0x7   :  { %988 = vmatpush.bf16.msra.mxu3 %v1513_v12  ;;  %v1505_v25 = vor.u32 %v1908_v22, %v1504_v20  ;;  %v1368_v26 = vld [vmem:[%s2990_s1 + $0xd0] sm:$0xf]  ;;  %v1874_v27 = vld [vmem:[%s2990_s1 + $0xd4] sm:$0xf0]  ;;  %v1305_v29 = vor.u32 %v1858_v24, %v1304_v23  ;;  %v1296_v35 = vld [vmem:[%s2990_s1 + $0x40] sm:$0xf] }
   0x8   :  { %v1432_v28 = vld [vmem:[%s2990_s1 + $0x150] sm:$0xf]  ;;  %947 = vmatpush.bf16.msra.mxu0 %v1313_v16  ;;  %v1890_v30 = vld [vmem:[%s2990_s1 + $0x154] sm:$0xf0]  ;;  %v1369_v33 = vor.u32 %v1874_v27, %v1368_v26  ;;  %v1856_v36 = vld [vmem:[%s2990_s1 + $0x44] sm:$0xf0] }
   0x9   :  { %v1496_v31 = vld [vmem:[%s2990_s1 + $0x1d0] sm:$0xf]  ;;  %v1906_v32 = vld [vmem:[%s2990_s1 + $0x1d4] sm:$0xf0]  ;;  %961 = vmatpush.bf16.msra.mxu1 %v1377_v17  ;;  %v1433_v34 = vor.u32 %v1890_v30, %v1432_v28  ;;  %v1360_v37 = vld [vmem:[%s2990_s1 + $0xc0] sm:$0xf]  ;;  %v1297_v44 = vor.u32 %v1856_v36, %v1296_v35 }
   0xa   :  { %975 = vmatpush.bf16.msra.mxu2 %v1441_v21  ;;  %v1497_v38 = vor.u32 %v1906_v32, %v1496_v31  ;;  %v1872_v39 = vld [vmem:[%s2990_s1 + $0xc4] sm:$0xf0]  ;;  %v1424_v40 = vld [vmem:[%s2990_s1 + $0x140] sm:$0xf]  ;;  %v1288_v47 = vld [vmem:[%s2990_s1 + $0x30] sm:$0xf] }
   0xb   :  { %989 = vmatpush.bf16.msra.mxu3 %v1505_v25  ;;  %v1888_v41 = vld [vmem:[%s2990_s1 + $0x144] sm:$0xf0]  ;;  %v1488_v42 = vld [vmem:[%s2990_s1 + $0x1c0] sm:$0xf]  ;;  %v1361_v45 = vor.u32 %v1872_v39, %v1360_v37  ;;  %v1854_v48 = vld [vmem:[%s2990_s1 + $0x34] sm:$0xf0] }
   0xc   :  { %v1904_v43 = vld [vmem:[%s2990_s1 + $0x1c4] sm:$0xf0]  ;;  %948 = vmatpush.bf16.msra.mxu0 %v1305_v29  ;;  %v1425_v46 = vor.u32 %v1888_v41, %v1424_v40  ;;  %v1352_v49 = vld [vmem:[%s2990_s1 + $0xb0] sm:$0xf]  ;;  %v1870_v51 = vld [vmem:[%s2990_s1 + $0xb4] sm:$0xf0]  ;;  %v1289_v56 = vor.u32 %v1854_v48, %v1288_v47 }
   0xd   :  { %962 = vmatpush.bf16.msra.mxu1 %v1369_v33  ;;  %v1489_v50 = vor.u32 %v1904_v43, %v1488_v42  ;;  %v1416_v52 = vld [vmem:[%s2990_s1 + $0x130] sm:$0xf]  ;;  %v1886_v53 = vld [vmem:[%s2990_s1 + $0x134] sm:$0xf0]  ;;  %v1353_v57 = vor.u32 %v1870_v51, %v1352_v49  ;;  %v1280_v59 = vld [vmem:[%s2990_s1 + $0x20] sm:$0xf] }
   0xe   :  { %976 = vmatpush.bf16.msra.mxu2 %v1433_v34  ;;  %v1480_v54 = vld [vmem:[%s2990_s1 + $0x1b0] sm:$0xf]  ;;  %v1902_v55 = vld [vmem:[%s2990_s1 + $0x1b4] sm:$0xf0]  ;;  %v1417_v58 = vor.u32 %v1886_v53, %v1416_v52  ;;  %v1852_v60 = vld [vmem:[%s2990_s1 + $0x24] sm:$0xf0] }
   0xf   :  { %990 = vmatpush.bf16.msra.mxu3 %v1497_v38  ;;  %v1344_v61 = vld [vmem:[%s2990_s1 + $0xa0] sm:$0xf]  ;;  %v1481_v62 = vor.u32 %v1902_v55, %v1480_v54  ;;  %v1868_v63 = vld [vmem:[%s2990_s1 + $0xa4] sm:$0xf0]  ;;  %v1281_v4 = vor.u32 %v1852_v60, %v1280_v59  ;;  %v1272_v7 = vld [vmem:[%s2990_s1 + $0x10] sm:$0xf] }
  0x10   :  { %949 = vmatpush.bf16.msra.mxu0 %v1297_v44  ;;  %v1408_v0 = vld [vmem:[%s2990_s1 + $0x120] sm:$0xf]  ;;  %v1884_v1 = vld [vmem:[%s2990_s1 + $0x124] sm:$0xf0]  ;;  %v1345_v5 = vor.u32 %v1868_v63, %v1344_v61  ;;  %v1850_v8 = vld [vmem:[%s2990_s1 + $0x14] sm:$0xf0] }
  0x11   :  { %963 = vmatpush.bf16.msra.mxu1 %v1361_v45  ;;  %v1472_v2 = vld [vmem:[%s2990_s1 + $0x1a0] sm:$0xf]  ;;  %v1900_v3 = vld [vmem:[%s2990_s1 + $0x1a4] sm:$0xf0]  ;;  %v1409_v6 = vor.u32 %v1884_v1, %v1408_v0  ;;  %v1336_v9 = vld [vmem:[%s2990_s1 + $0x90] sm:$0xf]  ;;  %v1273_v16 = vor.u32 %v1850_v8, %v1272_v7 }
  0x12   :  { %977 = vmatpush.bf16.msra.mxu2 %v1425_v46  ;;  %v1473_v10 = vor.u32 %v1900_v3, %v1472_v2  ;;  %v1866_v11 = vld [vmem:[%s2990_s1 + $0x94] sm:$0xf0]  ;;  %v1400_v12 = vld [vmem:[%s2990_s1 + $0x110] sm:$0xf]  ;;  %v1264_v17 = vld [vmem:[%s2990_s1] sm:$0xf] }
  0x13   :  { %991 = vmatpush.bf16.msra.mxu3 %v1489_v50  ;;  %v1882_v13 = vld [vmem:[%s2990_s1 + $0x114] sm:$0xf0]  ;;  %v1464_v14 = vld [vmem:[%s2990_s1 + $0x190] sm:$0xf]  ;;  %v1848_v18 = vld [vmem:[%s2990_s1 + $0x4] sm:$0xf0]  ;;  %v1337_v19 = vor.u32 %v1866_v11, %v1336_v9 }
  0x14   :  { %950 = vmatpush.bf16.msra.mxu0 %v1289_v56  ;;  %v1898_v15 = vld [vmem:[%s2990_s1 + $0x194] sm:$0xf0]  ;;  %v1401_v20 = vor.u32 %v1882_v13, %v1400_v12  ;;  %v1328_v21 = vld [vmem:[%s2990_s1 + $0x80] sm:$0xf]  ;;  %v1864_v22 = vld [vmem:[%s2990_s1 + $0x84] sm:$0xf0]  ;;  %v1265_v31 = vor.u32 %v1848_v18, %v1264_v17 }
  0x15   :  { %964 = vmatpush.bf16.msra.mxu1 %v1353_v57  ;;  %v1392_v23 = vld [vmem:[%s2990_s1 + $0x100] sm:$0xf]  ;;  %v1465_v24 = vor.u32 %v1898_v15, %v1464_v14  ;;  %v1880_v25 = vld [vmem:[%s2990_s1 + $0x104] sm:$0xf0]  ;;  %v1576_v26 = vld [vmem:[%s2990_s1 + $0x270] sm:$0xf]  ;;  %v1329_v35 = vor.u32 %v1864_v22, %v1328_v21 }
  0x16   :  { %978 = vmatpush.bf16.msra.mxu2 %v1417_v58  ;;  %v1926_v27 = vld [vmem:[%s2990_s1 + $0x274] sm:$0xf0]  ;;  %v1640_v28 = vld [vmem:[%s2990_s1 + $0x2f0] sm:$0xf]  ;;  %v1456_v33 = vld [vmem:[%s2990_s1 + $0x180] sm:$0xf]  ;;  %v1393_v36 = vor.u32 %v1880_v25, %v1392_v23 }
  0x17   :  { %992 = vmatpush.bf16.msra.mxu3 %v1481_v62  ;;  %v1942_v29 = vld [vmem:[%s2990_s1 + $0x2f4] sm:$0xf0]  ;;  %v1704_v30 = vld [vmem:[%s2990_s1 + $0x370] sm:$0xf]  ;;  %v1896_v34 = vld [vmem:[%s2990_s1 + $0x184] sm:$0xf0]  ;;  %v1577_v39 = vor.u32 %v1926_v27, %v1576_v26 }
  0x18   :  { %951 = vmatpush.bf16.msra.mxu0 %v1281_v4  ;;  %v1958_v32 = vld [vmem:[%s2990_s1 + $0x374] sm:$0xf0]  ;;  %v1768_v37 = vld [vmem:[%s2990_s1 + $0x3f0] sm:$0xf]  ;;  %v1641_v40 = vor.u32 %v1942_v29, %v1640_v28  ;;  %v1568_v41 = vld [vmem:[%s2990_s1 + $0x260] sm:$0xf]  ;;  %v1457_v44 = vor.u32 %v1896_v34, %v1456_v33 }
  0x19   :  { %965 = vmatpush.bf16.msra.mxu1 %v1345_v5  ;;  %v1974_v38 = vld [vmem:[%s2990_s1 + $0x3f4] sm:$0xf0]  ;;  %v1924_v42 = vld [vmem:[%s2990_s1 + $0x264] sm:$0xf0]  ;;  %v1705_v43 = vor.u32 %v1958_v32, %v1704_v30  ;;  %v1632_v45 = vld [vmem:[%s2990_s1 + $0x2e0] sm:$0xf] }
  0x1a   :  { %979 = vmatpush.bf16.msra.mxu2 %v1409_v6  ;;  %v1940_v46 = vld [vmem:[%s2990_s1 + $0x2e4] sm:$0xf0]  ;;  %v1696_v47 = vld [vmem:[%s2990_s1 + $0x360] sm:$0xf]  ;;  %v1769_v48 = vor.u32 %v1974_v38, %v1768_v37  ;;  %v1560_v52 = vld [vmem:[%s2990_s1 + $0x250] sm:$0xf]  ;;  %v1569_v56 = vor.u32 %v1924_v42, %v1568_v41 }
  0x1b   :  { %993 = vmatpush.bf16.msra.mxu3 %v1473_v10  ;;  %v1956_v49 = vld [vmem:[%s2990_s1 + $0x364] sm:$0xf0]  ;;  %v1760_v50 = vld [vmem:[%s2990_s1 + $0x3e0] sm:$0xf]  ;;  %v1842_v54 = vld [vmem:[%s2991_s0 + $0x20] sm:$0xf0]  ;;  %v1633_v57 = vor.u32 %v1940_v46, %v1632_v45 }
  0x1c   :  { %952 = vmatpush.bf16.msra.mxu0 %v1273_v16  ;;  %v1972_v51 = vld [vmem:[%s2990_s1 + $0x3e4] sm:$0xf0]  ;;  %v1228_v53 = vld [vmem:[%s2991_s0] sm:$0xf]  ;;  %v1922_v58 = vld [vmem:[%s2990_s1 + $0x254] sm:$0xf0]  ;;  %v1697_v62 = vor.u32 %v1956_v49, %v1696_v47 }
  0x1d   :  { %966 = vmatpush.bf16.msra.mxu1 %v1337_v19  ;;  %v1236_v55 = vld [vmem:[%s2991_s0 + $0x8] sm:$0xf]  ;;  %v1624_v59 = vld [vmem:[%s2990_s1 + $0x2d0] sm:$0xf]  ;;  %v2279_v60 = vor.u32 %v1842_v54, %v1228_v53  ;;  %v1843_v61 = vld [vmem:[%s2991_s0 + $0x28] sm:$0xf0]  ;;  %v1761_v3 = vor.u32 %v1972_v51, %v1760_v50  ;;  %v1561_v11 = vor.u32 %v1922_v58, %v1560_v52 }
  0x1e   :  { %980 = vmatpush.bf16.msra.mxu2 %v1401_v20  ;;  %v1938_v63 = vld [vmem:[%s2990_s1 + $0x2d4] sm:$0xf0]  ;;  %v1688_v0 = vld [vmem:[%s2990_s1 + $0x350] sm:$0xf]  ;;  %v2293_v2 = vor.u32 %v1843_v61, %v1236_v55  ;;  %v1838_v5 = vld [vmem:[%s2991_s0 + $0x4] sm:$0xf] }
  0x1f   :  { %994 = vmatpush.bf16.msra.mxu3 %v1465_v24  ;;  %v1954_v1 = vld [vmem:[%s2990_s1 + $0x354] sm:$0xf0]  ;;  %v1752_v4 = vld [vmem:[%s2990_s1 + $0x3d0] sm:$0xf]  ;;  %v1230_v6 = vld [vmem:[%s2991_s0 + $0x24] sm:$0xf0]  ;;  %v1625_v12 = vor.u32 %v1938_v63, %v1624_v59 }
  0x20   :  { %953 = vmatpush.bf16.msra.mxu0 %v1265_v31  ;;  %v1970_v7 = vld [vmem:[%s2990_s1 + $0x3d4] sm:$0xf0]  ;;  %v2309_v8 = vor.u32 %v1838_v5, %v1230_v6  ;;  %v1839_v9 = vld [vmem:[%s2991_s0 + $0xc] sm:$0xf]  ;;  %v1238_v10 = vld [vmem:[%s2991_s0 + $0x2c] sm:$0xf0]  ;;  %v1689_v15 = vor.u32 %v1954_v1, %v1688_v0 }
  0x21   :  { %967 = vmatpush.bf16.msra.mxu1 %v1329_v35  ;;  %v1552_v13 = vld [vmem:[%s2990_s1 + $0x240] sm:$0xf]  ;;  %v2320_v14 = vor.u32 %v1839_v9, %v1238_v10  ;;  %v1920_v16 = vld [vmem:[%s2990_s1 + $0x244] sm:$0xf0]  ;;  %v1753_v19 = vor.u32 %v1970_v7, %v1752_v4  ;;  %v1544_v26 = vld [vmem:[%s2990_s1 + $0x230] sm:$0xf] }
  0x22   :  { %981 = vmatpush.bf16.msra.mxu2 %v1393_v36  ;;  %v1616_v17 = vld [vmem:[%s2990_s1 + $0x2c0] sm:$0xf]  ;;  %v1936_v18 = vld [vmem:[%s2990_s1 + $0x2c4] sm:$0xf0]  ;;  %v1553_v24 = vor.u32 %v1920_v16, %v1552_v13  ;;  %v1918_v28 = vld [vmem:[%s2990_s1 + $0x234] sm:$0xf0] }
  0x23   :  { %995 = vmatpush.bf16.msra.mxu3 %v1457_v44  ;;  %954 = vmatmul.bf16.vlgmr.msra.gmra.mxu0 %v2279_v60  ;;  %v1680_v20 = vld [vmem:[%s2990_s1 + $0x340] sm:$0xf]  ;;  %v1952_v21 = vld [vmem:[%s2990_s1 + $0x344] sm:$0xf0]  ;;  %v1617_v25 = vor.u32 %v1936_v18, %v1616_v17  ;;  %v1608_v29 = vld [vmem:[%s2990_s1 + $0x2b0] sm:$0xf]  ;;  %v1545_v36 = vor.u32 %v1918_v28, %v1544_v26 }
  0x24   :  { %1002 = vmatpush.bf16.msrb.mxu0 %v1577_v39  ;;  %968 = vmatmul.bf16.vlgmr.msra.gmra.mxu1 %v2309_v8  ;;  %v1744_v22 = vld [vmem:[%s2990_s1 + $0x3c0] sm:$0xf]  ;;  %v1968_v23 = vld [vmem:[%s2990_s1 + $0x3c4] sm:$0xf0]  ;;  %v1681_v27 = vor.u32 %v1952_v21, %v1680_v20  ;;  %v1934_v30 = vld [vmem:[%s2990_s1 + $0x2b4] sm:$0xf0] }
  0x25   :  { %1016 = vmatpush.bf16.msrb.mxu1 %v1641_v40  ;;  %982 = vmatmul.bf16.vlgmr.msra.gmra.mxu2 %v2293_v2  ;;  %v1745_v31 = vor.u32 %v1968_v23, %v1744_v22  ;;  %v1672_v32 = vld [vmem:[%s2990_s1 + $0x330] sm:$0xf]  ;;  %v1950_v33 = vld [vmem:[%s2990_s1 + $0x334] sm:$0xf0]  ;;  %v1609_v37 = vor.u32 %v1934_v30, %v1608_v29  ;;  %v1536_v38 = vld [vmem:[%s2990_s1 + $0x220] sm:$0xf] }
  0x26   :  { %1030 = vmatpush.bf16.msrb.mxu2 %v1705_v43  ;;  %996 = vmatmul.bf16.vlgmr.msra.gmra.mxu3 %v2320_v14  ;;  %v1736_v34 = vld [vmem:[%s2990_s1 + $0x3b0] sm:$0xf]  ;;  %v1966_v35 = vld [vmem:[%s2990_s1 + $0x3b4] sm:$0xf0]  ;;  %v1673_v39 = vor.u32 %v1950_v33, %v1672_v32  ;;  %v1916_v40 = vld [vmem:[%s2990_s1 + $0x224] sm:$0xf0] }
  0x27   :  { %1044 = vmatpush.bf16.msrb.mxu3 %v1769_v48  ;;  %v1600_v41 = vld [vmem:[%s2990_s1 + $0x2a0] sm:$0xf]  ;;  %v1932_v42 = vld [vmem:[%s2990_s1 + $0x2a4] sm:$0xf0]  ;;  %v1737_v43 = vor.u32 %v1966_v35, %v1736_v34  ;;  %v1537_v48 = vor.u32 %v1916_v40, %v1536_v38  ;;  %v1528_v50 = vld [vmem:[%s2990_s1 + $0x210] sm:$0xf] }
  0x28   :  { %1003 = vmatpush.bf16.msrb.mxu0 %v1569_v56  ;;  %v1664_v44 = vld [vmem:[%s2990_s1 + $0x320] sm:$0xf]  ;;  %v1948_v45 = vld [vmem:[%s2990_s1 + $0x324] sm:$0xf0]  ;;  %v1601_v49 = vor.u32 %v1932_v42, %v1600_v41  ;;  %v1914_v51 = vld [vmem:[%s2990_s1 + $0x214] sm:$0xf0] }
  0x29   :  { %1017 = vmatpush.bf16.msrb.mxu1 %v1633_v57  ;;  %v1728_v46 = vld [vmem:[%s2990_s1 + $0x3a0] sm:$0xf]  ;;  %v1964_v47 = vld [vmem:[%s2990_s1 + $0x3a4] sm:$0xf0]  ;;  %v1665_v52 = vor.u32 %v1948_v45, %v1664_v44  ;;  %v1592_v53 = vld [vmem:[%s2990_s1 + $0x290] sm:$0xf]  ;;  %v1529_v1 = vor.u32 %v1914_v51, %v1528_v50 }
  0x2a   :  { %1031 = vmatpush.bf16.msrb.mxu2 %v1697_v62  ;;  %v1930_v54 = vld [vmem:[%s2990_s1 + $0x294] sm:$0xf0]  ;;  %v1656_v55 = vld [vmem:[%s2990_s1 + $0x310] sm:$0xf]  ;;  %v1729_v56 = vor.u32 %v1964_v47, %v1728_v46  ;;  %v1520_v61 = vld [vmem:[%s2990_s1 + $0x200] sm:$0xf] }
  0x2b   :  { %1045 = vmatpush.bf16.msrb.mxu3 %v1761_v3  ;;  %v1946_v57 = vld [vmem:[%s2990_s1 + $0x314] sm:$0xf0]  ;;  %v1720_v58 = vld [vmem:[%s2990_s1 + $0x390] sm:$0xf]  ;;  %v1912_v62 = vld [vmem:[%s2990_s1 + $0x204] sm:$0xf0]  ;;  %v1593_v3 = vor.u32 %v1930_v54, %v1592_v53 }
  0x2c   :  { %1004 = vmatpush.bf16.msrb.mxu0 %v1561_v11  ;;  %v1962_v59 = vld [vmem:[%s2990_s1 + $0x394] sm:$0xf0]  ;;  %v1584_v63 = vld [vmem:[%s2990_s1 + $0x280] sm:$0xf]  ;;  %v1928_v0 = vld [vmem:[%s2990_s1 + $0x284] sm:$0xf0]  ;;  %v1657_v7 = vor.u32 %v1946_v57, %v1656_v55  ;;  %v1521_v20 = vor.u32 %v1912_v62, %v1520_v61 }
  0x2d   :  { %1018 = vmatpush.bf16.msrb.mxu1 %v1625_v12  ;;  %v1648_v4 = vld [vmem:[%s2990_s1 + $0x300] sm:$0xf]  ;;  %v1944_v5 = vld [vmem:[%s2990_s1 + $0x304] sm:$0xf0]  ;;  %v1832_v6 = vld [vmem:[%s2990_s1 + $0x470] sm:$0xf]  ;;  %v1721_v12 = vor.u32 %v1962_v59, %v1720_v58  ;;  %v1585_v21 = vor.u32 %v1928_v0, %v1584_v63 }
  0x2e   :  { %1032 = vmatpush.bf16.msrb.mxu2 %v1689_v15  ;;  %v1990_v9 = vld [vmem:[%s2990_s1 + $0x474] sm:$0xf0]  ;;  %v1861_v10 = vld [vmem:[%s2990_s1 + $0x74] sm:$0xf]  ;;  %v1322_v11 = vld [vmem:[%s2990_s1 + $0x78] sm:$0xf0] }
  0x2f   :  { %1046 = vmatpush.bf16.msrb.mxu3 %v1753_v19  ;;  %v1877_v13 = vld [vmem:[%s2990_s1 + $0xf4] sm:$0xf]  ;;  %v1386_v15 = vld [vmem:[%s2990_s1 + $0xf8] sm:$0xf0]  ;;  %v1712_v16 = vld [vmem:[%s2990_s1 + $0x380] sm:$0xf]  ;;  %v1833_v26 = vor.u32 %v1990_v9, %v1832_v6  ;;  %v1325_v30 = vor.u32 %v1861_v10, %v1322_v11 }
  0x30   :  { %1005 = vmatpush.bf16.msrb.mxu0 %v1553_v24  ;;  %v1960_v17 = vld [vmem:[%s2990_s1 + $0x384] sm:$0xf0]  ;;  %v1244_v18 = vld [vmem:[%s2991_s0 + $0x10] sm:$0xf]  ;;  %v1844_v19 = vld [vmem:[%s2991_s0 + $0x30] sm:$0xf0] }
  0x31   :  { %1019 = vmatpush.bf16.msrb.mxu1 %v1617_v25  ;;  %v1252_v22 = vld [vmem:[%s2991_s0 + $0x18] sm:$0xf]  ;;  %v1845_v23 = vld [vmem:[%s2991_s0 + $0x38] sm:$0xf0]  ;;  %v1893_v24 = vld [vmem:[%s2990_s1 + $0x174] sm:$0xf]  ;;  %v1649_v25 = vor.u32 %v1944_v5, %v1648_v4  ;;  %v1713_v35 = vor.u32 %v1960_v17, %v1712_v16 }
  0x32   :  { %1033 = vmatpush.bf16.msrb.mxu2 %v1681_v27  ;;  %v1450_v27 = vld [vmem:[%s2990_s1 + $0x178] sm:$0xf0]  ;;  %v1840_v28 = vld [vmem:[%s2991_s0 + $0x14] sm:$0xf]  ;;  %v1246_v29 = vld [vmem:[%s2991_s0 + $0x34] sm:$0xf0]  ;;  %v2503_v40 = vor.u32 %v1845_v23, %v1252_v22 }
  0x33   :  { %1047 = vmatpush.bf16.msrb.mxu3 %v1745_v31  ;;  %v1389_v31 = vor.u32 %v1877_v13, %v1386_v15  ;;  %v1841_v32 = vld [vmem:[%s2991_s0 + $0x1c] sm:$0xf]  ;;  %v1824_v33 = vld [vmem:[%s2990_s1 + $0x460] sm:$0xf]  ;;  %v1988_v34 = vld [vmem:[%s2990_s1 + $0x464] sm:$0xf0]  ;;  %v1453_v41 = vor.u32 %v1893_v24, %v1450_v27  ;;  %v2511_v44 = vor.u32 %v1840_v28, %v1246_v29 }
  0x34   :  { %1006 = vmatpush.bf16.msrb.mxu0 %v1545_v36  ;;  %v2492_v36 = vor.u32 %v1844_v19, %v1244_v18  ;;  %v1859_v38 = vld [vmem:[%s2990_s1 + $0x64] sm:$0xf]  ;;  %v1825_v45 = vor.u32 %v1988_v34, %v1824_v33  ;;  %v1442_v47 = vld [vmem:[%s2990_s1 + $0x168] sm:$0xf0]  ;;  %v1816_v50 = vld [vmem:[%s2990_s1 + $0x450] sm:$0xf] }
  0x35   :  { %1020 = vmatpush.bf16.msrb.mxu1 %v1609_v37  ;;  %v1254_v37 = vld [vmem:[%s2991_s0 + $0x3c] sm:$0xf0]  ;;  %v1875_v42 = vld [vmem:[%s2990_s1 + $0xe4] sm:$0xf]  ;;  %v1986_v51 = vld [vmem:[%s2990_s1 + $0x454] sm:$0xf0] }
  0x36   :  { %1034 = vmatpush.bf16.msrb.mxu2 %v1673_v39  ;;  %v1314_v39 = vld [vmem:[%s2990_s1 + $0x68] sm:$0xf0]  ;;  %v1891_v46 = vld [vmem:[%s2990_s1 + $0x164] sm:$0xf]  ;;  %v1857_v53 = vld [vmem:[%s2990_s1 + $0x54] sm:$0xf]  ;;  %v1817_v58 = vor.u32 %v1986_v51, %v1816_v50 }
  0x37   :  { %1048 = vmatpush.bf16.msrb.mxu3 %v1737_v43  ;;  %v1378_v43 = vld [vmem:[%s2990_s1 + $0xe8] sm:$0xf0]  ;;  %v1306_v54 = vld [vmem:[%s2990_s1 + $0x58] sm:$0xf0]  ;;  %v1445_v55 = vor.u32 %v1891_v46, %v1442_v47  ;;  %v1889_v59 = vld [vmem:[%s2990_s1 + $0x154] sm:$0xf] }
  0x38   :  { %1007 = vmatpush.bf16.msrb.mxu0 %v1537_v48  ;;  %v2519_v48 = vor.u32 %v1841_v32, %v1254_v37  ;;  %v1370_v57 = vld [vmem:[%s2990_s1 + $0xd8] sm:$0xf0]  ;;  %v1309_v62 = vor.u32 %v1857_v53, %v1306_v54  ;;  %v1808_v63 = vld [vmem:[%s2990_s1 + $0x440] sm:$0xf]  ;;  %v1984_v0 = vld [vmem:[%s2990_s1 + $0x444] sm:$0xf0] }
  0x39   :  { %1021 = vmatpush.bf16.msrb.mxu1 %v1601_v49  ;;  %v1317_v49 = vor.u32 %v1859_v38, %v1314_v39  ;;  %v1434_v61 = vld [vmem:[%s2990_s1 + $0x158] sm:$0xf0]  ;;  %v1298_v4 = vld [vmem:[%s2990_s1 + $0x48] sm:$0xf0]  ;;  %v1871_v6 = vld [vmem:[%s2990_s1 + $0xc4] sm:$0xf]  ;;  %v1809_v9 = vor.u32 %v1984_v0, %v1808_v63 }
  0x3a   :  { %1035 = vmatpush.bf16.msrb.mxu2 %v1665_v52  ;;  %v1381_v52 = vor.u32 %v1875_v42, %v1378_v43  ;;  %v1437_v5 = vor.u32 %v1889_v59, %v1434_v61  ;;  %v1887_v10 = vld [vmem:[%s2990_s1 + $0x144] sm:$0xf]  ;;  %v1426_v11 = vld [vmem:[%s2990_s1 + $0x148] sm:$0xf0]  ;;  %v1800_v13 = vld [vmem:[%s2990_s1 + $0x430] sm:$0xf] }
  0x3b   :  { %1049 = vmatpush.bf16.msrb.mxu3 %v1729_v56  ;;  %v1873_v56 = vld [vmem:[%s2990_s1 + $0xd4] sm:$0xf]  ;;  %v1982_v15 = vld [vmem:[%s2990_s1 + $0x434] sm:$0xf0]  ;;  %v1290_v18 = vld [vmem:[%s2990_s1 + $0x38] sm:$0xf0]  ;;  %v1429_v19 = vor.u32 %v1887_v10, %v1426_v11 }
  0x3c   :  { %1008 = vmatpush.bf16.msrb.mxu0 %v1529_v1  ;;  %v1373_v1 = vor.u32 %v1873_v56, %v1370_v57  ;;  %v1853_v17 = vld [vmem:[%s2990_s1 + $0x34] sm:$0xf]  ;;  %v1801_v22 = vor.u32 %v1982_v15, %v1800_v13  ;;  %v1418_v24 = vld [vmem:[%s2990_s1 + $0x138] sm:$0xf0]  ;;  %v1980_v27 = vld [vmem:[%s2990_s1 + $0x424] sm:$0xf0] }
  0x3d   :  { %1022 = vmatpush.bf16.msrb.mxu1 %v1593_v3  ;;  %v1855_v3 = vld [vmem:[%s2990_s1 + $0x44] sm:$0xf]  ;;  %v1885_v23 = vld [vmem:[%s2990_s1 + $0x134] sm:$0xf]  ;;  %v1346_v33 = vld [vmem:[%s2990_s1 + $0xa8] sm:$0xf0] }
  0x3e   :  { %1036 = vmatpush.bf16.msrb.mxu2 %v1657_v7  ;;  %v1362_v7 = vld [vmem:[%s2990_s1 + $0xc8] sm:$0xf0]  ;;  %v1851_v29 = vld [vmem:[%s2990_s1 + $0x24] sm:$0xf]  ;;  %v1784_v39 = vld [vmem:[%s2990_s1 + $0x410] sm:$0xf] }
  0x3f   :  { %1050 = vmatpush.bf16.msrb.mxu3 %v1721_v12  ;;  %v1301_v12 = vor.u32 %v1855_v3, %v1298_v4  ;;  %v1365_v16 = vor.u32 %v1871_v6, %v1362_v7  ;;  %v1867_v32 = vld [vmem:[%s2990_s1 + $0xa4] sm:$0xf]  ;;  %v1410_v37 = vld [vmem:[%s2990_s1 + $0x128] sm:$0xf0]  ;;  %v1849_v43 = vld [vmem:[%s2990_s1 + $0x14] sm:$0xf] }
  0x40   :  { %1009 = vmatpush.bf16.msrb.mxu0 %v1521_v20  ;;  %v1869_v20 = vld [vmem:[%s2990_s1 + $0xb4] sm:$0xf]  ;;  %v1349_v42 = vor.u32 %v1867_v32, %v1346_v33  ;;  %v1402_v51 = vld [vmem:[%s2990_s1 + $0x118] sm:$0xf0]  ;;  %v1776_v53 = vld [vmem:[%s2990_s1 + $0x400] sm:$0xf] }
  0x41   :  { %1023 = vmatpush.bf16.msrb.mxu1 %v1585_v21  ;;  %v1354_v21 = vld [vmem:[%s2990_s1 + $0xb8] sm:$0xf0]  ;;  %v1865_v46 = vld [vmem:[%s2990_s1 + $0x94] sm:$0xf]  ;;  %v1976_v54 = vld [vmem:[%s2990_s1 + $0x404] sm:$0xf0] }
  0x42   :  { %1037 = vmatpush.bf16.msrb.mxu2 %v1649_v25  ;;  %v1293_v25 = vor.u32 %v1853_v17, %v1290_v18  ;;  %v1357_v28 = vor.u32 %v1869_v20, %v1354_v21  ;;  %v1881_v50 = vld [vmem:[%s2990_s1 + $0x114] sm:$0xf]  ;;  %v1266_v57 = vld [vmem:[%s2990_s1 + $0x8] sm:$0xf0]  ;;  %v1514_v63 = vld [vmem:[%s2990_s1 + $0x1f8] sm:$0xf0]  ;;  %v1777_v6 = vor.u32 %v1976_v54, %v1776_v53 }
  0x43   :  { %1051 = vmatpush.bf16.msrb.mxu3 %v1713_v35  ;;  %1010 = vmatmul.bf16.vlgmr.msrb.gmra.mxu0 %v2492_v36  ;;  %v1883_v35 = vld [vmem:[%s2990_s1 + $0x124] sm:$0xf]  ;;  %v1330_v59 = vld [vmem:[%s2990_s1 + $0x88] sm:$0xf0]  ;;  %v1925_v0 = vld [vmem:[%s2990_s1 + $0x274] sm:$0xf] }
  0x44   :  { %1058 = vmatpush.bf16.msra.mxu0 %v1833_v26  ;;  %1024 = vmatmul.bf16.vlgmr.msrb.gmra.mxu1 %v2511_v44  ;;  %v1792_v26 = vld [vmem:[%s2990_s1 + $0x420] sm:$0xf]  ;;  %v1413_v47 = vor.u32 %v1883_v35, %v1410_v37  ;;  %v1578_v3 = vld [vmem:[%s2990_s1 + $0x278] sm:$0xf0]  ;;  %v1941_v4 = vld [vmem:[%s2990_s1 + $0x2f4] sm:$0xf] }
  0x45   :  { %1072 = vmatpush.bf16.msra.mxu1 %v1325_v30  ;;  %1038 = vmatmul.bf16.vlgmr.msrb.gmra.mxu2 %v2503_v40  ;;  %v1282_v30 = vld [vmem:[%s2990_s1 + $0x28] sm:$0xf0]  ;;  %v1793_v34 = vor.u32 %v1980_v27, %v1792_v26  ;;  %v1879_v7 = vld [vmem:[%s2990_s1 + $0x104] sm:$0xf]  ;;  %v1260_v10 = vld [vmem:[%s2991_s0 + $0x20] sm:$0xf]  ;;  %v1581_v18 = vor.u32 %v1925_v0, %v1578_v3 }
  0x46   :  { %1086 = vmatpush.bf16.msra.mxu2 %v1389_v31  ;;  %1052 = vmatmul.bf16.vlgmr.msrb.gmra.mxu3 %v2519_v48  ;;  %v1421_v31 = vor.u32 %v1885_v23, %v1418_v24  ;;  %v1285_v38 = vor.u32 %v1851_v29, %v1282_v30  ;;  %v1846_v13 = vld [vmem:[%s2991_s0 + $0x40] sm:$0xf0]  ;;  %v1957_v15 = vld [vmem:[%s2990_s1 + $0x374] sm:$0xf]  ;;  %v1506_v20 = vld [vmem:[%s2990_s1 + $0x1e8] sm:$0xf0] }
  0x47   :  { %1100 = vmatpush.bf16.msra.mxu3 %v1453_v41  ;;  %v1978_v41 = vld [vmem:[%s2990_s1 + $0x414] sm:$0xf0]  ;;  %v1923_v23 = vld [vmem:[%s2990_s1 + $0x264] sm:$0xf]  ;;  %v1570_v24 = vld [vmem:[%s2990_s1 + $0x268] sm:$0xf0] }
  0x48   :  { %1059 = vmatpush.bf16.msra.mxu0 %v1825_v45  ;;  %v1274_v45 = vld [vmem:[%s2990_s1 + $0x18] sm:$0xf0]  ;;  %v1939_v27 = vld [vmem:[%s2990_s1 + $0x2e4] sm:$0xf]  ;;  %v1573_v32 = vor.u32 %v1923_v23, %v1570_v24  ;;  %v1905_v33 = vld [vmem:[%s2990_s1 + $0x1d4] sm:$0xf] }
  0x49   :  { %1073 = vmatpush.bf16.msra.mxu1 %v1317_v49  ;;  %v1338_v49 = vld [vmem:[%s2990_s1 + $0x98] sm:$0xf0]  ;;  %v1277_v56 = vor.u32 %v1849_v43, %v1274_v45  ;;  %v1955_v30 = vld [vmem:[%s2990_s1 + $0x364] sm:$0xf]  ;;  %v1921_v37 = vld [vmem:[%s2990_s1 + $0x254] sm:$0xf] }
  0x4a   :  { %1087 = vmatpush.bf16.msra.mxu2 %v1381_v52  ;;  %v1785_v52 = vor.u32 %v1978_v41, %v1784_v39  ;;  %v1341_v61 = vor.u32 %v1865_v46, %v1338_v49  ;;  %v1937_v41 = vld [vmem:[%s2990_s1 + $0x2d4] sm:$0xf]  ;;  %v1690_v46 = vld [vmem:[%s2990_s1 + $0x358] sm:$0xf0]  ;;  %v1903_v49 = vld [vmem:[%s2990_s1 + $0x1c4] sm:$0xf] }
  0x4b   :  { %1101 = vmatpush.bf16.msra.mxu3 %v1445_v55  ;;  %v1847_v55 = vld [vmem:[%s2990_s1 + $0x4] sm:$0xf]  ;;  %v1953_v45 = vld [vmem:[%s2990_s1 + $0x354] sm:$0xf]  ;;  %v1610_v3 = vld [vmem:[%s2990_s1 + $0x2b8] sm:$0xf0] }
  0x4c   :  { %1060 = vmatpush.bf16.msra.mxu0 %v1817_v58  ;;  %v1863_v58 = vld [vmem:[%s2990_s1 + $0x84] sm:$0xf]  ;;  %v1269_v11 = vor.u32 %v1847_v55, %v1266_v57  ;;  %v1693_v53 = vor.u32 %v1953_v45, %v1690_v46  ;;  %v1466_v23 = vld [vmem:[%s2990_s1 + $0x198] sm:$0xf0] }
  0x4d   :  { %1074 = vmatpush.bf16.msra.mxu1 %v1309_v62  ;;  %v1909_v62 = vld [vmem:[%s2990_s1 + $0x1f4] sm:$0xf]  ;;  %v1333_v17 = vor.u32 %v1863_v58, %v1330_v59  ;;  %v1935_v54 = vld [vmem:[%s2990_s1 + $0x2c4] sm:$0xf]  ;;  %v1482_v59 = vld [vmem:[%s2990_s1 + $0x1b8] sm:$0xf0] }
  0x4e   :  { %1088 = vmatpush.bf16.msra.mxu2 %v1373_v1  ;;  %v1405_v1 = vor.u32 %v1881_v50, %v1402_v51  ;;  %v1490_v50 = vld [vmem:[%s2990_s1 + $0x1c8] sm:$0xf0]  ;;  %v1901_v58 = vld [vmem:[%s2990_s1 + $0x1b4] sm:$0xf]  ;;  %v1770_v45 = vld [vmem:[%s2990_s1 + $0x3f8] sm:$0xf0] }
  0x4f   :  { %1102 = vmatpush.bf16.msra.mxu3 %v1437_v5  ;;  %v1642_v5 = vld [vmem:[%s2990_s1 + $0x2f8] sm:$0xf0]  ;;  %v1493_v55 = vor.u32 %v1903_v49, %v1490_v50  ;;  %v1989_v49 = vld [vmem:[%s2990_s1 + $0x474] sm:$0xf] }
  0x50   :  { %1061 = vmatpush.bf16.msra.mxu0 %v1809_v9  ;;  %v1394_v9 = vld [vmem:[%s2990_s1 + $0x108] sm:$0xf0]  ;;  %v1645_v21 = vor.u32 %v1941_v4, %v1642_v5  ;;  %v1485_v4 = vor.u32 %v1901_v58, %v1482_v59  ;;  %v1949_v5 = vld [vmem:[%s2990_s1 + $0x334] sm:$0xf]  ;;  %v1834_v50 = vld [vmem:[%s2990_s1 + $0x478] sm:$0xf0] }
  0x51   :  { %1075 = vmatpush.bf16.msra.mxu1 %v1301_v12  ;;  %v1517_v12 = vor.u32 %v1909_v62, %v1514_v63  ;;  %v1917_v62 = vld [vmem:[%s2990_s1 + $0x234] sm:$0xf]  ;;  %v1546_v63 = vld [vmem:[%s2990_s1 + $0x238] sm:$0xf0]  ;;  %v1987_v58 = vld [vmem:[%s2990_s1 + $0x464] sm:$0xf] }
  0x52   :  { %1089 = vmatpush.bf16.msra.mxu2 %v1365_v16  ;;  %v1706_v16 = vld [vmem:[%s2990_s1 + $0x378] sm:$0xf0]  ;;  %v1826_v59 = vld [vmem:[%s2990_s1 + $0x468] sm:$0xf0] }
  0x53   :  { %1103 = vmatpush.bf16.msra.mxu3 %v1429_v19  ;;  %v1907_v19 = vld [vmem:[%s2990_s1 + $0x1e4] sm:$0xf]  ;;  %v1709_v26 = vor.u32 %v1957_v15, %v1706_v16 }
  0x54   :  { %1062 = vmatpush.bf16.msra.mxu0 %v1801_v22  ;;  %v1397_v22 = vor.u32 %v1879_v7, %v1394_v9  ;;  %v1509_v29 = vor.u32 %v1907_v19, %v1506_v20  ;;  %v1549_v7 = vor.u32 %v1917_v62, %v1546_v63  ;;  %v1899_v9 = vld [vmem:[%s2990_s1 + $0x1a4] sm:$0xf]  ;;  %v1666_v20 = vld [vmem:[%s2990_s1 + $0x328] sm:$0xf0]  ;;  %v1829_v62 = vor.u32 %v1987_v58, %v1826_v59  ;;  %v1969_v63 = vld [vmem:[%s2990_s1 + $0x3d4] sm:$0xf] }
  0x55   :  { %1076 = vmatpush.bf16.msra.mxu1 %v1293_v25  ;;  %v2711_v25 = vor.u32 %v1846_v13, %v1260_v10  ;;  %v1474_v10 = vld [vmem:[%s2990_s1 + $0x1a8] sm:$0xf0]  ;;  %v1931_v16 = vld [vmem:[%s2990_s1 + $0x2a4] sm:$0xf] }
  0x56   :  { %1090 = vmatpush.bf16.msra.mxu2 %v1357_v28  ;;  %v1634_v28 = vld [vmem:[%s2990_s1 + $0x2e8] sm:$0xf0]  ;;  %v1947_v19 = vld [vmem:[%s2990_s1 + $0x324] sm:$0xf] }
  0x57   :  { %1104 = vmatpush.bf16.msra.mxu3 %v1421_v31  ;;  %v1698_v31 = vld [vmem:[%s2990_s1 + $0x368] sm:$0xf0]  ;;  %v1637_v35 = vor.u32 %v1939_v27, %v1634_v28  ;;  %v1530_v27 = vld [vmem:[%s2990_s1 + $0x218] sm:$0xf0]  ;;  %v1669_v28 = vor.u32 %v1947_v19, %v1666_v20 }
  0x58   :  { %1063 = vmatpush.bf16.msra.mxu0 %v1793_v34  ;;  %v1498_v34 = vld [vmem:[%s2990_s1 + $0x1d8] sm:$0xf0]  ;;  %v1701_v39 = vor.u32 %v1955_v30, %v1698_v31  ;;  %v1538_v13 = vld [vmem:[%s2990_s1 + $0x228] sm:$0xf0] }
  0x59   :  { %1077 = vmatpush.bf16.msra.mxu1 %v1285_v38  ;;  %v1562_v38 = vld [vmem:[%s2990_s1 + $0x258] sm:$0xf0]  ;;  %v1501_v43 = vor.u32 %v1905_v33, %v1498_v34  ;;  %v1895_v34 = vld [vmem:[%s2990_s1 + $0x184] sm:$0xf]  ;;  %v1794_v19 = vld [vmem:[%s2990_s1 + $0x428] sm:$0xf0] }
  0x5a   :  { %1091 = vmatpush.bf16.msra.mxu2 %v1349_v42  ;;  %v1626_v42 = vld [vmem:[%s2990_s1 + $0x2d8] sm:$0xf0] }
  0x5b   :  { %1105 = vmatpush.bf16.msra.mxu3 %v1413_v47  ;;  %v1565_v47 = vor.u32 %v1921_v37, %v1562_v38  ;;  %v1629_v51 = vor.u32 %v1937_v41, %v1626_v42  ;;  %v1594_v30 = vld [vmem:[%s2990_s1 + $0x298] sm:$0xf0]  ;;  %v1458_v37 = vld [vmem:[%s2990_s1 + $0x188] sm:$0xf0]  ;;  %v1911_v38 = vld [vmem:[%s2990_s1 + $0x204] sm:$0xf] }
  0x5c   :  { %1064 = vmatpush.bf16.msra.mxu0 %v1785_v52  ;;  %v1919_v52 = vld [vmem:[%s2990_s1 + $0x244] sm:$0xf]  ;;  %v1658_v33 = vld [vmem:[%s2990_s1 + $0x318] sm:$0xf0] }
  0x5d   :  { %1078 = vmatpush.bf16.msra.mxu1 %v1277_v56  ;;  %v1951_v56 = vld [vmem:[%s2990_s1 + $0x344] sm:$0xf] }
  0x5e   :  { %1092 = vmatpush.bf16.msra.mxu2 %v1341_v61  ;;  %v1927_v42 = vld [vmem:[%s2990_s1 + $0x284] sm:$0xf] }
  0x5f   :  { %1106 = vmatpush.bf16.msra.mxu3 %v1405_v1  ;;  %v1933_v1 = vld [vmem:[%s2990_s1 + $0x2b4] sm:$0xf] }
  0x60   :  { %1065 = vmatpush.bf16.msra.mxu0 %v1777_v6  ;;  %v1674_v6 = vld [vmem:[%s2990_s1 + $0x338] sm:$0xf0] }
  0x61   :  { %1079 = vmatpush.bf16.msra.mxu1 %v1269_v11  ;;  %v1613_v11 = vor.u32 %v1933_v1, %v1610_v3  ;;  %v1677_v15 = vor.u32 %v1949_v5, %v1674_v6  ;;  %v1985_v1 = vld [vmem:[%s2990_s1 + $0x454] sm:$0xf]  ;;  %v1818_v3 = vld [vmem:[%s2990_s1 + $0x458] sm:$0xf0]  ;;  %v1746_v6 = vld [vmem:[%s2990_s1 + $0x3c8] sm:$0xf0] }
  0x62   :  { %1093 = vmatpush.bf16.msra.mxu2 %v1333_v17  ;;  %v1602_v17 = vld [vmem:[%s2990_s1 + $0x2a8] sm:$0xf0]  ;;  %v1821_v5 = vor.u32 %v1985_v1, %v1818_v3 }
  0x63   :  { %1107 = vmatpush.bf16.msra.mxu3 %v1397_v22  ;;  %1066 = vmatmul.bf16.vlgmr.msra.gmra.mxu0 %v2711_v25  ;;  %v1897_v22 = vld [vmem:[%s2990_s1 + $0x194] sm:$0xf]  ;;  %v1605_v24 = vor.u32 %v1931_v16, %v1602_v17  ;;  %v1963_v16 = vld [vmem:[%s2990_s1 + $0x3a4] sm:$0xf]  ;;  %v1730_v17 = vld [vmem:[%s2990_s1 + $0x3a8] sm:$0xf0] }
  0x64   :  { %1114 = vmatpush.bf16.msrb.mxu0 %v1517_v12  ;;  %1080 = vmatmul.bf16.vlgmr.msra.gmra.mxu1 %v2279_v60  ;;  %v1682_v60 = vld [vmem:[%s2990_s1 + $0x348] sm:$0xf0]  ;;  %v1915_v12 = vld [vmem:[%s2990_s1 + $0x224] sm:$0xf]  ;;  %v1469_v31 = vor.u32 %v1897_v22, %v1466_v23  ;;  %v1733_v20 = vor.u32 %v1963_v16, %v1730_v17  ;;  %v1961_v22 = vld [vmem:[%s2990_s1 + $0x394] sm:$0xf] }
  0x65   :  { %1128 = vmatpush.bf16.msrb.mxu1 %v1581_v18  ;;  %1094 = vmatmul.bf16.vlgmr.msra.gmra.mxu2 %v2309_v8  ;;  %v1554_v8 = vld [vmem:[%s2990_s1 + $0x248] sm:$0xf0]  ;;  %v1685_v0 = vor.u32 %v1951_v56, %v1682_v60  ;;  %v1477_v18 = vor.u32 %v1899_v9, %v1474_v10  ;;  %v1971_v56 = vld [vmem:[%s2990_s1 + $0x3e4] sm:$0xf]  ;;  %v1965_v9 = vld [vmem:[%s2990_s1 + $0x3b4] sm:$0xf] }
  0x66   :  { %1142 = vmatpush.bf16.msrb.mxu2 %v1645_v21  ;;  %1108 = vmatmul.bf16.vlgmr.msra.gmra.mxu3 %v2293_v2  ;;  %v1618_v2 = vld [vmem:[%s2990_s1 + $0x2c8] sm:$0xf0]  ;;  %v1557_v57 = vor.u32 %v1919_v52, %v1554_v8  ;;  %v1541_v21 = vor.u32 %v1915_v12, %v1538_v13  ;;  %v1943_v52 = vld [vmem:[%s2990_s1 + $0x304] sm:$0xf]  ;;  %v1738_v10 = vld [vmem:[%s2990_s1 + $0x3b8] sm:$0xf0] }
  0x67   :  { %1156 = vmatpush.bf16.msrb.mxu3 %v1709_v26  ;;  %v1621_v61 = vor.u32 %v1935_v54, %v1618_v2  ;;  %v1913_v26 = vld [vmem:[%s2990_s1 + $0x214] sm:$0xf]  ;;  %v1650_v8 = vld [vmem:[%s2990_s1 + $0x308] sm:$0xf0]  ;;  %v1802_v12 = vld [vmem:[%s2990_s1 + $0x438] sm:$0xf0]  ;;  %v1741_v13 = vor.u32 %v1965_v9, %v1738_v10 }
  0x68   :  { %1115 = vmatpush.bf16.msrb.mxu0 %v1509_v29  ;;  %v1929_v29 = vld [vmem:[%s2990_s1 + $0x294] sm:$0xf]  ;;  %v1762_v60 = vld [vmem:[%s2990_s1 + $0x3e8] sm:$0xf0]  ;;  %v1722_v23 = vld [vmem:[%s2990_s1 + $0x398] sm:$0xf0] }
  0x69   :  { %1129 = vmatpush.bf16.msrb.mxu1 %v1573_v32  ;;  %v1945_v32 = vld [vmem:[%s2990_s1 + $0x314] sm:$0xf]  ;;  %v1597_v41 = vor.u32 %v1929_v29, %v1594_v30  ;;  %v1959_v29 = vld [vmem:[%s2990_s1 + $0x384] sm:$0xf]  ;;  %v1714_v30 = vld [vmem:[%s2990_s1 + $0x388] sm:$0xf0] }
  0x6a   :  { %1143 = vmatpush.bf16.msrb.mxu2 %v1637_v35  ;;  %v1533_v35 = vor.u32 %v1913_v26, %v1530_v27  ;;  %v1661_v46 = vor.u32 %v1945_v32, %v1658_v33  ;;  %v1786_v26 = vld [vmem:[%s2990_s1 + $0x418] sm:$0xf0]  ;;  %v1725_v27 = vor.u32 %v1961_v22, %v1722_v23  ;;  %v1778_v32 = vld [vmem:[%s2990_s1 + $0x408] sm:$0xf0]  ;;  %v1717_v33 = vor.u32 %v1959_v29, %v1714_v30 }
  0x6b   :  { %1157 = vmatpush.bf16.msrb.mxu3 %v1701_v39  ;;  %v1522_v39 = vld [vmem:[%s2990_s1 + $0x208] sm:$0xf0] }
  0x6c   :  { %1116 = vmatpush.bf16.msrb.mxu0 %v1501_v43  ;;  %v1973_v43 = vld [vmem:[%s2990_s1 + $0x3f4] sm:$0xf] }
  0x6d   :  { %1130 = vmatpush.bf16.msrb.mxu1 %v1565_v47  ;;  %v1586_v47 = vld [vmem:[%s2990_s1 + $0x288] sm:$0xf0]  ;;  %v1773_v54 = vor.u32 %v1973_v43, %v1770_v45 }
  0x6e   :  { %1144 = vmatpush.bf16.msrb.mxu2 %v1629_v51  ;;  %v1461_v51 = vor.u32 %v1895_v34, %v1458_v37  ;;  %v1589_v2 = vor.u32 %v1927_v42, %v1586_v47 }
  0x6f   :  { %1158 = vmatpush.bf16.msrb.mxu3 %v1693_v53  ;;  %v1525_v53 = vor.u32 %v1911_v38, %v1522_v39 }
  0x70   :  { %1117 = vmatpush.bf16.msrb.mxu0 %v1493_v55  ;;  %v1837_v55 = vor.u32 %v1989_v49, %v1834_v50 }
  0x71   :  { %1131 = vmatpush.bf16.msrb.mxu1 %v1557_v57  ;;  %v1653_v57 = vor.u32 %v1943_v52, %v1650_v8 }
  0x72   :  { %1145 = vmatpush.bf16.msrb.mxu2 %v1621_v61  ;;  %v1765_v61 = vor.u32 %v1971_v56, %v1762_v60 }
  0x73   :  { %1159 = vmatpush.bf16.msrb.mxu3 %v1685_v0  ;;  %v1754_v0 = vld [vmem:[%s2990_s1 + $0x3d8] sm:$0xf0] }
  0x74   :  { %1118 = vmatpush.bf16.msrb.mxu0 %v1485_v4  ;;  %v1757_v4 = vor.u32 %v1969_v63, %v1754_v0 }
  0x75   :  { %1132 = vmatpush.bf16.msrb.mxu1 %v1549_v7 }
  0x76   :  { %1146 = vmatpush.bf16.msrb.mxu2 %v1613_v11  ;;  %v1981_v11 = vld [vmem:[%s2990_s1 + $0x434] sm:$0xf] }
  0x77   :  { %1160 = vmatpush.bf16.msrb.mxu3 %v1677_v15  ;;  %v1805_v15 = vor.u32 %v1981_v11, %v1802_v12 }
  0x78   :  { %1119 = vmatpush.bf16.msrb.mxu0 %v1477_v18  ;;  %v1979_v18 = vld [vmem:[%s2990_s1 + $0x424] sm:$0xf] }
  0x79   :  { %1133 = vmatpush.bf16.msrb.mxu1 %v1541_v21  ;;  %v1797_v21 = vor.u32 %v1979_v18, %v1794_v19 }
  0x7a   :  { %1147 = vmatpush.bf16.msrb.mxu2 %v1605_v24  ;;  %v1977_v24 = vld [vmem:[%s2990_s1 + $0x414] sm:$0xf] }
  0x7b   :  { %1161 = vmatpush.bf16.msrb.mxu3 %v1669_v28  ;;  %v1789_v28 = vor.u32 %v1977_v24, %v1786_v26  ;;  %v1198_v24 = vld [vmem:[%s2993_s3] sm:$0x3] }
  0x7c   :  { %1120 = vmatpush.bf16.msrb.mxu0 %v1469_v31  ;;  %v1975_v31 = vld [vmem:[%s2990_s1 + $0x404] sm:$0xf]  ;;  %v1200_v30 = vperm.slane %v1198_v24, 0 }
  0x7d   :  { %1134 = vmatpush.bf16.msrb.mxu1 %v1533_v35  ;;  %v1781_v34 = vor.u32 %v1975_v31, %v1778_v32  ;;  %v1208_v31 = vld [vmem:[%s2994_s4] sm:$0x3] }
  0x7e   :  { %1148 = vmatpush.bf16.msrb.mxu2 %v1597_v41 }
  0x7f   :  { %1162 = vmatpush.bf16.msrb.mxu3 %v1661_v46 }
  0x80   :  { %1121 = vmatpush.bf16.msrb.mxu0 %v1461_v51 }
  0x81   :  { %1135 = vmatpush.bf16.msrb.mxu1 %v1525_v53 }
  0x82   :  { %1149 = vmatpush.bf16.msrb.mxu2 %v1589_v2 }
  0x83   :  { %1163 = vmatpush.bf16.msrb.mxu3 %v1653_v57  ;;  %1122 = vmatmul.bf16.vlgmr.msrb.gmra.mxu0 %v2320_v14  ;;  %v1967_v14 = vld [vmem:[%s2990_s1 + $0x3c4] sm:$0xf] }
  0x84   :  { %1170 = vmatpush.bf16.msra.mxu0 %v1773_v54  ;;  %1136 = vmatmul.bf16.vlgmr.msrb.gmra.mxu1 %v2492_v36  ;;  %v1983_v36 = vld [vmem:[%s2990_s1 + $0x444] sm:$0xf] }
  0x85   :  { %1184 = vmatpush.bf16.msra.mxu1 %v1837_v55  ;;  %1150 = vmatmul.bf16.vlgmr.msrb.gmra.mxu2 %v2511_v44  ;;  %v1810_v44 = vld [vmem:[%s2990_s1 + $0x448] sm:$0xf0] }
  0x86   :  { %1164 = vmatmul.bf16.vlgmr.msrb.gmra.mxu3 %v2503_v40  ;;  %v1749_v40 = vor.u32 %v1967_v14, %v1746_v6  ;;  %v1813_v7 = vor.u32 %v1983_v36, %v1810_v44 }
  0x88   :  { %1171 = vmatpush.bf16.msra.mxu0 %v1765_v61 }
  0x89   :  { %1185 = vmatpush.bf16.msra.mxu1 %v1829_v62 }
  0x8c   :  { %1172 = vmatpush.bf16.msra.mxu0 %v1757_v4 }
  0x8d   :  { %1186 = vmatpush.bf16.msra.mxu1 %v1821_v5 }
  0x90   :  { %1173 = vmatpush.bf16.msra.mxu0 %v1749_v40 }
  0x91   :  { %1187 = vmatpush.bf16.msra.mxu1 %v1813_v7 }
  0x94   :  { %1174 = vmatpush.bf16.msra.mxu0 %v1741_v13 }
  0x95   :  { %1188 = vmatpush.bf16.msra.mxu1 %v1805_v15 }
  0x98   :  { %1175 = vmatpush.bf16.msra.mxu0 %v1733_v20 }
  0x99   :  { %1189 = vmatpush.bf16.msra.mxu1 %v1797_v21 }
  0x9c   :  { %1176 = vmatpush.bf16.msra.mxu0 %v1725_v27 }
  0x9d   :  { %1190 = vmatpush.bf16.msra.mxu1 %v1789_v28 }
  0xa0   :  { %1177 = vmatpush.bf16.msra.mxu0 %v1717_v33  ;;  %v955_v37 = vpop.f32.mrf.mxu0 }
  0xa1   :  { %1191 = vmatpush.bf16.msra.mxu1 %v1781_v34  ;;  %v969_v35 = vpop.f32.mrf.mxu1 }
  0xa3   :  { %1178 = vmatmul.bf16.vlgmr.msra.gmra.mxu0 %v2519_v48  ;;  %v174_v48 = vld [vmem:[%s2992_s2] sm:$0x3] }
  0xa4   :  { %1192 = vmatmul.bf16.vlgmr.msra.gmra.mxu1 %v2711_v25  ;;  %v176_v54 = vperm.slane %v174_v48, 0  ;;  %v177_v60 = vperm.slane %v174_v48, 1 }
  0xa6   :  { %v956_v55 = vadd.f32 %v955_v37, %v176_v54 }
  0xa8   :  { %v983_v38 = vpop.f32.mrf.mxu2  ;;  %v957_v41 = vpop.f32.mrf.mxu0  ;;  %v970_v57 = vadd.f32 %v969_v35, %v956_v55 }
  0xa9   :  { %v971_v39 = vpop.f32.mrf.mxu1  ;;  %v997_v42 = vpop.f32.mrf.mxu3  ;;  %v958_v3 = vadd.f32 %v957_v41, %v176_v54  ;;  %v1201_v41 = vperm.slane %v1198_v24, 1 }
  0xaa   :  { %v984_v63 = vadd.f32 %v983_v38, %v970_v57 }
  0xab   :  { %v972_v44 = vadd.f32 %v971_v39, %v958_v3 }
  0xac   :  { %v998_v4 = vadd.f32 %v997_v42, %v984_v63  ;;  %v1210_v42 = vperm.slane %v1208_v31, 0 }
  0xb0   :  { %v985_v43 = vpop.f32.mrf.mxu2 }
  0xb1   :  { %v999_v46 = vpop.f32.mrf.mxu3  ;;  %v986_v10 = vadd.f32 %v985_v43, %v972_v44 }
  0xb3   :  { %v1000_v17 = vadd.f32 %v999_v46, %v986_v10 }
  0xc0   :  { %v1011_v47 = vpop.f32.mrf.mxu0 }
  0xc1   :  { %v1025_v45 = vpop.f32.mrf.mxu1  ;;  %v1012_v40 = vadd.f32 %v1011_v47, %v998_v4  ;;  %v1211_v47 = vperm.slane %v1208_v31, 1 }
  0xc3   :  { %v1026_v11 = vadd.f32 %v1025_v45, %v1012_v40 }
  0xc8   :  { %v1039_v49 = vpop.f32.mrf.mxu2  ;;  %v1013_v51 = vpop.f32.mrf.mxu0 }
  0xc9   :  { %v1027_v50 = vpop.f32.mrf.mxu1  ;;  %v1053_v52 = vpop.f32.mrf.mxu3  ;;  %v1040_v18 = vadd.f32 %v1039_v49, %v1026_v11  ;;  %v1014_v21 = vadd.f32 %v1013_v51, %v1000_v17 }
  0xcb   :  { %v1054_v26 = vadd.f32 %v1053_v52, %v1040_v18  ;;  %v1028_v28 = vadd.f32 %v1027_v50, %v1014_v21 }
  0xd0   :  { %v1041_v8 = vpop.f32.mrf.mxu2 }
  0xd1   :  { %v1055_v2 = vpop.f32.mrf.mxu3  ;;  %v1042_v35 = vadd.f32 %v1041_v8, %v1028_v28 }
  0xd3   :  { %v1056_v50 = vadd.f32 %v1055_v2, %v1042_v35 }
  0xe0   :  { %v1067_v53 = vpop.f32.mrf.mxu0 }
  0xe1   :  { %v1081_v25 = vpop.f32.mrf.mxu1  ;;  %v1068_v29 = vadd.f32 %v1067_v53, %v1054_v26 }
  0xe2   :  { %v1082_v62 = vadd.f32 %v1081_v25, %v177_v60 }
  0xe3   :  { %v1204_v43 = vmax.f32 %v1068_v29, %v1200_v30 }
  0xe5   :  { %v1214_v52 = vmin.f32 %v1204_v43, %v1210_v42 }
  0xe8   :  { %v1095_v56 = vpop.f32.mrf.mxu2  ;;  %v1069_v59 = vpop.f32.mrf.mxu0 }
  0xe9   :  { %v1083_v58 = vpop.f32.mrf.mxu1  ;;  %v1109_v61 = vpop.f32.mrf.mxu3  ;;  %v1096_v0 = vadd.f32 %v1095_v56, %v1082_v62  ;;  %v1070_v48 = vadd.f32 %v1069_v59, %v1056_v50 }
  0xea   :  { %v1084_v7 = vadd.f32 %v1083_v58, %v177_v60 }
  0xeb   :  { %v1110_v14 = vadd.f32 %v1109_v61, %v1096_v0  ;;  %v1206_v60 = vmax.f32 %v1070_v48, %v1200_v30 }
  0xed   :  { %v1216_v61 = vmin.f32 %v1206_v60, %v1210_v42 }
  0xf0   :  { %v1097_v1 = vpop.f32.mrf.mxu2 }
  0xf1   :  { %v1111_v36 = vpop.f32.mrf.mxu3  ;;  %v1098_v13 = vadd.f32 %v1097_v1, %v1084_v7 }
  0xf3   :  { %v1112_v22 = vadd.f32 %v1111_v36, %v1098_v13 }
 0x100   :  { %v1123_v5 = vpop.f32.mrf.mxu0 }
 0x101   :  { %v1137_v6 = vpop.f32.mrf.mxu1  ;;  %v1124_v9 = vadd.f32 %v1123_v5, %v1110_v14 }
 0x103   :  { %v1138_v15 = vadd.f32 %v1137_v6, %v1124_v9 }
 0x108   :  { %v1151_v12 = vpop.f32.mrf.mxu2  ;;  %v1125_v16 = vpop.f32.mrf.mxu0 }
 0x109   :  { %v1139_v19 = vpop.f32.mrf.mxu1  ;;  %v1165_v20 = vpop.f32.mrf.mxu3  ;;  %v1152_v23 = vadd.f32 %v1151_v12, %v1138_v15  ;;  %v1126_v27 = vadd.f32 %v1125_v16, %v1112_v22 }
 0x10b   :  { %v1166_v32 = vadd.f32 %v1165_v20, %v1152_v23  ;;  %v1140_v37 = vadd.f32 %v1139_v19, %v1126_v27 }
 0x110   :  { %v1153_v33 = vpop.f32.mrf.mxu2 }
 0x111   :  { %v1154_v45 = vadd.f32 %v1153_v33, %v1140_v37  ;;  %v1167_v49 = vpop.f32.mrf.mxu3 }
 0x113   :  { %v1168_v25 = vadd.f32 %v1167_v49, %v1154_v45 }
 0x120   :  { %v1179_v34 = vpop.f32.mrf.mxu0 }
 0x121   :  { %v1180_v38 = vadd.f32 %v1179_v34, %v1166_v32  ;;  %v1193_v39 = vpop.f32.mrf.mxu1 }
 0x123   :  { %v1194_v46 = vadd.f32 %v1193_v39, %v1180_v38 }
 0x125   :  { %v1205_v51 = vmax.f32 %v1194_v46, %v1201_v41 }
 0x127   :  { %v1215_v53 = vmin.f32 %v1205_v51, %v1211_v47 }
 0x128   :  { %v1181_v54 = vpop.f32.mrf.mxu0 }
 0x129   :  { %v1218_v55 = vpack.c.bf16 %v1215_v53, %v1214_v52  ;;  %v1182_v56 = vadd.f32 %v1181_v54, %v1168_v25  ;;  %v1195_v8 = vpop.f32.mrf.mxu1 }
 0x12b   :  { %1220 = vst [vmem:[%s2995_s5] sm:$0xff] %v1218_v55  ;;  %v1196_v57 = vadd.f32 %v1195_v8, %v1182_v56 }
 0x12d   :  { %v1207_v58 = vmax.f32 %v1196_v57, %v1201_v41 }
 0x12f   :  { %v1217_v62 = vmin.f32 %v1207_v58, %v1211_v47 }
 0x131   :  { %v1219_v63 = vpack.c.bf16 %v1217_v62, %v1216_v61 }
 0x133   :  { %1221 = vst [vmem:[%s2995_s5 + $0x8] sm:$0xff] %v1219_v63 }

// kernel: encoder_mnist_conv_forward.9
= control target key start
LH: loop header
LB: loop body
LE: loop exit
PB: predicated region body
PF: predicated region fallthrough
CT: control target
= control target key end

     0   :  { %s2952_s1 = inlined_call_operand.vmem [shape: bf16[2304,128], index: 1, kind: input, shape index: {}]   ;;  %s2953_s0 = inlined_call_operand.vmem [shape: bf16[16,2304], index: 0, kind: input, shape index: {}]   ;;  %s2954_s2 = inlined_call_operand.vmem [shape: f32[1,128], index: 2, kind: input, shape index: {}]   ;;  %s2955_s3 = inlined_call_operand.vmem [shape: f32[1,128], index: 3, kind: input, shape index: {}]   ;;  %s2956_s4 = inlined_call_operand.vmem [shape: f32[1,128], index: 4, kind: input, shape index: {}]   ;;  %s2957_s5 = inlined_call_operand.vmem [shape: f32[16,128], index: 5, kind: output, shape index: {}]  }
   0x1   :  { %v2227_v0 = vld [vmem:[%s2952_s1 + $0x38] sm:$0xff]  ;;  %v2226_v4 = vld [vmem:[%s2952_s1 + $0x30] sm:$0xff]  ;;  %v2225_v8 = vld [vmem:[%s2952_s1 + $0x28] sm:$0xff] }
   0x2   :  { %v2235_v1 = vld [vmem:[%s2952_s1 + $0x78] sm:$0xff]  ;;  %1284 = vmatpush.bf16.msra.mxu0 %v2227_v0  ;;  %v2234_v5 = vld [vmem:[%s2952_s1 + $0x70] sm:$0xff]  ;;  %v2233_v9 = vld [vmem:[%s2952_s1 + $0x68] sm:$0xff] }
   0x3   :  { %v2243_v2 = vld [vmem:[%s2952_s1 + $0xb8] sm:$0xff]  ;;  %1298 = vmatpush.bf16.msra.mxu1 %v2235_v1  ;;  %v2242_v6 = vld [vmem:[%s2952_s1 + $0xb0] sm:$0xff]  ;;  %v2241_v10 = vld [vmem:[%s2952_s1 + $0xa8] sm:$0xff] }
   0x4   :  { %v2251_v3 = vld [vmem:[%s2952_s1 + $0xf8] sm:$0xff]  ;;  %1312 = vmatpush.bf16.msra.mxu2 %v2243_v2  ;;  %v2250_v7 = vld [vmem:[%s2952_s1 + $0xf0] sm:$0xff]  ;;  %v2249_v11 = vld [vmem:[%s2952_s1 + $0xe8] sm:$0xff] }
   0x5   :  { %1326 = vmatpush.bf16.msra.mxu3 %v2251_v3  ;;  %v2224_v12 = vld [vmem:[%s2952_s1 + $0x20] sm:$0xff]  ;;  %v2223_v16 = vld [vmem:[%s2952_s1 + $0x18] sm:$0xff]  ;;  %v2222_v20 = vld [vmem:[%s2952_s1 + $0x10] sm:$0xff] }
   0x6   :  { %1285 = vmatpush.bf16.msra.mxu0 %v2226_v4  ;;  %v2232_v13 = vld [vmem:[%s2952_s1 + $0x60] sm:$0xff]  ;;  %v2231_v17 = vld [vmem:[%s2952_s1 + $0x58] sm:$0xff]  ;;  %v2230_v21 = vld [vmem:[%s2952_s1 + $0x50] sm:$0xff] }
   0x7   :  { %1299 = vmatpush.bf16.msra.mxu1 %v2234_v5  ;;  %v2240_v14 = vld [vmem:[%s2952_s1 + $0xa0] sm:$0xff]  ;;  %v2239_v18 = vld [vmem:[%s2952_s1 + $0x98] sm:$0xff]  ;;  %v2238_v22 = vld [vmem:[%s2952_s1 + $0x90] sm:$0xff] }
   0x8   :  { %1313 = vmatpush.bf16.msra.mxu2 %v2242_v6  ;;  %v2248_v15 = vld [vmem:[%s2952_s1 + $0xe0] sm:$0xff]  ;;  %v2247_v19 = vld [vmem:[%s2952_s1 + $0xd8] sm:$0xff]  ;;  %v2246_v23 = vld [vmem:[%s2952_s1 + $0xd0] sm:$0xff] }
   0x9   :  { %1327 = vmatpush.bf16.msra.mxu3 %v2250_v7  ;;  %v2221_v24 = vld [vmem:[%s2952_s1 + $0x8] sm:$0xff]  ;;  %v2220_v28 = vld [vmem:[%s2952_s1] sm:$0xff]  ;;  %v2259_v31 = vld [vmem:[%s2952_s1 + $0x138] sm:$0xff] }
   0xa   :  { %1286 = vmatpush.bf16.msra.mxu0 %v2225_v8  ;;  %v2229_v25 = vld [vmem:[%s2952_s1 + $0x48] sm:$0xff]  ;;  %v2228_v29 = vld [vmem:[%s2952_s1 + $0x40] sm:$0xff]  ;;  %v2267_v32 = vld [vmem:[%s2952_s1 + $0x178] sm:$0xff] }
   0xb   :  { %1300 = vmatpush.bf16.msra.mxu1 %v2233_v9  ;;  %v2237_v26 = vld [vmem:[%s2952_s1 + $0x88] sm:$0xff]  ;;  %v2236_v30 = vld [vmem:[%s2952_s1 + $0x80] sm:$0xff]  ;;  %v2275_v35 = vld [vmem:[%s2952_s1 + $0x1b8] sm:$0xff] }
   0xc   :  { %1314 = vmatpush.bf16.msra.mxu2 %v2241_v10  ;;  %v2245_v27 = vld [vmem:[%s2952_s1 + $0xc8] sm:$0xff]  ;;  %v1556_v33 = vld [vmem:[%s2953_s0] sm:$0xf]  ;;  %v2212_v37 = vld [vmem:[%s2953_s0 + $0x4c] sm:$0xf0] }
   0xd   :  { %1328 = vmatpush.bf16.msra.mxu3 %v2249_v11  ;;  %v2211_v34 = vld [vmem:[%s2953_s0 + $0x44] sm:$0xf0]  ;;  %v2202_v38 = vld [vmem:[%s2953_s0 + $0x4] sm:$0xf]  ;;  %v1558_v39 = vld [vmem:[%s2953_s0 + $0x48] sm:$0xf0] }
   0xe   :  { %1287 = vmatpush.bf16.msra.mxu0 %v2224_v12  ;;  %v1564_v36 = vld [vmem:[%s2953_s0 + $0x8] sm:$0xf]  ;;  %v2244_v40 = vld [vmem:[%s2952_s1 + $0xc0] sm:$0xff]  ;;  %v1557_v41 = vor.u32 %v2211_v34, %v1556_v33  ;;  %v2283_v42 = vld [vmem:[%s2952_s1 + $0x1f8] sm:$0xff]  ;;  %v1561_v47 = vor.u32 %v2202_v38, %v1558_v39 }
   0xf   :  { %1301 = vmatpush.bf16.msra.mxu1 %v2232_v13  ;;  %v1565_v43 = vor.u32 %v2212_v37, %v1564_v36  ;;  %v2203_v44 = vld [vmem:[%s2953_s0 + $0xc] sm:$0xf]  ;;  %v1566_v45 = vld [vmem:[%s2953_s0 + $0x50] sm:$0xf0]  ;;  %v2256_v56 = vld [vmem:[%s2952_s1 + $0x120] sm:$0xff] }
  0x10   :  { %1315 = vmatpush.bf16.msra.mxu2 %v2240_v14  ;;  %v2258_v46 = vld [vmem:[%s2952_s1 + $0x130] sm:$0xff]  ;;  %v1569_v50 = vor.u32 %v2203_v44, %v1566_v45  ;;  %v2257_v52 = vld [vmem:[%s2952_s1 + $0x128] sm:$0xff]  ;;  %v2264_v57 = vld [vmem:[%s2952_s1 + $0x160] sm:$0xff] }
  0x11   :  { %1329 = vmatpush.bf16.msra.mxu3 %v2248_v15  ;;  %v2266_v48 = vld [vmem:[%s2952_s1 + $0x170] sm:$0xff]  ;;  %v2265_v53 = vld [vmem:[%s2952_s1 + $0x168] sm:$0xff]  ;;  %v2272_v58 = vld [vmem:[%s2952_s1 + $0x1a0] sm:$0xff] }
  0x12   :  { %1288 = vmatpush.bf16.msra.mxu0 %v2223_v16  ;;  %v2274_v49 = vld [vmem:[%s2952_s1 + $0x1b0] sm:$0xff]  ;;  %v2273_v54 = vld [vmem:[%s2952_s1 + $0x1a8] sm:$0xff]  ;;  %v2280_v59 = vld [vmem:[%s2952_s1 + $0x1e0] sm:$0xff] }
  0x13   :  { %1302 = vmatpush.bf16.msra.mxu1 %v2231_v17  ;;  %v2282_v51 = vld [vmem:[%s2952_s1 + $0x1f0] sm:$0xff]  ;;  %v2281_v55 = vld [vmem:[%s2952_s1 + $0x1e8] sm:$0xff]  ;;  %v2255_v60 = vld [vmem:[%s2952_s1 + $0x118] sm:$0xff] }
  0x14   :  { %1316 = vmatpush.bf16.msra.mxu2 %v2239_v18  ;;  %v2263_v61 = vld [vmem:[%s2952_s1 + $0x158] sm:$0xff]  ;;  %v2254_v0 = vld [vmem:[%s2952_s1 + $0x110] sm:$0xff]  ;;  %v2253_v4 = vld [vmem:[%s2952_s1 + $0x108] sm:$0xff] }
  0x15   :  { %1330 = vmatpush.bf16.msra.mxu3 %v2247_v19  ;;  %v2271_v62 = vld [vmem:[%s2952_s1 + $0x198] sm:$0xff]  ;;  %v2262_v1 = vld [vmem:[%s2952_s1 + $0x150] sm:$0xff]  ;;  %v2261_v5 = vld [vmem:[%s2952_s1 + $0x148] sm:$0xff] }
  0x16   :  { %1289 = vmatpush.bf16.msra.mxu0 %v2222_v20  ;;  %v2279_v63 = vld [vmem:[%s2952_s1 + $0x1d8] sm:$0xff]  ;;  %v2270_v2 = vld [vmem:[%s2952_s1 + $0x190] sm:$0xff]  ;;  %v2269_v6 = vld [vmem:[%s2952_s1 + $0x188] sm:$0xff] }
  0x17   :  { %1303 = vmatpush.bf16.msra.mxu1 %v2230_v21  ;;  %v2278_v3 = vld [vmem:[%s2952_s1 + $0x1d0] sm:$0xff]  ;;  %v2277_v7 = vld [vmem:[%s2952_s1 + $0x1c8] sm:$0xff]  ;;  %v2252_v8 = vld [vmem:[%s2952_s1 + $0x100] sm:$0xff] }
  0x18   :  { %1317 = vmatpush.bf16.msra.mxu2 %v2238_v22  ;;  %v2260_v9 = vld [vmem:[%s2952_s1 + $0x140] sm:$0xff]  ;;  %v2291_v11 = vld [vmem:[%s2952_s1 + $0x238] sm:$0xff]  ;;  %v1572_v13 = vld [vmem:[%s2953_s0 + $0x10] sm:$0xf] }
  0x19   :  { %1331 = vmatpush.bf16.msra.mxu3 %v2246_v23  ;;  %v2268_v10 = vld [vmem:[%s2952_s1 + $0x180] sm:$0xff]  ;;  %v2299_v12 = vld [vmem:[%s2952_s1 + $0x278] sm:$0xff]  ;;  %v2204_v18 = vld [vmem:[%s2953_s0 + $0x14] sm:$0xf] }
  0x1a   :  { %1290 = vmatpush.bf16.msra.mxu0 %v2221_v24  ;;  %v2213_v14 = vld [vmem:[%s2953_s0 + $0x54] sm:$0xf0]  ;;  %v2214_v16 = vld [vmem:[%s2953_s0 + $0x5c] sm:$0xf0]  ;;  %v1574_v19 = vld [vmem:[%s2953_s0 + $0x58] sm:$0xf0] }
  0x1b   :  { %1304 = vmatpush.bf16.msra.mxu1 %v2229_v25  ;;  %v1580_v15 = vld [vmem:[%s2953_s0 + $0x18] sm:$0xf]  ;;  %v2276_v20 = vld [vmem:[%s2952_s1 + $0x1c0] sm:$0xff]  ;;  %v2205_v21 = vld [vmem:[%s2953_s0 + $0x1c] sm:$0xf]  ;;  %v1573_v23 = vor.u32 %v2213_v14, %v1572_v13 }
  0x1c   :  { %1318 = vmatpush.bf16.msra.mxu2 %v2237_v26  ;;  %v2307_v17 = vld [vmem:[%s2952_s1 + $0x2b8] sm:$0xff]  ;;  %v1582_v22 = vld [vmem:[%s2953_s0 + $0x60] sm:$0xf0]  ;;  %v1581_v24 = vor.u32 %v2214_v16, %v1580_v15  ;;  %v1577_v26 = vor.u32 %v2204_v18, %v1574_v19  ;;  %v2297_v33 = vld [vmem:[%s2952_s1 + $0x268] sm:$0xff] }
  0x1d   :  { %1332 = vmatpush.bf16.msra.mxu3 %v2245_v27  ;;  %v2315_v25 = vld [vmem:[%s2952_s1 + $0x2f8] sm:$0xff]  ;;  %v1585_v27 = vor.u32 %v2205_v21, %v1582_v22  ;;  %v2305_v34 = vld [vmem:[%s2952_s1 + $0x2a8] sm:$0xff]  ;;  %v2288_v36 = vld [vmem:[%s2952_s1 + $0x220] sm:$0xff] }
  0x1e   :  { %1291 = vmatpush.bf16.msra.mxu0 %v2220_v28  ;;  %v2290_v28 = vld [vmem:[%s2952_s1 + $0x230] sm:$0xff]  ;;  %v2296_v37 = vld [vmem:[%s2952_s1 + $0x260] sm:$0xff]  ;;  %v2329_v13 = vld [vmem:[%s2952_s1 + $0x368] sm:$0xff] }
  0x1f   :  { %1305 = vmatpush.bf16.msra.mxu1 %v2228_v29  ;;  %v2298_v29 = vld [vmem:[%s2952_s1 + $0x270] sm:$0xff]  ;;  %v2304_v38 = vld [vmem:[%s2952_s1 + $0x2a0] sm:$0xff]  ;;  %v2337_v14 = vld [vmem:[%s2952_s1 + $0x3a8] sm:$0xff] }
  0x20   :  { %1319 = vmatpush.bf16.msra.mxu2 %v2236_v30  ;;  %v2306_v30 = vld [vmem:[%s2952_s1 + $0x2b0] sm:$0xff]  ;;  %v2312_v39 = vld [vmem:[%s2952_s1 + $0x2e0] sm:$0xff]  ;;  %v2345_v15 = vld [vmem:[%s2952_s1 + $0x3e8] sm:$0xff] }
  0x21   :  { %1333 = vmatpush.bf16.msra.mxu3 %v2244_v40  ;;  %1292 = vmatmul.bf16.vlgmr.msra.gmra.mxu0 %v1557_v41  ;;  %v2287_v40 = vld [vmem:[%s2952_s1 + $0x218] sm:$0xff]  ;;  %v2286_v44 = vld [vmem:[%s2952_s1 + $0x210] sm:$0xff]  ;;  %v2320_v16 = vld [vmem:[%s2952_s1 + $0x320] sm:$0xff] }
  0x22   :  { %1340 = vmatpush.bf16.msrb.mxu0 %v2259_v31  ;;  %1306 = vmatmul.bf16.vlgmr.msra.gmra.mxu1 %v1561_v47  ;;  %v2314_v31 = vld [vmem:[%s2952_s1 + $0x2f0] sm:$0xff]  ;;  %v2295_v41 = vld [vmem:[%s2952_s1 + $0x258] sm:$0xff]  ;;  %v2336_v18 = vld [vmem:[%s2952_s1 + $0x3a0] sm:$0xff] }
  0x23   :  { %1354 = vmatpush.bf16.msrb.mxu1 %v2267_v32  ;;  %1320 = vmatmul.bf16.vlgmr.msra.gmra.mxu2 %v1565_v43  ;;  %v2289_v32 = vld [vmem:[%s2952_s1 + $0x228] sm:$0xff]  ;;  %v2311_v43 = vld [vmem:[%s2952_s1 + $0x2d8] sm:$0xff]  ;;  %v2294_v45 = vld [vmem:[%s2952_s1 + $0x250] sm:$0xff] }
  0x24   :  { %1368 = vmatpush.bf16.msrb.mxu2 %v2275_v35  ;;  %1334 = vmatmul.bf16.vlgmr.msra.gmra.mxu3 %v1569_v50  ;;  %v2313_v35 = vld [vmem:[%s2952_s1 + $0x2e8] sm:$0xff]  ;;  %v2310_v47 = vld [vmem:[%s2952_s1 + $0x2d0] sm:$0xff]  ;;  %v2344_v19 = vld [vmem:[%s2952_s1 + $0x3e0] sm:$0xff] }
  0x25   :  { %1382 = vmatpush.bf16.msrb.mxu3 %v2283_v42  ;;  %v2303_v42 = vld [vmem:[%s2952_s1 + $0x298] sm:$0xff]  ;;  %v2301_v50 = vld [vmem:[%s2952_s1 + $0x288] sm:$0xff] }
  0x26   :  { %1341 = vmatpush.bf16.msrb.mxu0 %v2258_v46  ;;  %v2302_v46 = vld [vmem:[%s2952_s1 + $0x290] sm:$0xff]  ;;  %v2327_v21 = vld [vmem:[%s2952_s1 + $0x358] sm:$0xff] }
  0x27   :  { %1355 = vmatpush.bf16.msrb.mxu1 %v2266_v48  ;;  %v2285_v48 = vld [vmem:[%s2952_s1 + $0x208] sm:$0xff]  ;;  %v2335_v22 = vld [vmem:[%s2952_s1 + $0x398] sm:$0xff] }
  0x28   :  { %1369 = vmatpush.bf16.msrb.mxu2 %v2274_v49  ;;  %v2293_v49 = vld [vmem:[%s2952_s1 + $0x248] sm:$0xff] }
  0x29   :  { %1383 = vmatpush.bf16.msrb.mxu3 %v2282_v51  ;;  %v2309_v51 = vld [vmem:[%s2952_s1 + $0x2c8] sm:$0xff] }
  0x2a   :  { %1342 = vmatpush.bf16.msrb.mxu0 %v2257_v52  ;;  %v2284_v52 = vld [vmem:[%s2952_s1 + $0x200] sm:$0xff] }
  0x2b   :  { %1356 = vmatpush.bf16.msrb.mxu1 %v2265_v53  ;;  %v2292_v53 = vld [vmem:[%s2952_s1 + $0x240] sm:$0xff] }
  0x2c   :  { %1370 = vmatpush.bf16.msrb.mxu2 %v2273_v54  ;;  %v2300_v54 = vld [vmem:[%s2952_s1 + $0x280] sm:$0xff] }
  0x2d   :  { %1384 = vmatpush.bf16.msrb.mxu3 %v2281_v55  ;;  %v2323_v55 = vld [vmem:[%s2952_s1 + $0x338] sm:$0xff] }
  0x2e   :  { %1343 = vmatpush.bf16.msrb.mxu0 %v2256_v56  ;;  %v2331_v56 = vld [vmem:[%s2952_s1 + $0x378] sm:$0xff] }
  0x2f   :  { %1357 = vmatpush.bf16.msrb.mxu1 %v2264_v57  ;;  %v1588_v57 = vld [vmem:[%s2953_s0 + $0x20] sm:$0xf] }
  0x30   :  { %1371 = vmatpush.bf16.msrb.mxu2 %v2272_v58  ;;  %v2215_v58 = vld [vmem:[%s2953_s0 + $0x64] sm:$0xf0] }
  0x31   :  { %1385 = vmatpush.bf16.msrb.mxu3 %v2280_v59  ;;  %v1596_v59 = vld [vmem:[%s2953_s0 + $0x28] sm:$0xf] }
  0x32   :  { %1344 = vmatpush.bf16.msrb.mxu0 %v2255_v60  ;;  %v2216_v60 = vld [vmem:[%s2953_s0 + $0x6c] sm:$0xf0] }
  0x33   :  { %1358 = vmatpush.bf16.msrb.mxu1 %v2263_v61  ;;  %v2339_v61 = vld [vmem:[%s2952_s1 + $0x3b8] sm:$0xff] }
  0x34   :  { %1372 = vmatpush.bf16.msrb.mxu2 %v2271_v62  ;;  %v2206_v62 = vld [vmem:[%s2953_s0 + $0x24] sm:$0xf] }
  0x35   :  { %1386 = vmatpush.bf16.msrb.mxu3 %v2279_v63  ;;  %v1590_v63 = vld [vmem:[%s2953_s0 + $0x68] sm:$0xf0] }
  0x36   :  { %1345 = vmatpush.bf16.msrb.mxu0 %v2254_v0  ;;  %v2308_v0 = vld [vmem:[%s2952_s1 + $0x2c0] sm:$0xff] }
  0x37   :  { %1359 = vmatpush.bf16.msrb.mxu1 %v2262_v1  ;;  %v2207_v1 = vld [vmem:[%s2953_s0 + $0x2c] sm:$0xf] }
  0x38   :  { %1373 = vmatpush.bf16.msrb.mxu2 %v2270_v2  ;;  %v1598_v2 = vld [vmem:[%s2953_s0 + $0x70] sm:$0xf0] }
  0x39   :  { %1387 = vmatpush.bf16.msrb.mxu3 %v2278_v3  ;;  %v1589_v3 = vor.u32 %v2215_v58, %v1588_v57  ;;  %v2359_v57 = vld [vmem:[%s2952_s1 + $0x458] sm:$0xff]  ;;  %v2350_v58 = vld [vmem:[%s2952_s1 + $0x410] sm:$0xff] }
  0x3a   :  { %1346 = vmatpush.bf16.msrb.mxu0 %v2253_v4  ;;  %v1597_v4 = vor.u32 %v2216_v60, %v1596_v59  ;;  %v2358_v59 = vld [vmem:[%s2952_s1 + $0x450] sm:$0xff]  ;;  %v2349_v60 = vld [vmem:[%s2952_s1 + $0x408] sm:$0xff] }
  0x3b   :  { %1360 = vmatpush.bf16.msrb.mxu1 %v2261_v5  ;;  %v2347_v5 = vld [vmem:[%s2952_s1 + $0x3f8] sm:$0xff] }
  0x3c   :  { %1374 = vmatpush.bf16.msrb.mxu2 %v2269_v6  ;;  %v1593_v6 = vor.u32 %v2206_v62, %v1590_v63  ;;  %v2348_v62 = vld [vmem:[%s2952_s1 + $0x400] sm:$0xff] }
  0x3d   :  { %1388 = vmatpush.bf16.msrb.mxu3 %v2277_v7  ;;  %v1601_v7 = vor.u32 %v2207_v1, %v1598_v2  ;;  %v1620_v63 = vld [vmem:[%s2953_s0 + $0x40] sm:$0xf]  ;;  %v2210_v2 = vld [vmem:[%s2953_s0 + $0x44] sm:$0xf] }
  0x3e   :  { %1347 = vmatpush.bf16.msrb.mxu0 %v2252_v8  ;;  %v2322_v8 = vld [vmem:[%s2952_s1 + $0x330] sm:$0xff]  ;;  %v2356_v1 = vld [vmem:[%s2952_s1 + $0x440] sm:$0xff] }
  0x3f   :  { %1361 = vmatpush.bf16.msrb.mxu1 %v2260_v9  ;;  %v2330_v9 = vld [vmem:[%s2952_s1 + $0x370] sm:$0xff] }
  0x40   :  { %1375 = vmatpush.bf16.msrb.mxu2 %v2268_v10  ;;  %v2338_v10 = vld [vmem:[%s2952_s1 + $0x3b0] sm:$0xff] }
  0x41   :  { %1389 = vmatpush.bf16.msrb.mxu3 %v2276_v20  ;;  %1348 = vmatmul.bf16.vlgmr.msrb.gmra.mxu0 %v1573_v23  ;;  %v2319_v20 = vld [vmem:[%s2952_s1 + $0x318] sm:$0xff] }
  0x42   :  { %1396 = vmatpush.bf16.msra.mxu0 %v2291_v11  ;;  %1362 = vmatmul.bf16.vlgmr.msrb.gmra.mxu1 %v1577_v26  ;;  %v2346_v11 = vld [vmem:[%s2952_s1 + $0x3f0] sm:$0xff]  ;;  %v2343_v23 = vld [vmem:[%s2952_s1 + $0x3d8] sm:$0xff] }
  0x43   :  { %1410 = vmatpush.bf16.msra.mxu1 %v2299_v12  ;;  %1376 = vmatmul.bf16.vlgmr.msrb.gmra.mxu2 %v1581_v24  ;;  %v2321_v12 = vld [vmem:[%s2952_s1 + $0x328] sm:$0xff]  ;;  %v2318_v24 = vld [vmem:[%s2952_s1 + $0x310] sm:$0xff] }
  0x44   :  { %1424 = vmatpush.bf16.msra.mxu2 %v2307_v17  ;;  %1390 = vmatmul.bf16.vlgmr.msrb.gmra.mxu3 %v1585_v27  ;;  %v2328_v17 = vld [vmem:[%s2952_s1 + $0x360] sm:$0xff]  ;;  %v2334_v26 = vld [vmem:[%s2952_s1 + $0x390] sm:$0xff] }
  0x45   :  { %1438 = vmatpush.bf16.msra.mxu3 %v2315_v25  ;;  %v2326_v25 = vld [vmem:[%s2952_s1 + $0x350] sm:$0xff] }
  0x46   :  { %1397 = vmatpush.bf16.msra.mxu0 %v2290_v28  ;;  %v2342_v27 = vld [vmem:[%s2952_s1 + $0x3d0] sm:$0xff]  ;;  %v2317_v28 = vld [vmem:[%s2952_s1 + $0x308] sm:$0xff] }
  0x47   :  { %1411 = vmatpush.bf16.msra.mxu1 %v2298_v29  ;;  %v2325_v29 = vld [vmem:[%s2952_s1 + $0x348] sm:$0xff] }
  0x48   :  { %1425 = vmatpush.bf16.msra.mxu2 %v2306_v30  ;;  %v2333_v30 = vld [vmem:[%s2952_s1 + $0x388] sm:$0xff] }
  0x49   :  { %1439 = vmatpush.bf16.msra.mxu3 %v2314_v31  ;;  %v2341_v31 = vld [vmem:[%s2952_s1 + $0x3c8] sm:$0xff] }
  0x4a   :  { %1398 = vmatpush.bf16.msra.mxu0 %v2289_v32  ;;  %v2316_v32 = vld [vmem:[%s2952_s1 + $0x300] sm:$0xff] }
  0x4b   :  { %1412 = vmatpush.bf16.msra.mxu1 %v2297_v33  ;;  %v2324_v33 = vld [vmem:[%s2952_s1 + $0x340] sm:$0xff] }
  0x4c   :  { %1426 = vmatpush.bf16.msra.mxu2 %v2305_v34  ;;  %v2332_v34 = vld [vmem:[%s2952_s1 + $0x380] sm:$0xff] }
  0x4d   :  { %1440 = vmatpush.bf16.msra.mxu3 %v2313_v35  ;;  %v1604_v35 = vld [vmem:[%s2953_s0 + $0x30] sm:$0xf] }
  0x4e   :  { %1399 = vmatpush.bf16.msra.mxu0 %v2288_v36  ;;  %v2217_v36 = vld [vmem:[%s2953_s0 + $0x74] sm:$0xf0] }
  0x4f   :  { %1413 = vmatpush.bf16.msra.mxu1 %v2296_v37  ;;  %v1612_v37 = vld [vmem:[%s2953_s0 + $0x38] sm:$0xf] }
  0x50   :  { %1427 = vmatpush.bf16.msra.mxu2 %v2304_v38  ;;  %v2218_v38 = vld [vmem:[%s2953_s0 + $0x7c] sm:$0xf0] }
  0x51   :  { %1441 = vmatpush.bf16.msra.mxu3 %v2312_v39  ;;  %v2208_v39 = vld [vmem:[%s2953_s0 + $0x34] sm:$0xf] }
  0x52   :  { %1400 = vmatpush.bf16.msra.mxu0 %v2287_v40  ;;  %v1606_v40 = vld [vmem:[%s2953_s0 + $0x78] sm:$0xf0] }
  0x53   :  { %1414 = vmatpush.bf16.msra.mxu1 %v2295_v41  ;;  %v2355_v41 = vld [vmem:[%s2952_s1 + $0x438] sm:$0xff] }
  0x54   :  { %1428 = vmatpush.bf16.msra.mxu2 %v2303_v42  ;;  %v2363_v42 = vld [vmem:[%s2952_s1 + $0x478] sm:$0xff] }
  0x55   :  { %1442 = vmatpush.bf16.msra.mxu3 %v2311_v43  ;;  %v2340_v43 = vld [vmem:[%s2952_s1 + $0x3c0] sm:$0xff] }
  0x56   :  { %1401 = vmatpush.bf16.msra.mxu0 %v2286_v44  ;;  %v1605_v44 = vor.u32 %v2217_v36, %v1604_v35 }
  0x57   :  { %1415 = vmatpush.bf16.msra.mxu1 %v2294_v45  ;;  %v2209_v45 = vld [vmem:[%s2953_s0 + $0x3c] sm:$0xf] }
  0x58   :  { %1429 = vmatpush.bf16.msra.mxu2 %v2302_v46  ;;  %v1614_v46 = vld [vmem:[%s2953_s0 + $0x80] sm:$0xf0] }
  0x59   :  { %1443 = vmatpush.bf16.msra.mxu3 %v2310_v47  ;;  %v1613_v47 = vor.u32 %v2218_v38, %v1612_v37 }
  0x5a   :  { %1402 = vmatpush.bf16.msra.mxu0 %v2285_v48  ;;  %v1609_v48 = vor.u32 %v2208_v39, %v1606_v40 }
  0x5b   :  { %1416 = vmatpush.bf16.msra.mxu1 %v2293_v49  ;;  %v1617_v49 = vor.u32 %v2209_v45, %v1614_v46 }
  0x5c   :  { %1430 = vmatpush.bf16.msra.mxu2 %v2301_v50  ;;  %v2354_v50 = vld [vmem:[%s2952_s1 + $0x430] sm:$0xff] }
  0x5d   :  { %1444 = vmatpush.bf16.msra.mxu3 %v2309_v51  ;;  %v2362_v51 = vld [vmem:[%s2952_s1 + $0x470] sm:$0xff] }
  0x5e   :  { %1403 = vmatpush.bf16.msra.mxu0 %v2284_v52  ;;  %v2353_v52 = vld [vmem:[%s2952_s1 + $0x428] sm:$0xff] }
  0x5f   :  { %1417 = vmatpush.bf16.msra.mxu1 %v2292_v53  ;;  %v2361_v53 = vld [vmem:[%s2952_s1 + $0x468] sm:$0xff] }
  0x60   :  { %1431 = vmatpush.bf16.msra.mxu2 %v2300_v54  ;;  %v2352_v54 = vld [vmem:[%s2952_s1 + $0x420] sm:$0xff] }
  0x61   :  { %1445 = vmatpush.bf16.msra.mxu3 %v2308_v0  ;;  %1404 = vmatmul.bf16.vlgmr.msra.gmra.mxu0 %v1589_v3  ;;  %v2219_v0 = vld [vmem:[%s2953_s0 + $0x84] sm:$0xf0]  ;;  %v1622_v3 = vld [vmem:[%s2953_s0 + $0x88] sm:$0xf0] }
  0x62   :  { %1452 = vmatpush.bf16.msrb.mxu0 %v2323_v55  ;;  %1418 = vmatmul.bf16.vlgmr.msra.gmra.mxu1 %v1593_v6  ;;  %v2360_v55 = vld [vmem:[%s2952_s1 + $0x460] sm:$0xff] }
  0x63   :  { %1466 = vmatpush.bf16.msrb.mxu1 %v2331_v56  ;;  %1432 = vmatmul.bf16.vlgmr.msra.gmra.mxu2 %v1597_v4  ;;  %v2351_v56 = vld [vmem:[%s2952_s1 + $0x418] sm:$0xff]  ;;  %v1621_v4 = vor.u32 %v2219_v0, %v1620_v63 }
  0x64   :  { %1480 = vmatpush.bf16.msrb.mxu2 %v2339_v61  ;;  %1446 = vmatmul.bf16.vlgmr.msra.gmra.mxu3 %v1601_v7  ;;  %v2357_v61 = vld [vmem:[%s2952_s1 + $0x448] sm:$0xff] }
  0x65   :  { %1494 = vmatpush.bf16.msrb.mxu3 %v2347_v5  ;;  %v1625_v5 = vor.u32 %v2210_v2, %v1622_v3 }
  0x66   :  { %1453 = vmatpush.bf16.msrb.mxu0 %v2322_v8 }
  0x67   :  { %1467 = vmatpush.bf16.msrb.mxu1 %v2330_v9 }
  0x68   :  { %1481 = vmatpush.bf16.msrb.mxu2 %v2338_v10 }
  0x69   :  { %1495 = vmatpush.bf16.msrb.mxu3 %v2346_v11 }
  0x6a   :  { %1454 = vmatpush.bf16.msrb.mxu0 %v2321_v12  ;;  %v2364_v12 = vld [vmem:[%s2954_s2] ss:$0 sm:$0xff] }
  0x6b   :  { %1468 = vmatpush.bf16.msrb.mxu1 %v2329_v13 }
  0x6c   :  { %1482 = vmatpush.bf16.msrb.mxu2 %v2337_v14 }
  0x6d   :  { %1496 = vmatpush.bf16.msrb.mxu3 %v2345_v15 }
  0x6e   :  { %1455 = vmatpush.bf16.msrb.mxu0 %v2320_v16 }
  0x6f   :  { %1469 = vmatpush.bf16.msrb.mxu1 %v2328_v17 }
  0x70   :  { %1483 = vmatpush.bf16.msrb.mxu2 %v2336_v18 }
  0x71   :  { %1497 = vmatpush.bf16.msrb.mxu3 %v2344_v19 }
  0x72   :  { %1456 = vmatpush.bf16.msrb.mxu0 %v2319_v20 }
  0x73   :  { %1470 = vmatpush.bf16.msrb.mxu1 %v2327_v21 }
  0x74   :  { %1484 = vmatpush.bf16.msrb.mxu2 %v2335_v22 }
  0x75   :  { %1498 = vmatpush.bf16.msrb.mxu3 %v2343_v23 }
  0x76   :  { %1457 = vmatpush.bf16.msrb.mxu0 %v2318_v24 }
  0x77   :  { %1471 = vmatpush.bf16.msrb.mxu1 %v2326_v25 }
  0x78   :  { %1485 = vmatpush.bf16.msrb.mxu2 %v2334_v26 }
  0x79   :  { %1499 = vmatpush.bf16.msrb.mxu3 %v2342_v27 }
  0x7a   :  { %1458 = vmatpush.bf16.msrb.mxu0 %v2317_v28 }
  0x7b   :  { %1472 = vmatpush.bf16.msrb.mxu1 %v2325_v29 }
  0x7c   :  { %1486 = vmatpush.bf16.msrb.mxu2 %v2333_v30 }
  0x7d   :  { %1500 = vmatpush.bf16.msrb.mxu3 %v2341_v31 }
  0x7e   :  { %1459 = vmatpush.bf16.msrb.mxu0 %v2316_v32 }
  0x7f   :  { %1473 = vmatpush.bf16.msrb.mxu1 %v2324_v33 }
  0x80   :  { %1487 = vmatpush.bf16.msrb.mxu2 %v2332_v34 }
  0x81   :  { %1501 = vmatpush.bf16.msrb.mxu3 %v2340_v43  ;;  %1460 = vmatmul.bf16.vlgmr.msrb.gmra.mxu0 %v1605_v44 }
  0x82   :  { %1508 = vmatpush.bf16.msra.mxu0 %v2355_v41  ;;  %1474 = vmatmul.bf16.vlgmr.msrb.gmra.mxu1 %v1609_v48 }
  0x83   :  { %1522 = vmatpush.bf16.msra.mxu1 %v2363_v42  ;;  %1488 = vmatmul.bf16.vlgmr.msrb.gmra.mxu2 %v1613_v47 }
  0x84   :  { %1502 = vmatmul.bf16.vlgmr.msrb.gmra.mxu3 %v1617_v49 }
  0x86   :  { %1509 = vmatpush.bf16.msra.mxu0 %v2354_v50 }
  0x87   :  { %1523 = vmatpush.bf16.msra.mxu1 %v2362_v51 }
  0x8a   :  { %1510 = vmatpush.bf16.msra.mxu0 %v2353_v52 }
  0x8b   :  { %1524 = vmatpush.bf16.msra.mxu1 %v2361_v53 }
  0x8e   :  { %1511 = vmatpush.bf16.msra.mxu0 %v2352_v54 }
  0x8f   :  { %1525 = vmatpush.bf16.msra.mxu1 %v2360_v55 }
  0x92   :  { %1512 = vmatpush.bf16.msra.mxu0 %v2351_v56 }
  0x93   :  { %1526 = vmatpush.bf16.msra.mxu1 %v2359_v57 }
  0x96   :  { %1513 = vmatpush.bf16.msra.mxu0 %v2350_v58 }
  0x97   :  { %1527 = vmatpush.bf16.msra.mxu1 %v2358_v59 }
  0x9a   :  { %1514 = vmatpush.bf16.msra.mxu0 %v2349_v60 }
  0x9b   :  { %1528 = vmatpush.bf16.msra.mxu1 %v2357_v61 }
  0x9e   :  { %1515 = vmatpush.bf16.msra.mxu0 %v2348_v62  ;;  %v1293_v6 = vpop.f32.mrf.mxu0 }
  0x9f   :  { %1529 = vmatpush.bf16.msra.mxu1 %v2356_v1  ;;  %v1307_v7 = vpop.f32.mrf.mxu1  ;;  %v1294_v15 = vadd.f32 %v2364_v12, %v1293_v6 }
  0xa1   :  { %1516 = vmatmul.bf16.vlgmr.msra.gmra.mxu0 %v1621_v4  ;;  %v1308_v18 = vadd.f32 %v1307_v7, %v1294_v15  ;;  %v2365_v7 = vld [vmem:[%s2955_s3] ss:$0 sm:$0xff] }
  0xa2   :  { %1530 = vmatmul.bf16.vlgmr.msra.gmra.mxu1 %v1625_v5 }
  0xa6   :  { %v1321_v8 = vpop.f32.mrf.mxu2  ;;  %v1295_v9 = vpop.f32.mrf.mxu0 }
  0xa7   :  { %v1309_v10 = vpop.f32.mrf.mxu1  ;;  %v1335_v11 = vpop.f32.mrf.mxu3  ;;  %v1322_v20 = vadd.f32 %v1321_v8, %v1308_v18  ;;  %v1296_v24 = vadd.f32 %v2364_v12, %v1295_v9 }
  0xa9   :  { %v1336_v25 = vadd.f32 %v1335_v11, %v1322_v20  ;;  %v1310_v26 = vadd.f32 %v1309_v10, %v1296_v24  ;;  %v2366_v10 = vld [vmem:[%s2956_s4] ss:$0 sm:$0xff] }
  0xae   :  { %v1323_v13 = vpop.f32.mrf.mxu2 }
  0xaf   :  { %v1337_v17 = vpop.f32.mrf.mxu3  ;;  %v1324_v31 = vadd.f32 %v1323_v13, %v1310_v26 }
  0xb1   :  { %v1338_v34 = vadd.f32 %v1337_v17, %v1324_v31 }
  0xbe   :  { %v1349_v14 = vpop.f32.mrf.mxu0 }
  0xbf   :  { %v1363_v16 = vpop.f32.mrf.mxu1  ;;  %v1350_v27 = vadd.f32 %v1349_v14, %v1336_v25 }
  0xc1   :  { %v1364_v32 = vadd.f32 %v1363_v16, %v1350_v27 }
  0xc6   :  { %v1377_v19 = vpop.f32.mrf.mxu2  ;;  %v1351_v21 = vpop.f32.mrf.mxu0 }
  0xc7   :  { %v1365_v22 = vpop.f32.mrf.mxu1  ;;  %v1391_v23 = vpop.f32.mrf.mxu3  ;;  %v1378_v35 = vadd.f32 %v1377_v19, %v1364_v32  ;;  %v1352_v37 = vadd.f32 %v1351_v21, %v1338_v34 }
  0xc9   :  { %v1392_v39 = vadd.f32 %v1391_v23, %v1378_v35  ;;  %v1366_v42 = vadd.f32 %v1365_v22, %v1352_v37 }
  0xce   :  { %v1379_v28 = vpop.f32.mrf.mxu2 }
  0xcf   :  { %v1393_v33 = vpop.f32.mrf.mxu3  ;;  %v1380_v44 = vadd.f32 %v1379_v28, %v1366_v42 }
  0xd1   :  { %v1394_v48 = vadd.f32 %v1393_v33, %v1380_v44 }
  0xde   :  { %v1405_v29 = vpop.f32.mrf.mxu0 }
  0xdf   :  { %v1419_v30 = vpop.f32.mrf.mxu1  ;;  %v1406_v43 = vadd.f32 %v1405_v29, %v1392_v39 }
  0xe1   :  { %v1420_v45 = vadd.f32 %v1419_v30, %v1406_v43 }
  0xe6   :  { %v1433_v36 = vpop.f32.mrf.mxu2  ;;  %v1407_v38 = vpop.f32.mrf.mxu0 }
  0xe7   :  { %v1421_v40 = vpop.f32.mrf.mxu1  ;;  %v1447_v41 = vpop.f32.mrf.mxu3  ;;  %v1434_v49 = vadd.f32 %v1433_v36, %v1420_v45  ;;  %v1408_v51 = vadd.f32 %v1407_v38, %v1394_v48 }
  0xe9   :  { %v1448_v53 = vadd.f32 %v1447_v41, %v1434_v49  ;;  %v1422_v54 = vadd.f32 %v1421_v40, %v1408_v51 }
  0xee   :  { %v1435_v46 = vpop.f32.mrf.mxu2 }
  0xef   :  { %v1449_v52 = vpop.f32.mrf.mxu3  ;;  %v1436_v57 = vadd.f32 %v1435_v46, %v1422_v54 }
  0xf1   :  { %v1450_v62 = vadd.f32 %v1449_v52, %v1436_v57 }
  0xfe   :  { %v1461_v47 = vpop.f32.mrf.mxu0 }
  0xff   :  { %v1475_v50 = vpop.f32.mrf.mxu1  ;;  %v1462_v55 = vadd.f32 %v1461_v47, %v1448_v53 }
 0x101   :  { %v1476_v59 = vadd.f32 %v1475_v50, %v1462_v55 }
 0x106   :  { %v1489_v56 = vpop.f32.mrf.mxu2  ;;  %v1463_v58 = vpop.f32.mrf.mxu0 }
 0x107   :  { %v1477_v60 = vpop.f32.mrf.mxu1  ;;  %v1503_v61 = vpop.f32.mrf.mxu3  ;;  %v1490_v63 = vadd.f32 %v1489_v56, %v1476_v59  ;;  %v1464_v0 = vadd.f32 %v1463_v58, %v1450_v62 }
 0x109   :  { %v1504_v1 = vadd.f32 %v1503_v61, %v1490_v63  ;;  %v1478_v4 = vadd.f32 %v1477_v60, %v1464_v0 }
 0x10e   :  { %v1491_v2 = vpop.f32.mrf.mxu2 }
 0x10f   :  { %v1492_v8 = vadd.f32 %v1491_v2, %v1478_v4  ;;  %v1505_v11 = vpop.f32.mrf.mxu3 }
 0x111   :  { %v1506_v13 = vadd.f32 %v1505_v11, %v1492_v8 }
 0x11e   :  { %v1517_v3 = vpop.f32.mrf.mxu0 }
 0x11f   :  { %v1518_v5 = vadd.f32 %v1517_v3, %v1504_v1  ;;  %v1531_v6 = vpop.f32.mrf.mxu1 }
 0x121   :  { %v1532_v9 = vadd.f32 %v1531_v6, %v1518_v5 }
 0x123   :  { %v1540_v12 = vmax.f32 %v1532_v9, %v2365_v7 }
 0x125   :  { %v1546_v14 = vmin.f32 %v1540_v12, %v2366_v10 }
 0x126   :  { %v1519_v15 = vpop.f32.mrf.mxu0 }
 0x127   :  { %1548 = vst [vmem:[%s2957_s5] sm:$0xff] %v1546_v14  ;;  %v1520_v16 = vadd.f32 %v1519_v15, %v1506_v13  ;;  %v1533_v17 = vpop.f32.mrf.mxu1 }
 0x129   :  { %v1534_v18 = vadd.f32 %v1533_v17, %v1520_v16 }
 0x12b   :  { %v1541_v19 = vmax.f32 %v1534_v18, %v2365_v7 }
 0x12d   :  { %v1547_v20 = vmin.f32 %v1541_v19, %v2366_v10 }
 0x12f   :  { %1549 = vst [vmem:[%s2957_s5 + $0x8] sm:$0xff] %v1547_v20 }

</bundles_post_ra>
